<compile_context>
chip_gen: v5e
topology: v5e:2x2
jax: 0.10.0
libtpu: 0.0.40
codegen_flags: <defaults>
</compile_context>

<pallas_src>
import functools

import jax
import jax.numpy as jnp
from jax import lax
from jax.experimental import pallas as pl
from jax.experimental.pallas import tpu as pltpu


# ----------------------------- fused Pallas kernel ----------------------------- #

def _cnnrul_kernel(mask_ref, x_ref, *refs, n_conv, relu_flags, kh, kw, H, W, B):
    """Fused CNNRUL forward for B batch samples (grid is over batch blocks).

    Ref order (after mask_ref, x_ref):
      [w_i, b_i] * n_conv : (Cout_i, Kpad_i), (Cout_i, 1)      -- im2col weights
      [w_j, b_j] * n_lin  : (Fin_j, Fout_j), (1, Fout_j)
      o_ref               : (Fout_last, B)                      -- lane-dense out
      pad_ref  (scratch)  : (Cmax, B*HW + left + right)         -- halo staging
      s_ref    (scratch)  : (Kmax, B*HW)                        -- im2col rows
      a_ref    (scratch)  : (C_last, B*HW)                      -- last conv out
      flat_ref (scratch)  : (B, C_last*HW)                      -- head input
    """
    n_lin = len(relu_flags)
    conv_refs = refs[:2 * n_conv]
    lin_refs = refs[2 * n_conv:2 * n_conv + 2 * n_lin]
    o_ref = refs[2 * n_conv + 2 * n_lin]
    pad_ref, s_ref, a_ref, flat_ref = refs[2 * n_conv + 2 * n_lin + 1:]

    HW = H * W
    BHW = B * HW
    oh, ow = (kh - 1) // 2, (kw - 1) // 2
    left = oh * W + ow
    right = (kh - 1 - oh) * W + (kw - 1 - ow)
    taps = kh * kw

    # Zero only the halo strips (cheap; boundary taps are masked anyway, this just
    # keeps uninitialised VMEM out of the data path).  Runs every step: scratch is
    # per-core on megacore parts, so a program_id==0 guard would be wrong.
    prows = pad_ref.shape[0]
    if left > 0:
        pad_ref[:, 0:left] = jnp.zeros((prows, left), jnp.float32)
    if right > 0:
        pad_ref[:, left + BHW:left + BHW + right] = jnp.zeros(
            (prows, right), jnp.float32)

    act = x_ref[...]                                    # (cin0, B*HW)

    # ---- Conv2d(stride=1, padding='same') + ReLU: im2col + one MXU matmul ---- #
    for li in range(n_conv):
        w_ref = conv_refs[2 * li]                       # (cout, k_pad)
        b_col = conv_refs[2 * li + 1][...]              # (cout, 1)
        cin = act.shape[0]
        k_real = taps * cin
        k_pad = w_ref.shape[1]

        # Stage activation once; every tap becomes a static lane-offset slice.
        pad_ref[0:cin, left:left + BHW] = act

        for dh in range(kh):
            for dw in range(kw):
                t = dh * kw + dw
                s = (dh - oh) * W + (dw - ow)
                sh = pad_ref[0:cin, left + s:left + s + BHW]      # (cin, B*HW)
                if not (dh == oh and dw == ow):
                    m = mask_ref[t:t + 1, :]                      # (1, B*HW) 0/1
                    sh = jnp.where(m != 0.0, sh, 0.0)
                s_ref[t * cin:(t + 1) * cin, :] = sh

        if k_pad > k_real:                      # zero rows matching padded-K cols
            s_ref[k_real:k_pad, :] = jnp.zeros((k_pad - k_real, BHW), jnp.float32)

        acc = jnp.dot(w_ref[...], s_ref[0:k_pad, :],
                      preferred_element_type=jnp.float32)         # (cout, B*HW)
        act = jnp.maximum(acc + b_col, 0.0)

    # ---- Flatten: (c, b*HW + p) -> (b, c*HW + p)  == torch NCHW flatten ------- #
    c_last = act.shape[0]
    a_ref[...] = act
    for b in range(B):
        for c in range(c_last):
            flat_ref[b:b + 1, c * HW:(c + 1) * HW] = \
                a_ref[c:c + 1, b * HW:(b + 1) * HW]

    # ---- Dense head: one (B, flat) matmul per Linear ------------------------- #
    vec = flat_ref[...]                                 # (B, c_last*HW)
    for lj in range(n_lin):
        wl_ref = lin_refs[2 * lj]                       # (fin, fout)
        b_row = lin_refs[2 * lj + 1][...]               # (1, fout)
        vec = jnp.dot(vec, wl_ref[...], preferred_element_type=jnp.float32) + b_row
        if relu_flags[lj]:
            vec = jnp.maximum(vec, 0.0)
        # TODO(synk): Dropout(0.5) after the ReLU linear is inference identity.

    # Lane-dense output: samples on the lane axis.
    if o_ref.shape[0] == 1 and vec.shape[1] == 1:
        for b in range(B):                              # tiny per-sample scatter
            o_ref[0:1, b:b + 1] = vec[b:b + 1, 0:1]
    else:
        o_ref[...] = jnp.transpose(vec)                 # (fout_last, B)


# ------------------------------ JAX wrappers ------------------------------ #

def prepare_fused_params(params, kh, kw):
    """Convert standard-layout params into the kernel's im2col / matmul layout."""
    convs = []
    for (w, b) in params["convs"]:                      # w: (kh, kw, cin, cout)
        kh_, kw_, cin, cout = w.shape
        # W_mat[co, (dh*kw + dw)*cin + ci] = w[dh, dw, ci, co]
        w_mat = jnp.transpose(w, (3, 0, 1, 2)).reshape(cout, kh_ * kw_ * cin)
        k_real = kh_ * kw_ * cin
        k_pad = -(-k_real // 8) * 8                     # round K up to sublanes
        if k_pad != k_real:
            w_mat = jnp.concatenate(
                [w_mat, jnp.zeros((cout, k_pad - k_real), w_mat.dtype)], axis=1)
        convs.append((w_mat, b.reshape(cout, 1)))
    linears = []
    relu_flags = []
    for (w, b, relu) in params["linears"]:              # w: (fin, fout)
        linears.append((w, b.reshape(1, -1)))
        relu_flags.append(bool(relu))
    return {"convs": convs, "linears": linears}, tuple(relu_flags)


def _make_tap_masks(kh, kw, H, W, B):
    """(kh*kw, B*HW) 0/1 masks: which destination lanes a given tap may read."""
    HW = H * W
    oh, ow = (kh - 1) // 2, (kw - 1) // 2
    q = jnp.arange(B * HW, dtype=jnp.int32)
    p = q % HW
    h = p // W
    w = p % W
    rows = []
    for dh in range(kh):
        for dw in range(kw):
            dhh, dww = dh - oh, dw - ow
            ok = (h + dhh >= 0) & (h + dhh < H) & (w + dww >= 0) & (w + dww < W)
            rows.append(ok.astype(jnp.float32))
    return jnp.stack(rows, axis=0)


def cnnrul_forward_fused(weights, x_nchw, *, kh, kw, relu_flags, batch_block=8):
    """Single-pallas_call fused forward; B samples per grid step."""
    N, cin0, H, W = x_nchw.shape
    HW = H * W
    B = batch_block
    n_steps = -(-N // B)
    Np = n_steps * B

    x = x_nchw.reshape(N, cin0, HW)
    if Np != N:
        x = jnp.concatenate([x, jnp.zeros((Np - N, cin0, HW), x.dtype)], axis=0)
    # Layout plumbing (wrapper-side): channels on sublanes, (sample, spatial)
    # flattened on the lane axis -> (cin0, Np*HW).
    x_lanes = jnp.transpose(x, (1, 0, 2)).reshape(cin0, Np * HW)

    conv_args = weights["convs"]
    lin_args = weights["linears"]
    n_conv = len(conv_args)
    n_lin = len(lin_args)
    assert n_lin == len(relu_flags)

    oh, ow = (kh - 1) // 2, (kw - 1) // 2
    left = oh * W + ow
    right = (kh - 1 - oh) * W + (kw - 1 - ow)
    taps = kh * kw

    conv_in_ch = [cin0] + [b.shape[0] for (_, b) in conv_args[:-1]]
    cmax = max(conv_in_ch) if n_conv else cin0
    c_last = conv_args[-1][1].shape[0] if n_conv else cin0
    flat_dim = c_last * HW
    fout_last = lin_args[-1][0].shape[1] if n_lin else flat_dim
    s_rows = max((w.shape[1] for (w, _) in conv_args), default=8)

    masks = _make_tap_masks(kh, kw, H, W, B)

    operands = [masks, x_lanes]
    in_specs = [pl.BlockSpec((taps, B * HW), lambda n: (0, 0)),
                pl.BlockSpec((cin0, B * HW), lambda n: (0, n))]
    for (w_mat, b_col) in conv_args:          # constant index_map -> VMEM-resident
        operands += [w_mat, b_col]
        in_specs += [pl.BlockSpec(w_mat.shape, lambda n: (0, 0)),
                     pl.BlockSpec(b_col.shape, lambda n: (0, 0))]
    for (w, b_row) in lin_args:
        operands += [w, b_row]
        in_specs += [pl.BlockSpec(w.shape, lambda n: (0, 0)),
                     pl.BlockSpec(b_row.shape, lambda n: (0, 0))]

    kernel = functools.partial(
        _cnnrul_kernel, n_conv=n_conv, relu_flags=tuple(relu_flags),
        kh=kh, kw=kw, H=H, W=W, B=B)

    out = pl.pallas_call(
        kernel,
        out_shape=jax.ShapeDtypeStruct((n_steps, fout_last, B), jnp.float32),
        grid=(n_steps,),
        in_specs=in_specs,
        out_specs=pl.BlockSpec((None, fout_last, B), lambda n: (n, 0, 0)),
        scratch_shapes=[
            pltpu.VMEM((cmax, B * HW + left + right), jnp.float32),  # halo staging
            pltpu.VMEM((s_rows, B * HW), jnp.float32),               # im2col rows
            pltpu.VMEM((c_last, B * HW), jnp.float32),               # last conv out
            pltpu.VMEM((B, flat_dim), jnp.float32),                  # head input
        ],
        compiler_params=pltpu.CompilerParams(
            dimension_semantics=("parallel",)),
    )(*operands)

    # (steps, F, B) -> (N, F)
    out = jnp.transpose(out, (0, 2, 1)).reshape(Np, fout_last)
    return out[:N]


# --------------------------- Parameter construction ------------------------ #

def init_params(key, kh, kw, conv_cfg, lin_cfg):
    """kaiming_normal_(nonlinearity='relu') -> std = sqrt(2/fan_in); bias = 0."""
    params = {"convs": [], "linears": []}
    for (cin, cout) in conv_cfg:
        key, sub = jax.random.split(key)
        fan_in = cin * kh * kw
        w = jax.random.normal(sub, (kh, kw, cin, cout), jnp.float32) * jnp.sqrt(2.0 / fan_in)
        b = jnp.zeros((cout,), jnp.float32)
        params["convs"].append((w, b))
    for (fin, fout, relu) in lin_cfg:
        key, sub = jax.random.split(key)
        w = jax.random.normal(sub, (fin, fout), jnp.float32) * jnp.sqrt(2.0 / fin)
        b = jnp.zeros((fout,), jnp.float32)
        params["linears"].append((w, b, relu))
    return params


# --------------------------- Pure-JAX reference ---------------------------- #

def reference_forward(params, x_nchw, kh, kw):
    out = x_nchw
    for (w, b) in params["convs"]:
        w_oihw = jnp.transpose(w, (3, 2, 0, 1))          # (Cout, Cin, kh, kw)
        out = lax.conv_general_dilated(
            out, w_oihw, window_strides=(1, 1), padding="SAME",
            dimension_numbers=("NCHW", "OIHW", "NCHW"))
        out = jnp.maximum(out + b[None, :, None, None], 0.0)
    out = out.reshape(out.shape[0], -1)
    for (w, b, relu) in params["linears"]:
        out = out @ w + b[None, :]
        if relu:
            out = jnp.maximum(out, 0.0)
    return out


# ----------------------------------- main ----------------------------------- #

if __name__ == "__main__":
    key = jax.random.PRNGKey(0)

    # Shapes consistent with the module: 1 input channel, time-window height=16,
    # sensor-feature width=8 (H*W = 128, lane dense).  N=16 with B=8 per grid
    # step -> 2 steps (keeps the v7x megacore split active).
    N, C, H, W = 16, 1, 16, 8
    kh, kw = 3, 3
    B = 8

    conv_cfg = [(1, 8), (8, 8)]                       # ('C',1,8), ('C',8,8)
    flat = 8 * H * W                                  # 1024
    lin_cfg = [(flat, 32, True), (32, 1, False)]      # ('L',...,True), ('L',...,False)

    key, kx = jax.random.split(key)
    x = jax.random.normal(kx, (N, C, H, W), jnp.float32)

    params = init_params(key, kh, kw, conv_cfg, lin_cfg)
    weights, relu_flags = prepare_fused_params(params, kh, kw)

    fwd = jax.jit(functools.partial(
        cnnrul_forward_fused, kh=kh, kw=kw, relu_flags=relu_flags,
        batch_block=B))

    out = jax.block_until_ready(fwd(weights, x))
    ref = reference_forward(params, x, kh, kw)

    assert out.shape == (N, 1)
    assert jnp.allclose(out, ref, atol=1e-3, rtol=1e-3), \
        float(jnp.max(jnp.abs(out - ref)))

    print("KERNEL_OK")
</pallas_src>

<mosaic_0001>
module attributes {stable_mosaic.version = 11 : i64} {
  func.func @_cnnrul_kernel(%arg0: i32, %arg1: memref<9x1024xf32, #tpu.memory_space<vmem>>, %arg2: memref<1x1024xf32, #tpu.memory_space<vmem>>, %arg3: memref<8x16xf32, #tpu.memory_space<vmem>>, %arg4: memref<8x1xf32, #tpu.memory_space<vmem>>, %arg5: memref<8x72xf32, #tpu.memory_space<vmem>>, %arg6: memref<8x1xf32, #tpu.memory_space<vmem>>, %arg7: memref<1024x32xf32, #tpu.memory_space<vmem>>, %arg8: memref<1x32xf32, #tpu.memory_space<vmem>>, %arg9: memref<32x1xf32, #tpu.memory_space<vmem>>, %arg10: memref<1x1xf32, #tpu.memory_space<vmem>>, %arg11: memref<1x1x8xf32, #tpu.memory_space<vmem>>, %arg12: memref<8x1042xf32, #tpu.memory_space<vmem>>, %arg13: memref<72x1024xf32, #tpu.memory_space<vmem>>, %arg14: memref<8x1024xf32, #tpu.memory_space<vmem>>, %arg15: memref<8x1024xf32, #tpu.memory_space<vmem>>) attributes {dimension_semantics = [#tpu.dimension_semantics<parallel>], iteration_bounds = array<i64: 2>, scalar_prefetch = 0 : i64, scratch_operands = 4 : i64, tpu.core_type = #tpu.core_type<tc>, window_params = [{pipeline_mode = #tpu.pipeline_mode<synchronous>, transform_indices = @transform_0, window_bounds = array<i64: 9, 1024>}, {transform_indices = @transform_1, window_bounds = array<i64: 1, 1024>}, {pipeline_mode = #tpu.pipeline_mode<synchronous>, transform_indices = @transform_2, window_bounds = array<i64: 8, 16>}, {pipeline_mode = #tpu.pipeline_mode<synchronous>, transform_indices = @transform_3, window_bounds = array<i64: 8, 1>}, {pipeline_mode = #tpu.pipeline_mode<synchronous>, transform_indices = @transform_4, window_bounds = array<i64: 8, 72>}, {pipeline_mode = #tpu.pipeline_mode<synchronous>, transform_indices = @transform_5, window_bounds = array<i64: 8, 1>}, {pipeline_mode = #tpu.pipeline_mode<synchronous>, transform_indices = @transform_6, window_bounds = array<i64: 1024, 32>}, {pipeline_mode = #tpu.pipeline_mode<synchronous>, transform_indices = @transform_7, window_bounds = array<i64: 1, 32>}, {pipeline_mode = #tpu.pipeline_mode<synchronous>, transform_indices = @transform_8, window_bounds = array<i64: 32, 1>}, {pipeline_mode = #tpu.pipeline_mode<synchronous>, transform_indices = @transform_9, window_bounds = array<i64: 1, 1>}, {transform_indices = @transform_10, window_bounds = array<i64: 1, 1, 8>}]} {
    %cst = arith.constant 0.000000e+00 : f32
    %0 = vector.broadcast %cst : f32 to vector<8x9xf32>
    %c0 = arith.constant 0 : index
    %c0_0 = arith.constant 0 : index
    %1 = vector.load %arg12[%c0, %c0_0] : memref<8x1042xf32, #tpu.memory_space<vmem>>, vector<8x9xf32>
    tpu.vector_store %arg12[%c0, %c0_0], %0 {strides = array<i32>} : memref<8x1042xf32, #tpu.memory_space<vmem>>, vector<8x9xf32>,
    %cst_1 = arith.constant 0.000000e+00 : f32
    %2 = vector.broadcast %cst_1 : f32 to vector<8x9xf32>
    %c0_2 = arith.constant 0 : index
    %c1033 = arith.constant 1033 : index
    %3 = vector.load %arg12[%c0_2, %c1033] : memref<8x1042xf32, #tpu.memory_space<vmem>>, vector<8x9xf32>
    tpu.vector_store %arg12[%c0_2, %c1033], %2 {strides = array<i32>} : memref<8x1042xf32, #tpu.memory_space<vmem>>, vector<8x9xf32>,
    %c0_3 = arith.constant 0 : index
    %c0_4 = arith.constant 0 : index
    %4 = vector.load %arg2[%c0_3, %c0_4] : memref<1x1024xf32, #tpu.memory_space<vmem>>, vector<1x1024xf32>
    %c0_5 = arith.constant 0 : index
    %c0_6 = arith.constant 0 : index
    %5 = vector.load %arg4[%c0_5, %c0_6] : memref<8x1xf32, #tpu.memory_space<vmem>>, vector<8x1xf32>
    %c0_7 = arith.constant 0 : index
    %c9 = arith.constant 9 : index
    %6 = vector.load %arg12[%c0_7, %c9] : memref<8x1042xf32, #tpu.memory_space<vmem>>, vector<1x1024xf32>
    tpu.vector_store %arg12[%c0_7, %c9], %4 {strides = array<i32>} : memref<8x1042xf32, #tpu.memory_space<vmem>>, vector<1x1024xf32>,
    %c0_8 = arith.constant 0 : index
    %c0_9 = arith.constant 0 : index
    %7 = vector.load %arg12[%c0_8, %c0_9] : memref<8x1042xf32, #tpu.memory_space<vmem>>, vector<1x1024xf32>
    %c0_10 = arith.constant 0 : index
    %c0_11 = arith.constant 0 : index
    %8 = vector.load %arg1[%c0_10, %c0_11] : memref<9x1024xf32, #tpu.memory_space<vmem>>, vector<1x1024xf32>
    %cst_12 = arith.constant 0.000000e+00 : f32
    %9 = vector.broadcast %cst_12 : f32 to vector<1x1024xf32>
    %10 = arith.cmpf one, %8, %9 : vector<1x1024xf32>
    %cst_13 = arith.constant 0.000000e+00 : f32
    %11 = vector.broadcast %cst_13 : f32 to vector<1x1024xf32>
    %12 = arith.select %10, %7, %11 : vector<1x1024xi1>, vector<1x1024xf32>
    %c0_14 = arith.constant 0 : index
    %c0_15 = arith.constant 0 : index
    %13 = vector.load %arg13[%c0_14, %c0_15] : memref<72x1024xf32, #tpu.memory_space<vmem>>, vector<1x1024xf32>
    tpu.vector_store %arg13[%c0_14, %c0_15], %12 {strides = array<i32>} : memref<72x1024xf32, #tpu.memory_space<vmem>>, vector<1x1024xf32>,
    %c0_16 = arith.constant 0 : index
    %c1 = arith.constant 1 : index
    %14 = vector.load %arg12[%c0_16, %c1] : memref<8x1042xf32, #tpu.memory_space<vmem>>, vector<1x1024xf32>
    %c1_17 = arith.constant 1 : index
    %c0_18 = arith.constant 0 : index
    %15 = vector.load %arg1[%c1_17, %c0_18] : memref<9x1024xf32, #tpu.memory_space<vmem>>, vector<1x1024xf32>
    %cst_19 = arith.constant 0.000000e+00 : f32
    %16 = vector.broadcast %cst_19 : f32 to vector<1x1024xf32>
    %17 = arith.cmpf one, %15, %16 : vector<1x1024xf32>
    %cst_20 = arith.constant 0.000000e+00 : f32
    %18 = vector.broadcast %cst_20 : f32 to vector<1x1024xf32>
    %19 = arith.select %17, %14, %18 : vector<1x1024xi1>, vector<1x1024xf32>
    %c1_21 = arith.constant 1 : index
    %c0_22 = arith.constant 0 : index
    %20 = vector.load %arg13[%c1_21, %c0_22] : memref<72x1024xf32, #tpu.memory_space<vmem>>, vector<1x1024xf32>
    tpu.vector_store %arg13[%c1_21, %c0_22], %19 {strides = array<i32>} : memref<72x1024xf32, #tpu.memory_space<vmem>>, vector<1x1024xf32>,
    %c0_23 = arith.constant 0 : index
    %c2 = arith.constant 2 : index
    %21 = vector.load %arg12[%c0_23, %c2] : memref<8x1042xf32, #tpu.memory_space<vmem>>, vector<1x1024xf32>
    %c2_24 = arith.constant 2 : index
    %c0_25 = arith.constant 0 : index
    %22 = vector.load %arg1[%c2_24, %c0_25] : memref<9x1024xf32, #tpu.memory_space<vmem>>, vector<1x1024xf32>
    %cst_26 = arith.constant 0.000000e+00 : f32
    %23 = vector.broadcast %cst_26 : f32 to vector<1x1024xf32>
    %24 = arith.cmpf one, %22, %23 : vector<1x1024xf32>
    %cst_27 = arith.constant 0.000000e+00 : f32
    %25 = vector.broadcast %cst_27 : f32 to vector<1x1024xf32>
    %26 = arith.select %24, %21, %25 : vector<1x1024xi1>, vector<1x1024xf32>
    %c2_28 = arith.constant 2 : index
    %c0_29 = arith.constant 0 : index
    %27 = vector.load %arg13[%c2_28, %c0_29] : memref<72x1024xf32, #tpu.memory_space<vmem>>, vector<1x1024xf32>
    tpu.vector_store %arg13[%c2_28, %c0_29], %26 {strides = array<i32>} : memref<72x1024xf32, #tpu.memory_space<vmem>>, vector<1x1024xf32>,
    %c0_30 = arith.constant 0 : index
    %c8 = arith.constant 8 : index
    %28 = vector.load %arg12[%c0_30, %c8] : memref<8x1042xf32, #tpu.memory_space<vmem>>, vector<1x1024xf32>
    %c3 = arith.constant 3 : index
    %c0_31 = arith.constant 0 : index
    %29 = vector.load %arg1[%c3, %c0_31] : memref<9x1024xf32, #tpu.memory_space<vmem>>, vector<1x1024xf32>
    %cst_32 = arith.constant 0.000000e+00 : f32
    %30 = vector.broadcast %cst_32 : f32 to vector<1x1024xf32>
    %31 = arith.cmpf one, %29, %30 : vector<1x1024xf32>
    %cst_33 = arith.constant 0.000000e+00 : f32
    %32 = vector.broadcast %cst_33 : f32 to vector<1x1024xf32>
    %33 = arith.select %31, %28, %32 : vector<1x1024xi1>, vector<1x1024xf32>
    %c3_34 = arith.constant 3 : index
    %c0_35 = arith.constant 0 : index
    %34 = vector.load %arg13[%c3_34, %c0_35] : memref<72x1024xf32, #tpu.memory_space<vmem>>, vector<1x1024xf32>
    tpu.vector_store %arg13[%c3_34, %c0_35], %33 {strides = array<i32>} : memref<72x1024xf32, #tpu.memory_space<vmem>>, vector<1x1024xf32>,
    %c0_36 = arith.constant 0 : index
    %c9_37 = arith.constant 9 : index
    %35 = vector.load %arg12[%c0_36, %c9_37] : memref<8x1042xf32, #tpu.memory_space<vmem>>, vector<1x1024xf32>
    %c4 = arith.constant 4 : index
    %c0_38 = arith.constant 0 : index
    %36 = vector.load %arg13[%c4, %c0_38] : memref<72x1024xf32, #tpu.memory_space<vmem>>, vector<1x1024xf32>
    tpu.vector_store %arg13[%c4, %c0_38], %35 {strides = array<i32>} : memref<72x1024xf32, #tpu.memory_space<vmem>>, vector<1x1024xf32>,
    %c0_39 = arith.constant 0 : index
    %c10 = arith.constant 10 : index
    %37 = vector.load %arg12[%c0_39, %c10] : memref<8x1042xf32, #tpu.memory_space<vmem>>, vector<1x1024xf32>
    %c5 = arith.constant 5 : index
    %c0_40 = arith.constant 0 : index
    %38 = vector.load %arg1[%c5, %c0_40] : memref<9x1024xf32, #tpu.memory_space<vmem>>, vector<1x1024xf32>
    %cst_41 = arith.constant 0.000000e+00 : f32
    %39 = vector.broadcast %cst_41 : f32 to vector<1x1024xf32>
    %40 = arith.cmpf one, %38, %39 : vector<1x1024xf32>
    %cst_42 = arith.constant 0.000000e+00 : f32
    %41 = vector.broadcast %cst_42 : f32 to vector<1x1024xf32>
    %42 = arith.select %40, %37, %41 : vector<1x1024xi1>, vector<1x1024xf32>
    %c5_43 = arith.constant 5 : index
    %c0_44 = arith.constant 0 : index
    %43 = vector.load %arg13[%c5_43, %c0_44] : memref<72x1024xf32, #tpu.memory_space<vmem>>, vector<1x1024xf32>
    tpu.vector_store %arg13[%c5_43, %c0_44], %42 {strides = array<i32>} : memref<72x1024xf32, #tpu.memory_space<vmem>>, vector<1x1024xf32>,
    %c0_45 = arith.constant 0 : index
    %c16 = arith.constant 16 : index
    %44 = vector.load %arg12[%c0_45, %c16] : memref<8x1042xf32, #tpu.memory_space<vmem>>, vector<1x1024xf32>
    %c6 = arith.constant 6 : index
    %c0_46 = arith.constant 0 : index
    %45 = vector.load %arg1[%c6, %c0_46] : memref<9x1024xf32, #tpu.memory_space<vmem>>, vector<1x1024xf32>
    %cst_47 = arith.constant 0.000000e+00 : f32
    %46 = vector.broadcast %cst_47 : f32 to vector<1x1024xf32>
    %47 = arith.cmpf one, %45, %46 : vector<1x1024xf32>
    %cst_48 = arith.constant 0.000000e+00 : f32
    %48 = vector.broadcast %cst_48 : f32 to vector<1x1024xf32>
    %49 = arith.select %47, %44, %48 : vector<1x1024xi1>, vector<1x1024xf32>
    %c6_49 = arith.constant 6 : index
    %c0_50 = arith.constant 0 : index
    %50 = vector.load %arg13[%c6_49, %c0_50] : memref<72x1024xf32, #tpu.memory_space<vmem>>, vector<1x1024xf32>
    tpu.vector_store %arg13[%c6_49, %c0_50], %49 {strides = array<i32>} : memref<72x1024xf32, #tpu.memory_space<vmem>>, vector<1x1024xf32>,
    %c0_51 = arith.constant 0 : index
    %c17 = arith.constant 17 : index
    %51 = vector.load %arg12[%c0_51, %c17] : memref<8x1042xf32, #tpu.memory_space<vmem>>, vector<1x1024xf32>
    %c7 = arith.constant 7 : index
    %c0_52 = arith.constant 0 : index
    %52 = vector.load %arg1[%c7, %c0_52] : memref<9x1024xf32, #tpu.memory_space<vmem>>, vector<1x1024xf32>
    %cst_53 = arith.constant 0.000000e+00 : f32
    %53 = vector.broadcast %cst_53 : f32 to vector<1x1024xf32>
    %54 = arith.cmpf one, %52, %53 : vector<1x1024xf32>
    %cst_54 = arith.constant 0.000000e+00 : f32
    %55 = vector.broadcast %cst_54 : f32 to vector<1x1024xf32>
    %56 = arith.select %54, %51, %55 : vector<1x1024xi1>, vector<1x1024xf32>
    %c7_55 = arith.constant 7 : index
    %c0_56 = arith.constant 0 : index
    %57 = vector.load %arg13[%c7_55, %c0_56] : memref<72x1024xf32, #tpu.memory_space<vmem>>, vector<1x1024xf32>
    tpu.vector_store %arg13[%c7_55, %c0_56], %56 {strides = array<i32>} : memref<72x1024xf32, #tpu.memory_space<vmem>>, vector<1x1024xf32>,
    %c0_57 = arith.constant 0 : index
    %c18 = arith.constant 18 : index
    %58 = vector.load %arg12[%c0_57, %c18] : memref<8x1042xf32, #tpu.memory_space<vmem>>, vector<1x1024xf32>
    %c8_58 = arith.constant 8 : index
    %c0_59 = arith.constant 0 : index
    %59 = vector.load %arg1[%c8_58, %c0_59] : memref<9x1024xf32, #tpu.memory_space<vmem>>, vector<1x1024xf32>
    %cst_60 = arith.constant 0.000000e+00 : f32
    %60 = vector.broadcast %cst_60 : f32 to vector<1x1024xf32>
    %61 = arith.cmpf one, %59, %60 : vector<1x1024xf32>
    %cst_61 = arith.constant 0.000000e+00 : f32
    %62 = vector.broadcast %cst_61 : f32 to vector<1x1024xf32>
    %63 = arith.select %61, %58, %62 : vector<1x1024xi1>, vector<1x1024xf32>
    %c8_62 = arith.constant 8 : index
    %c0_63 = arith.constant 0 : index
    %64 = vector.load %arg13[%c8_62, %c0_63] : memref<72x1024xf32, #tpu.memory_space<vmem>>, vector<1x1024xf32>
    tpu.vector_store %arg13[%c8_62, %c0_63], %63 {strides = array<i32>} : memref<72x1024xf32, #tpu.memory_space<vmem>>, vector<1x1024xf32>,
    %cst_64 = arith.constant 0.000000e+00 : f32
    %65 = vector.broadcast %cst_64 : f32 to vector<7x1024xf32>
    %c9_65 = arith.constant 9 : index
    %c0_66 = arith.constant 0 : index
    %66 = vector.load %arg13[%c9_65, %c0_66] : memref<72x1024xf32, #tpu.memory_space<vmem>>, vector<7x1024xf32>
    tpu.vector_store %arg13[%c9_65, %c0_66], %65 {strides = array<i32>} : memref<72x1024xf32, #tpu.memory_space<vmem>>, vector<7x1024xf32>,
    %c0_67 = arith.constant 0 : index
    %c0_68 = arith.constant 0 : index
    %67 = vector.load %arg3[%c0_67, %c0_68] : memref<8x16xf32, #tpu.memory_space<vmem>>, vector<8x16xf32>
    %c0_69 = arith.constant 0 : index
    %c0_70 = arith.constant 0 : index
    %68 = vector.load %arg13[%c0_69, %c0_70] : memref<72x1024xf32, #tpu.memory_space<vmem>>, vector<16x1024xf32>
    %cst_71 = arith.constant dense<0.000000e+00> : vector<8x1024xf32>
    %69 = tpu.matmul %67, %68, %cst_71 {dimension_numbers = #tpu.dot_dimension_numbers<[1], [0], [0], [1], [0, 0, 1, 1], [], []>} : vector<8x16xf32>, vector<16x1024xf32>, vector<8x1024xf32> -> vector<8x1024xf32>
    %70 = vector.broadcast %5 : vector<8x1xf32> to vector<8x1024xf32>
    %71 = arith.addf %69, %70 : vector<8x1024xf32>
    %cst_72 = arith.constant 0.000000e+00 : f32
    %72 = vector.broadcast %cst_72 : f32 to vector<8x1024xf32>
    %73 = arith.maximumf %71, %72 : vector<8x1024xf32>
    %c0_73 = arith.constant 0 : index
    %c0_74 = arith.constant 0 : index
    %74 = vector.load %arg6[%c0_73, %c0_74] : memref<8x1xf32, #tpu.memory_space<vmem>>, vector<8x1xf32>
    %c0_75 = arith.constant 0 : index
    %c9_76 = arith.constant 9 : index
    %75 = vector.load %arg12[%c0_75, %c9_76] : memref<8x1042xf32, #tpu.memory_space<vmem>>, vector<8x1024xf32>
    tpu.vector_store %arg12[%c0_75, %c9_76], %73 {strides = array<i32>} : memref<8x1042xf32, #tpu.memory_space<vmem>>, vector<8x1024xf32>,
    %c0_77 = arith.constant 0 : index
    %c0_78 = arith.constant 0 : index
    %76 = vector.load %arg12[%c0_77, %c0_78] : memref<8x1042xf32, #tpu.memory_space<vmem>>, vector<8x1024xf32>
    %c0_79 = arith.constant 0 : index
    %c0_80 = arith.constant 0 : index
    %77 = vector.load %arg1[%c0_79, %c0_80] : memref<9x1024xf32, #tpu.memory_space<vmem>>, vector<1x1024xf32>
    %cst_81 = arith.constant 0.000000e+00 : f32
    %78 = vector.broadcast %cst_81 : f32 to vector<1x1024xf32>
    %79 = arith.cmpf one, %77, %78 : vector<1x1024xf32>
    %cst_82 = arith.constant 0.000000e+00 : f32
    %80 = vector.shape_cast %79 : vector<1x1024xi1> to vector<1x1024xi1>
    %81 = vector.broadcast %80 : vector<1x1024xi1> to vector<8x1024xi1>
    %82 = vector.broadcast %cst_82 : f32 to vector<8x1024xf32>
    %83 = arith.select %81, %76, %82 : vector<8x1024xi1>, vector<8x1024xf32>
    %c0_83 = arith.constant 0 : index
    %c0_84 = arith.constant 0 : index
    %84 = vector.load %arg13[%c0_83, %c0_84] : memref<72x1024xf32, #tpu.memory_space<vmem>>, vector<8x1024xf32>
    tpu.vector_store %arg13[%c0_83, %c0_84], %83 {strides = array<i32>} : memref<72x1024xf32, #tpu.memory_space<vmem>>, vector<8x1024xf32>,
    %c0_85 = arith.constant 0 : index
    %c1_86 = arith.constant 1 : index
    %85 = vector.load %arg12[%c0_85, %c1_86] : memref<8x1042xf32, #tpu.memory_space<vmem>>, vector<8x1024xf32>
    %c1_87 = arith.constant 1 : index
    %c0_88 = arith.constant 0 : index
    %86 = vector.load %arg1[%c1_87, %c0_88] : memref<9x1024xf32, #tpu.memory_space<vmem>>, vector<1x1024xf32>
    %cst_89 = arith.constant 0.000000e+00 : f32
    %87 = vector.broadcast %cst_89 : f32 to vector<1x1024xf32>
    %88 = arith.cmpf one, %86, %87 : vector<1x1024xf32>
    %cst_90 = arith.constant 0.000000e+00 : f32
    %89 = vector.shape_cast %88 : vector<1x1024xi1> to vector<1x1024xi1>
    %90 = vector.broadcast %89 : vector<1x1024xi1> to vector<8x1024xi1>
    %91 = vector.broadcast %cst_90 : f32 to vector<8x1024xf32>
    %92 = arith.select %90, %85, %91 : vector<8x1024xi1>, vector<8x1024xf32>
    %c8_91 = arith.constant 8 : index
    %c0_92 = arith.constant 0 : index
    %93 = vector.load %arg13[%c8_91, %c0_92] : memref<72x1024xf32, #tpu.memory_space<vmem>>, vector<8x1024xf32>
    tpu.vector_store %arg13[%c8_91, %c0_92], %92 {strides = array<i32>} : memref<72x1024xf32, #tpu.memory_space<vmem>>, vector<8x1024xf32>,
    %c0_93 = arith.constant 0 : index
    %c2_94 = arith.constant 2 : index
    %94 = vector.load %arg12[%c0_93, %c2_94] : memref<8x1042xf32, #tpu.memory_space<vmem>>, vector<8x1024xf32>
    %c2_95 = arith.constant 2 : index
    %c0_96 = arith.constant 0 : index
    %95 = vector.load %arg1[%c2_95, %c0_96] : memref<9x1024xf32, #tpu.memory_space<vmem>>, vector<1x1024xf32>
    %cst_97 = arith.constant 0.000000e+00 : f32
    %96 = vector.broadcast %cst_97 : f32 to vector<1x1024xf32>
    %97 = arith.cmpf one, %95, %96 : vector<1x1024xf32>
    %cst_98 = arith.constant 0.000000e+00 : f32
    %98 = vector.shape_cast %97 : vector<1x1024xi1> to vector<1x1024xi1>
    %99 = vector.broadcast %98 : vector<1x1024xi1> to vector<8x1024xi1>
    %100 = vector.broadcast %cst_98 : f32 to vector<8x1024xf32>
    %101 = arith.select %99, %94, %100 : vector<8x1024xi1>, vector<8x1024xf32>
    %c16_99 = arith.constant 16 : index
    %c0_100 = arith.constant 0 : index
    %102 = vector.load %arg13[%c16_99, %c0_100] : memref<72x1024xf32, #tpu.memory_space<vmem>>, vector<8x1024xf32>
    tpu.vector_store %arg13[%c16_99, %c0_100], %101 {strides = array<i32>} : memref<72x1024xf32, #tpu.memory_space<vmem>>, vector<8x1024xf32>,
    %c0_101 = arith.constant 0 : index
    %c8_102 = arith.constant 8 : index
    %103 = vector.load %arg12[%c0_101, %c8_102] : memref<8x1042xf32, #tpu.memory_space<vmem>>, vector<8x1024xf32>
    %c3_103 = arith.constant 3 : index
    %c0_104 = arith.constant 0 : index
    %104 = vector.load %arg1[%c3_103, %c0_104] : memref<9x1024xf32, #tpu.memory_space<vmem>>, vector<1x1024xf32>
    %cst_105 = arith.constant 0.000000e+00 : f32
    %105 = vector.broadcast %cst_105 : f32 to vector<1x1024xf32>
    %106 = arith.cmpf one, %104, %105 : vector<1x1024xf32>
    %cst_106 = arith.constant 0.000000e+00 : f32
    %107 = vector.shape_cast %106 : vector<1x1024xi1> to vector<1x1024xi1>
    %108 = vector.broadcast %107 : vector<1x1024xi1> to vector<8x1024xi1>
    %109 = vector.broadcast %cst_106 : f32 to vector<8x1024xf32>
    %110 = arith.select %108, %103, %109 : vector<8x1024xi1>, vector<8x1024xf32>
    %c24 = arith.constant 24 : index
    %c0_107 = arith.constant 0 : index
    %111 = vector.load %arg13[%c24, %c0_107] : memref<72x1024xf32, #tpu.memory_space<vmem>>, vector<8x1024xf32>
    tpu.vector_store %arg13[%c24, %c0_107], %110 {strides = array<i32>} : memref<72x1024xf32, #tpu.memory_space<vmem>>, vector<8x1024xf32>,
    %c0_108 = arith.constant 0 : index
    %c9_109 = arith.constant 9 : index
    %112 = vector.load %arg12[%c0_108, %c9_109] : memref<8x1042xf32, #tpu.memory_space<vmem>>, vector<8x1024xf32>
    %c32 = arith.constant 32 : index
    %c0_110 = arith.constant 0 : index
    %113 = vector.load %arg13[%c32, %c0_110] : memref<72x1024xf32, #tpu.memory_space<vmem>>, vector<8x1024xf32>
    tpu.vector_store %arg13[%c32, %c0_110], %112 {strides = array<i32>} : memref<72x1024xf32, #tpu.memory_space<vmem>>, vector<8x1024xf32>,
    %c0_111 = arith.constant 0 : index
    %c10_112 = arith.constant 10 : index
    %114 = vector.load %arg12[%c0_111, %c10_112] : memref<8x1042xf32, #tpu.memory_space<vmem>>, vector<8x1024xf32>
    %c5_113 = arith.constant 5 : index
    %c0_114 = arith.constant 0 : index
    %115 = vector.load %arg1[%c5_113, %c0_114] : memref<9x1024xf32, #tpu.memory_space<vmem>>, vector<1x1024xf32>
    %cst_115 = arith.constant 0.000000e+00 : f32
    %116 = vector.broadcast %cst_115 : f32 to vector<1x1024xf32>
    %117 = arith.cmpf one, %115, %116 : vector<1x1024xf32>
    %cst_116 = arith.constant 0.000000e+00 : f32
    %118 = vector.shape_cast %117 : vector<1x1024xi1> to vector<1x1024xi1>
    %119 = vector.broadcast %118 : vector<1x1024xi1> to vector<8x1024xi1>
    %120 = vector.broadcast %cst_116 : f32 to vector<8x1024xf32>
    %121 = arith.select %119, %114, %120 : vector<8x1024xi1>, vector<8x1024xf32>
    %c40 = arith.constant 40 : index
    %c0_117 = arith.constant 0 : index
    %122 = vector.load %arg13[%c40, %c0_117] : memref<72x1024xf32, #tpu.memory_space<vmem>>, vector<8x1024xf32>
    tpu.vector_store %arg13[%c40, %c0_117], %121 {strides = array<i32>} : memref<72x1024xf32, #tpu.memory_space<vmem>>, vector<8x1024xf32>,
    %c0_118 = arith.constant 0 : index
    %c16_119 = arith.constant 16 : index
    %123 = vector.load %arg12[%c0_118, %c16_119] : memref<8x1042xf32, #tpu.memory_space<vmem>>, vector<8x1024xf32>
    %c6_120 = arith.constant 6 : index
    %c0_121 = arith.constant 0 : index
    %124 = vector.load %arg1[%c6_120, %c0_121] : memref<9x1024xf32, #tpu.memory_space<vmem>>, vector<1x1024xf32>
    %cst_122 = arith.constant 0.000000e+00 : f32
    %125 = vector.broadcast %cst_122 : f32 to vector<1x1024xf32>
    %126 = arith.cmpf one, %124, %125 : vector<1x1024xf32>
    %cst_123 = arith.constant 0.000000e+00 : f32
    %127 = vector.shape_cast %126 : vector<1x1024xi1> to vector<1x1024xi1>
    %128 = vector.broadcast %127 : vector<1x1024xi1> to vector<8x1024xi1>
    %129 = vector.broadcast %cst_123 : f32 to vector<8x1024xf32>
    %130 = arith.select %128, %123, %129 : vector<8x1024xi1>, vector<8x1024xf32>
    %c48 = arith.constant 48 : index
    %c0_124 = arith.constant 0 : index
    %131 = vector.load %arg13[%c48, %c0_124] : memref<72x1024xf32, #tpu.memory_space<vmem>>, vector<8x1024xf32>
    tpu.vector_store %arg13[%c48, %c0_124], %130 {strides = array<i32>} : memref<72x1024xf32, #tpu.memory_space<vmem>>, vector<8x1024xf32>,
    %c0_125 = arith.constant 0 : index
    %c17_126 = arith.constant 17 : index
    %132 = vector.load %arg12[%c0_125, %c17_126] : memref<8x1042xf32, #tpu.memory_space<vmem>>, vector<8x1024xf32>
    %c7_127 = arith.constant 7 : index
    %c0_128 = arith.constant 0 : index
    %133 = vector.load %arg1[%c7_127, %c0_128] : memref<9x1024xf32, #tpu.memory_space<vmem>>, vector<1x1024xf32>
    %cst_129 = arith.constant 0.000000e+00 : f32
    %134 = vector.broadcast %cst_129 : f32 to vector<1x1024xf32>
    %135 = arith.cmpf one, %133, %134 : vector<1x1024xf32>
    %cst_130 = arith.constant 0.000000e+00 : f32
    %136 = vector.shape_cast %135 : vector<1x1024xi1> to vector<1x1024xi1>
    %137 = vector.broadcast %136 : vector<1x1024xi1> to vector<8x1024xi1>
    %138 = vector.broadcast %cst_130 : f32 to vector<8x1024xf32>
    %139 = arith.select %137, %132, %138 : vector<8x1024xi1>, vector<8x1024xf32>
    %c56 = arith.constant 56 : index
    %c0_131 = arith.constant 0 : index
    %140 = vector.load %arg13[%c56, %c0_131] : memref<72x1024xf32, #tpu.memory_space<vmem>>, vector<8x1024xf32>
    tpu.vector_store %arg13[%c56, %c0_131], %139 {strides = array<i32>} : memref<72x1024xf32, #tpu.memory_space<vmem>>, vector<8x1024xf32>,
    %c0_132 = arith.constant 0 : index
    %c18_133 = arith.constant 18 : index
    %141 = vector.load %arg12[%c0_132, %c18_133] : memref<8x1042xf32, #tpu.memory_space<vmem>>, vector<8x1024xf32>
    %c8_134 = arith.constant 8 : index
    %c0_135 = arith.constant 0 : index
    %142 = vector.load %arg1[%c8_134, %c0_135] : memref<9x1024xf32, #tpu.memory_space<vmem>>, vector<1x1024xf32>
    %cst_136 = arith.constant 0.000000e+00 : f32
    %143 = vector.broadcast %cst_136 : f32 to vector<1x1024xf32>
    %144 = arith.cmpf one, %142, %143 : vector<1x1024xf32>
    %cst_137 = arith.constant 0.000000e+00 : f32
    %145 = vector.shape_cast %144 : vector<1x1024xi1> to vector<1x1024xi1>
    %146 = vector.broadcast %145 : vector<1x1024xi1> to vector<8x1024xi1>
    %147 = vector.broadcast %cst_137 : f32 to vector<8x1024xf32>
    %148 = arith.select %146, %141, %147 : vector<8x1024xi1>, vector<8x1024xf32>
    %c64 = arith.constant 64 : index
    %c0_138 = arith.constant 0 : index
    %149 = vector.load %arg13[%c64, %c0_138] : memref<72x1024xf32, #tpu.memory_space<vmem>>, vector<8x1024xf32>
    tpu.vector_store %arg13[%c64, %c0_138], %148 {strides = array<i32>} : memref<72x1024xf32, #tpu.memory_space<vmem>>, vector<8x1024xf32>,
    %c0_139 = arith.constant 0 : index
    %c0_140 = arith.constant 0 : index
    %150 = vector.load %arg5[%c0_139, %c0_140] : memref<8x72xf32, #tpu.memory_space<vmem>>, vector<8x72xf32>
    %c0_141 = arith.constant 0 : index
    %c0_142 = arith.constant 0 : index
    %151 = vector.load %arg13[%c0_141, %c0_142] : memref<72x1024xf32, #tpu.memory_space<vmem>>, vector<72x1024xf32>
    %cst_143 = arith.constant dense<0.000000e+00> : vector<8x1024xf32>
    %152 = tpu.matmul %150, %151, %cst_143 {dimension_numbers = #tpu.dot_dimension_numbers<[1], [0], [0], [1], [0, 0, 1, 1], [], []>} : vector<8x72xf32>, vector<72x1024xf32>, vector<8x1024xf32> -> vector<8x1024xf32>
    %153 = vector.broadcast %74 : vector<8x1xf32> to vector<8x1024xf32>
    %154 = arith.addf %152, %153 : vector<8x1024xf32>
    %cst_144 = arith.constant 0.000000e+00 : f32
    %155 = vector.broadcast %cst_144 : f32 to vector<8x1024xf32>
    %156 = arith.maximumf %154, %155 : vector<8x1024xf32>
    %c0_145 = arith.constant 0 : index
    %c0_146 = arith.constant 0 : index
    %157 = vector.load %arg14[%c0_145, %c0_146] : memref<8x1024xf32, #tpu.memory_space<vmem>>, vector<8x1024xf32>
    tpu.vector_store %arg14[%c0_145, %c0_146], %156 {strides = array<i32>} : memref<8x1024xf32, #tpu.memory_space<vmem>>, vector<8x1024xf32>,
    %c0_147 = arith.constant 0 : index
    %c0_148 = arith.constant 0 : index
    %158 = vector.load %arg14[%c0_147, %c0_148] : memref<8x1024xf32, #tpu.memory_space<vmem>>, vector<1x128xf32>
    %c0_149 = arith.constant 0 : index
    %c0_150 = arith.constant 0 : index
    %159 = vector.load %arg15[%c0_149, %c0_150] : memref<8x1024xf32, #tpu.memory_space<vmem>>, vector<1x128xf32>
    tpu.vector_store %arg15[%c0_149, %c0_150], %158 {strides = array<i32>} : memref<8x1024xf32, #tpu.memory_space<vmem>>, vector<1x128xf32>,
    %c1_151 = arith.constant 1 : index
    %c0_152 = arith.constant 0 : index
    %160 = vector.load %arg14[%c1_151, %c0_152] : memref<8x1024xf32, #tpu.memory_space<vmem>>, vector<1x128xf32>
    %c0_153 = arith.constant 0 : index
    %c128 = arith.constant 128 : index
    %161 = vector.load %arg15[%c0_153, %c128] : memref<8x1024xf32, #tpu.memory_space<vmem>>, vector<1x128xf32>
    tpu.vector_store %arg15[%c0_153, %c128], %160 {strides = array<i32>} : memref<8x1024xf32, #tpu.memory_space<vmem>>, vector<1x128xf32>,
    %c2_154 = arith.constant 2 : index
    %c0_155 = arith.constant 0 : index
    %162 = vector.load %arg14[%c2_154, %c0_155] : memref<8x1024xf32, #tpu.memory_space<vmem>>, vector<1x128xf32>
    %c0_156 = arith.constant 0 : index
    %c256 = arith.constant 256 : index
    %163 = vector.load %arg15[%c0_156, %c256] : memref<8x1024xf32, #tpu.memory_space<vmem>>, vector<1x128xf32>
    tpu.vector_store %arg15[%c0_156, %c256], %162 {strides = array<i32>} : memref<8x1024xf32, #tpu.memory_space<vmem>>, vector<1x128xf32>,
    %c3_157 = arith.constant 3 : index
    %c0_158 = arith.constant 0 : index
    %164 = vector.load %arg14[%c3_157, %c0_158] : memref<8x1024xf32, #tpu.memory_space<vmem>>, vector<1x128xf32>
    %c0_159 = arith.constant 0 : index
    %c384 = arith.constant 384 : index
    %165 = vector.load %arg15[%c0_159, %c384] : memref<8x1024xf32, #tpu.memory_space<vmem>>, vector<1x128xf32>
    tpu.vector_store %arg15[%c0_159, %c384], %164 {strides = array<i32>} : memref<8x1024xf32, #tpu.memory_space<vmem>>, vector<1x128xf32>,
    %c4_160 = arith.constant 4 : index
    %c0_161 = arith.constant 0 : index
    %166 = vector.load %arg14[%c4_160, %c0_161] : memref<8x1024xf32, #tpu.memory_space<vmem>>, vector<1x128xf32>
    %c0_162 = arith.constant 0 : index
    %c512 = arith.constant 512 : index
    %167 = vector.load %arg15[%c0_162, %c512] : memref<8x1024xf32, #tpu.memory_space<vmem>>, vector<1x128xf32>
    tpu.vector_store %arg15[%c0_162, %c512], %166 {strides = array<i32>} : memref<8x1024xf32, #tpu.memory_space<vmem>>, vector<1x128xf32>,
    %c5_163 = arith.constant 5 : index
    %c0_164 = arith.constant 0 : index
    %168 = vector.load %arg14[%c5_163, %c0_164] : memref<8x1024xf32, #tpu.memory_space<vmem>>, vector<1x128xf32>
    %c0_165 = arith.constant 0 : index
    %c640 = arith.constant 640 : index
    %169 = vector.load %arg15[%c0_165, %c640] : memref<8x1024xf32, #tpu.memory_space<vmem>>, vector<1x128xf32>
    tpu.vector_store %arg15[%c0_165, %c640], %168 {strides = array<i32>} : memref<8x1024xf32, #tpu.memory_space<vmem>>, vector<1x128xf32>,
    %c6_166 = arith.constant 6 : index
    %c0_167 = arith.constant 0 : index
    %170 = vector.load %arg14[%c6_166, %c0_167] : memref<8x1024xf32, #tpu.memory_space<vmem>>, vector<1x128xf32>
    %c0_168 = arith.constant 0 : index
    %c768 = arith.constant 768 : index
    %171 = vector.load %arg15[%c0_168, %c768] : memref<8x1024xf32, #tpu.memory_space<vmem>>, vector<1x128xf32>
    tpu.vector_store %arg15[%c0_168, %c768], %170 {strides = array<i32>} : memref<8x1024xf32, #tpu.memory_space<vmem>>, vector<1x128xf32>,
    %c7_169 = arith.constant 7 : index
    %c0_170 = arith.constant 0 : index
    %172 = vector.load %arg14[%c7_169, %c0_170] : memref<8x1024xf32, #tpu.memory_space<vmem>>, vector<1x128xf32>
    %c0_171 = arith.constant 0 : index
    %c896 = arith.constant 896 : index
    %173 = vector.load %arg15[%c0_171, %c896] : memref<8x1024xf32, #tpu.memory_space<vmem>>, vector<1x128xf32>
    tpu.vector_store %arg15[%c0_171, %c896], %172 {strides = array<i32>} : memref<8x1024xf32, #tpu.memory_space<vmem>>, vector<1x128xf32>,
    %c0_172 = arith.constant 0 : index
    %c128_173 = arith.constant 128 : index
    %174 = vector.load %arg14[%c0_172, %c128_173] : memref<8x1024xf32, #tpu.memory_space<vmem>>, vector<1x128xf32>
    %c1_174 = arith.constant 1 : index
    %c0_175 = arith.constant 0 : index
    %175 = vector.load %arg15[%c1_174, %c0_175] : memref<8x1024xf32, #tpu.memory_space<vmem>>, vector<1x128xf32>
    tpu.vector_store %arg15[%c1_174, %c0_175], %174 {strides = array<i32>} : memref<8x1024xf32, #tpu.memory_space<vmem>>, vector<1x128xf32>,
    %c1_176 = arith.constant 1 : index
    %c128_177 = arith.constant 128 : index
    %176 = vector.load %arg14[%c1_176, %c128_177] : memref<8x1024xf32, #tpu.memory_space<vmem>>, vector<1x128xf32>
    %c1_178 = arith.constant 1 : index
    %c128_179 = arith.constant 128 : index
    %177 = vector.load %arg15[%c1_178, %c128_179] : memref<8x1024xf32, #tpu.memory_space<vmem>>, vector<1x128xf32>
    tpu.vector_store %arg15[%c1_178, %c128_179], %176 {strides = array<i32>} : memref<8x1024xf32, #tpu.memory_space<vmem>>, vector<1x128xf32>,
    %c2_180 = arith.constant 2 : index
    %c128_181 = arith.constant 128 : index
    %178 = vector.load %arg14[%c2_180, %c128_181] : memref<8x1024xf32, #tpu.memory_space<vmem>>, vector<1x128xf32>
    %c1_182 = arith.constant 1 : index
    %c256_183 = arith.constant 256 : index
    %179 = vector.load %arg15[%c1_182, %c256_183] : memref<8x1024xf32, #tpu.memory_space<vmem>>, vector<1x128xf32>
    tpu.vector_store %arg15[%c1_182, %c256_183], %178 {strides = array<i32>} : memref<8x1024xf32, #tpu.memory_space<vmem>>, vector<1x128xf32>,
    %c3_184 = arith.constant 3 : index
    %c128_185 = arith.constant 128 : index
    %180 = vector.load %arg14[%c3_184, %c128_185] : memref<8x1024xf32, #tpu.memory_space<vmem>>, vector<1x128xf32>
    %c1_186 = arith.constant 1 : index
    %c384_187 = arith.constant 384 : index
    %181 = vector.load %arg15[%c1_186, %c384_187] : memref<8x1024xf32, #tpu.memory_space<vmem>>, vector<1x128xf32>
    tpu.vector_store %arg15[%c1_186, %c384_187], %180 {strides = array<i32>} : memref<8x1024xf32, #tpu.memory_space<vmem>>, vector<1x128xf32>,
    %c4_188 = arith.constant 4 : index
    %c128_189 = arith.constant 128 : index
    %182 = vector.load %arg14[%c4_188, %c128_189] : memref<8x1024xf32, #tpu.memory_space<vmem>>, vector<1x128xf32>
    %c1_190 = arith.constant 1 : index
    %c512_191 = arith.constant 512 : index
    %183 = vector.load %arg15[%c1_190, %c512_191] : memref<8x1024xf32, #tpu.memory_space<vmem>>, vector<1x128xf32>
    tpu.vector_store %arg15[%c1_190, %c512_191], %182 {strides = array<i32>} : memref<8x1024xf32, #tpu.memory_space<vmem>>, vector<1x128xf32>,
    %c5_192 = arith.constant 5 : index
    %c128_193 = arith.constant 128 : index
    %184 = vector.load %arg14[%c5_192, %c128_193] : memref<8x1024xf32, #tpu.memory_space<vmem>>, vector<1x128xf32>
    %c1_194 = arith.constant 1 : index
    %c640_195 = arith.constant 640 : index
    %185 = vector.load %arg15[%c1_194, %c640_195] : memref<8x1024xf32, #tpu.memory_space<vmem>>, vector<1x128xf32>
    tpu.vector_store %arg15[%c1_194, %c640_195], %184 {strides = array<i32>} : memref<8x1024xf32, #tpu.memory_space<vmem>>, vector<1x128xf32>,
    %c6_196 = arith.constant 6 : index
    %c128_197 = arith.constant 128 : index
    %186 = vector.load %arg14[%c6_196, %c128_197] : memref<8x1024xf32, #tpu.memory_space<vmem>>, vector<1x128xf32>
    %c1_198 = arith.constant 1 : index
    %c768_199 = arith.constant 768 : index
    %187 = vector.load %arg15[%c1_198, %c768_199] : memref<8x1024xf32, #tpu.memory_space<vmem>>, vector<1x128xf32>
    tpu.vector_store %arg15[%c1_198, %c768_199], %186 {strides = array<i32>} : memref<8x1024xf32, #tpu.memory_space<vmem>>, vector<1x128xf32>,
    %c7_200 = arith.constant 7 : index
    %c128_201 = arith.constant 128 : index
    %188 = vector.load %arg14[%c7_200, %c128_201] : memref<8x1024xf32, #tpu.memory_space<vmem>>, vector<1x128xf32>
    %c1_202 = arith.constant 1 : index
    %c896_203 = arith.constant 896 : index
    %189 = vector.load %arg15[%c1_202, %c896_203] : memref<8x1024xf32, #tpu.memory_space<vmem>>, vector<1x128xf32>
    tpu.vector_store %arg15[%c1_202, %c896_203], %188 {strides = array<i32>} : memref<8x1024xf32, #tpu.memory_space<vmem>>, vector<1x128xf32>,
    %c0_204 = arith.constant 0 : index
    %c256_205 = arith.constant 256 : index
    %190 = vector.load %arg14[%c0_204, %c256_205] : memref<8x1024xf32, #tpu.memory_space<vmem>>, vector<1x128xf32>
    %c2_206 = arith.constant 2 : index
    %c0_207 = arith.constant 0 : index
    %191 = vector.load %arg15[%c2_206, %c0_207] : memref<8x1024xf32, #tpu.memory_space<vmem>>, vector<1x128xf32>
    tpu.vector_store %arg15[%c2_206, %c0_207], %190 {strides = array<i32>} : memref<8x1024xf32, #tpu.memory_space<vmem>>, vector<1x128xf32>,
    %c1_208 = arith.constant 1 : index
    %c256_209 = arith.constant 256 : index
    %192 = vector.load %arg14[%c1_208, %c256_209] : memref<8x1024xf32, #tpu.memory_space<vmem>>, vector<1x128xf32>
    %c2_210 = arith.constant 2 : index
    %c128_211 = arith.constant 128 : index
    %193 = vector.load %arg15[%c2_210, %c128_211] : memref<8x1024xf32, #tpu.memory_space<vmem>>, vector<1x128xf32>
    tpu.vector_store %arg15[%c2_210, %c128_211], %192 {strides = array<i32>} : memref<8x1024xf32, #tpu.memory_space<vmem>>, vector<1x128xf32>,
    %c2_212 = arith.constant 2 : index
    %c256_213 = arith.constant 256 : index
    %194 = vector.load %arg14[%c2_212, %c256_213] : memref<8x1024xf32, #tpu.memory_space<vmem>>, vector<1x128xf32>
    %c2_214 = arith.constant 2 : index
    %c256_215 = arith.constant 256 : index
    %195 = vector.load %arg15[%c2_214, %c256_215] : memref<8x1024xf32, #tpu.memory_space<vmem>>, vector<1x128xf32>
    tpu.vector_store %arg15[%c2_214, %c256_215], %194 {strides = array<i32>} : memref<8x1024xf32, #tpu.memory_space<vmem>>, vector<1x128xf32>,
    %c3_216 = arith.constant 3 : index
    %c256_217 = arith.constant 256 : index
    %196 = vector.load %arg14[%c3_216, %c256_217] : memref<8x1024xf32, #tpu.memory_space<vmem>>, vector<1x128xf32>
    %c2_218 = arith.constant 2 : index
    %c384_219 = arith.constant 384 : index
    %197 = vector.load %arg15[%c2_218, %c384_219] : memref<8x1024xf32, #tpu.memory_space<vmem>>, vector<1x128xf32>
    tpu.vector_store %arg15[%c2_218, %c384_219], %196 {strides = array<i32>} : memref<8x1024xf32, #tpu.memory_space<vmem>>, vector<1x128xf32>,
    %c4_220 = arith.constant 4 : index
    %c256_221 = arith.constant 256 : index
    %198 = vector.load %arg14[%c4_220, %c256_221] : memref<8x1024xf32, #tpu.memory_space<vmem>>, vector<1x128xf32>
    %c2_222 = arith.constant 2 : index
    %c512_223 = arith.constant 512 : index
    %199 = vector.load %arg15[%c2_222, %c512_223] : memref<8x1024xf32, #tpu.memory_space<vmem>>, vector<1x128xf32>
    tpu.vector_store %arg15[%c2_222, %c512_223], %198 {strides = array<i32>} : memref<8x1024xf32, #tpu.memory_space<vmem>>, vector<1x128xf32>,
    %c5_224 = arith.constant 5 : index
    %c256_225 = arith.constant 256 : index
    %200 = vector.load %arg14[%c5_224, %c256_225] : memref<8x1024xf32, #tpu.memory_space<vmem>>, vector<1x128xf32>
    %c2_226 = arith.constant 2 : index
    %c640_227 = arith.constant 640 : index
    %201 = vector.load %arg15[%c2_226, %c640_227] : memref<8x1024xf32, #tpu.memory_space<vmem>>, vector<1x128xf32>
    tpu.vector_store %arg15[%c2_226, %c640_227], %200 {strides = array<i32>} : memref<8x1024xf32, #tpu.memory_space<vmem>>, vector<1x128xf32>,
    %c6_228 = arith.constant 6 : index
    %c256_229 = arith.constant 256 : index
    %202 = vector.load %arg14[%c6_228, %c256_229] : memref<8x1024xf32, #tpu.memory_space<vmem>>, vector<1x128xf32>
    %c2_230 = arith.constant 2 : index
    %c768_231 = arith.constant 768 : index
    %203 = vector.load %arg15[%c2_230, %c768_231] : memref<8x1024xf32, #tpu.memory_space<vmem>>, vector<1x128xf32>
    tpu.vector_store %arg15[%c2_230, %c768_231], %202 {strides = array<i32>} : memref<8x1024xf32, #tpu.memory_space<vmem>>, vector<1x128xf32>,
    %c7_232 = arith.constant 7 : index
    %c256_233 = arith.constant 256 : index
    %204 = vector.load %arg14[%c7_232, %c256_233] : memref<8x1024xf32, #tpu.memory_space<vmem>>, vector<1x128xf32>
    %c2_234 = arith.constant 2 : index
    %c896_235 = arith.constant 896 : index
    %205 = vector.load %arg15[%c2_234, %c896_235] : memref<8x1024xf32, #tpu.memory_space<vmem>>, vector<1x128xf32>
    tpu.vector_store %arg15[%c2_234, %c896_235], %204 {strides = array<i32>} : memref<8x1024xf32, #tpu.memory_space<vmem>>, vector<1x128xf32>,
    %c0_236 = arith.constant 0 : index
    %c384_237 = arith.constant 384 : index
    %206 = vector.load %arg14[%c0_236, %c384_237] : memref<8x1024xf32, #tpu.memory_space<vmem>>, vector<1x128xf32>
    %c3_238 = arith.constant 3 : index
    %c0_239 = arith.constant 0 : index
    %207 = vector.load %arg15[%c3_238, %c0_239] : memref<8x1024xf32, #tpu.memory_space<vmem>>, vector<1x128xf32>
    tpu.vector_store %arg15[%c3_238, %c0_239], %206 {strides = array<i32>} : memref<8x1024xf32, #tpu.memory_space<vmem>>, vector<1x128xf32>,
    %c1_240 = arith.constant 1 : index
    %c384_241 = arith.constant 384 : index
    %208 = vector.load %arg14[%c1_240, %c384_241] : memref<8x1024xf32, #tpu.memory_space<vmem>>, vector<1x128xf32>
    %c3_242 = arith.constant 3 : index
    %c128_243 = arith.constant 128 : index
    %209 = vector.load %arg15[%c3_242, %c128_243] : memref<8x1024xf32, #tpu.memory_space<vmem>>, vector<1x128xf32>
    tpu.vector_store %arg15[%c3_242, %c128_243], %208 {strides = array<i32>} : memref<8x1024xf32, #tpu.memory_space<vmem>>, vector<1x128xf32>,
    %c2_244 = arith.constant 2 : index
    %c384_245 = arith.constant 384 : index
    %210 = vector.load %arg14[%c2_244, %c384_245] : memref<8x1024xf32, #tpu.memory_space<vmem>>, vector<1x128xf32>
    %c3_246 = arith.constant 3 : index
    %c256_247 = arith.constant 256 : index
    %211 = vector.load %arg15[%c3_246, %c256_247] : memref<8x1024xf32, #tpu.memory_space<vmem>>, vector<1x128xf32>
    tpu.vector_store %arg15[%c3_246, %c256_247], %210 {strides = array<i32>} : memref<8x1024xf32, #tpu.memory_space<vmem>>, vector<1x128xf32>,
    %c3_248 = arith.constant 3 : index
    %c384_249 = arith.constant 384 : index
    %212 = vector.load %arg14[%c3_248, %c384_249] : memref<8x1024xf32, #tpu.memory_space<vmem>>, vector<1x128xf32>
    %c3_250 = arith.constant 3 : index
    %c384_251 = arith.constant 384 : index
    %213 = vector.load %arg15[%c3_250, %c384_251] : memref<8x1024xf32, #tpu.memory_space<vmem>>, vector<1x128xf32>
    tpu.vector_store %arg15[%c3_250, %c384_251], %212 {strides = array<i32>} : memref<8x1024xf32, #tpu.memory_space<vmem>>, vector<1x128xf32>,
    %c4_252 = arith.constant 4 : index
    %c384_253 = arith.constant 384 : index
    %214 = vector.load %arg14[%c4_252, %c384_253] : memref<8x1024xf32, #tpu.memory_space<vmem>>, vector<1x128xf32>
    %c3_254 = arith.constant 3 : index
    %c512_255 = arith.constant 512 : index
    %215 = vector.load %arg15[%c3_254, %c512_255] : memref<8x1024xf32, #tpu.memory_space<vmem>>, vector<1x128xf32>
    tpu.vector_store %arg15[%c3_254, %c512_255], %214 {strides = array<i32>} : memref<8x1024xf32, #tpu.memory_space<vmem>>, vector<1x128xf32>,
    %c5_256 = arith.constant 5 : index
    %c384_257 = arith.constant 384 : index
    %216 = vector.load %arg14[%c5_256, %c384_257] : memref<8x1024xf32, #tpu.memory_space<vmem>>, vector<1x128xf32>
    %c3_258 = arith.constant 3 : index
    %c640_259 = arith.constant 640 : index
    %217 = vector.load %arg15[%c3_258, %c640_259] : memref<8x1024xf32, #tpu.memory_space<vmem>>, vector<1x128xf32>
    tpu.vector_store %arg15[%c3_258, %c640_259], %216 {strides = array<i32>} : memref<8x1024xf32, #tpu.memory_space<vmem>>, vector<1x128xf32>,
    %c6_260 = arith.constant 6 : index
    %c384_261 = arith.constant 384 : index
    %218 = vector.load %arg14[%c6_260, %c384_261] : memref<8x1024xf32, #tpu.memory_space<vmem>>, vector<1x128xf32>
    %c3_262 = arith.constant 3 : index
    %c768_263 = arith.constant 768 : index
    %219 = vector.load %arg15[%c3_262, %c768_263] : memref<8x1024xf32, #tpu.memory_space<vmem>>, vector<1x128xf32>
    tpu.vector_store %arg15[%c3_262, %c768_263], %218 {strides = array<i32>} : memref<8x1024xf32, #tpu.memory_space<vmem>>, vector<1x128xf32>,
    %c7_264 = arith.constant 7 : index
    %c384_265 = arith.constant 384 : index
    %220 = vector.load %arg14[%c7_264, %c384_265] : memref<8x1024xf32, #tpu.memory_space<vmem>>, vector<1x128xf32>
    %c3_266 = arith.constant 3 : index
    %c896_267 = arith.constant 896 : index
    %221 = vector.load %arg15[%c3_266, %c896_267] : memref<8x1024xf32, #tpu.memory_space<vmem>>, vector<1x128xf32>
    tpu.vector_store %arg15[%c3_266, %c896_267], %220 {strides = array<i32>} : memref<8x1024xf32, #tpu.memory_space<vmem>>, vector<1x128xf32>,
    %c0_268 = arith.constant 0 : index
    %c512_269 = arith.constant 512 : index
    %222 = vector.load %arg14[%c0_268, %c512_269] : memref<8x1024xf32, #tpu.memory_space<vmem>>, vector<1x128xf32>
    %c4_270 = arith.constant 4 : index
    %c0_271 = arith.constant 0 : index
    %223 = vector.load %arg15[%c4_270, %c0_271] : memref<8x1024xf32, #tpu.memory_space<vmem>>, vector<1x128xf32>
    tpu.vector_store %arg15[%c4_270, %c0_271], %222 {strides = array<i32>} : memref<8x1024xf32, #tpu.memory_space<vmem>>, vector<1x128xf32>,
    %c1_272 = arith.constant 1 : index
    %c512_273 = arith.constant 512 : index
    %224 = vector.load %arg14[%c1_272, %c512_273] : memref<8x1024xf32, #tpu.memory_space<vmem>>, vector<1x128xf32>
    %c4_274 = arith.constant 4 : index
    %c128_275 = arith.constant 128 : index
    %225 = vector.load %arg15[%c4_274, %c128_275] : memref<8x1024xf32, #tpu.memory_space<vmem>>, vector<1x128xf32>
    tpu.vector_store %arg15[%c4_274, %c128_275], %224 {strides = array<i32>} : memref<8x1024xf32, #tpu.memory_space<vmem>>, vector<1x128xf32>,
    %c2_276 = arith.constant 2 : index
    %c512_277 = arith.constant 512 : index
    %226 = vector.load %arg14[%c2_276, %c512_277] : memref<8x1024xf32, #tpu.memory_space<vmem>>, vector<1x128xf32>
    %c4_278 = arith.constant 4 : index
    %c256_279 = arith.constant 256 : index
    %227 = vector.load %arg15[%c4_278, %c256_279] : memref<8x1024xf32, #tpu.memory_space<vmem>>, vector<1x128xf32>
    tpu.vector_store %arg15[%c4_278, %c256_279], %226 {strides = array<i32>} : memref<8x1024xf32, #tpu.memory_space<vmem>>, vector<1x128xf32>,
    %c3_280 = arith.constant 3 : index
    %c512_281 = arith.constant 512 : index
    %228 = vector.load %arg14[%c3_280, %c512_281] : memref<8x1024xf32, #tpu.memory_space<vmem>>, vector<1x128xf32>
    %c4_282 = arith.constant 4 : index
    %c384_283 = arith.constant 384 : index
    %229 = vector.load %arg15[%c4_282, %c384_283] : memref<8x1024xf32, #tpu.memory_space<vmem>>, vector<1x128xf32>
    tpu.vector_store %arg15[%c4_282, %c384_283], %228 {strides = array<i32>} : memref<8x1024xf32, #tpu.memory_space<vmem>>, vector<1x128xf32>,
    %c4_284 = arith.constant 4 : index
    %c512_285 = arith.constant 512 : index
    %230 = vector.load %arg14[%c4_284, %c512_285] : memref<8x1024xf32, #tpu.memory_space<vmem>>, vector<1x128xf32>
    %c4_286 = arith.constant 4 : index
    %c512_287 = arith.constant 512 : index
    %231 = vector.load %arg15[%c4_286, %c512_287] : memref<8x1024xf32, #tpu.memory_space<vmem>>, vector<1x128xf32>
    tpu.vector_store %arg15[%c4_286, %c512_287], %230 {strides = array<i32>} : memref<8x1024xf32, #tpu.memory_space<vmem>>, vector<1x128xf32>,
    %c5_288 = arith.constant 5 : index
    %c512_289 = arith.constant 512 : index
    %232 = vector.load %arg14[%c5_288, %c512_289] : memref<8x1024xf32, #tpu.memory_space<vmem>>, vector<1x128xf32>
    %c4_290 = arith.constant 4 : index
    %c640_291 = arith.constant 640 : index
    %233 = vector.load %arg15[%c4_290, %c640_291] : memref<8x1024xf32, #tpu.memory_space<vmem>>, vector<1x128xf32>
    tpu.vector_store %arg15[%c4_290, %c640_291], %232 {strides = array<i32>} : memref<8x1024xf32, #tpu.memory_space<vmem>>, vector<1x128xf32>,
    %c6_292 = arith.constant 6 : index
    %c512_293 = arith.constant 512 : index
    %234 = vector.load %arg14[%c6_292, %c512_293] : memref<8x1024xf32, #tpu.memory_space<vmem>>, vector<1x128xf32>
    %c4_294 = arith.constant 4 : index
    %c768_295 = arith.constant 768 : index
    %235 = vector.load %arg15[%c4_294, %c768_295] : memref<8x1024xf32, #tpu.memory_space<vmem>>, vector<1x128xf32>
    tpu.vector_store %arg15[%c4_294, %c768_295], %234 {strides = array<i32>} : memref<8x1024xf32, #tpu.memory_space<vmem>>, vector<1x128xf32>,
    %c7_296 = arith.constant 7 : index
    %c512_297 = arith.constant 512 : index
    %236 = vector.load %arg14[%c7_296, %c512_297] : memref<8x1024xf32, #tpu.memory_space<vmem>>, vector<1x128xf32>
    %c4_298 = arith.constant 4 : index
    %c896_299 = arith.constant 896 : index
    %237 = vector.load %arg15[%c4_298, %c896_299] : memref<8x1024xf32, #tpu.memory_space<vmem>>, vector<1x128xf32>
    tpu.vector_store %arg15[%c4_298, %c896_299], %236 {strides = array<i32>} : memref<8x1024xf32, #tpu.memory_space<vmem>>, vector<1x128xf32>,
    %c0_300 = arith.constant 0 : index
    %c640_301 = arith.constant 640 : index
    %238 = vector.load %arg14[%c0_300, %c640_301] : memref<8x1024xf32, #tpu.memory_space<vmem>>, vector<1x128xf32>
    %c5_302 = arith.constant 5 : index
    %c0_303 = arith.constant 0 : index
    %239 = vector.load %arg15[%c5_302, %c0_303] : memref<8x1024xf32, #tpu.memory_space<vmem>>, vector<1x128xf32>
    tpu.vector_store %arg15[%c5_302, %c0_303], %238 {strides = array<i32>} : memref<8x1024xf32, #tpu.memory_space<vmem>>, vector<1x128xf32>,
    %c1_304 = arith.constant 1 : index
    %c640_305 = arith.constant 640 : index
    %240 = vector.load %arg14[%c1_304, %c640_305] : memref<8x1024xf32, #tpu.memory_space<vmem>>, vector<1x128xf32>
    %c5_306 = arith.constant 5 : index
    %c128_307 = arith.constant 128 : index
    %241 = vector.load %arg15[%c5_306, %c128_307] : memref<8x1024xf32, #tpu.memory_space<vmem>>, vector<1x128xf32>
    tpu.vector_store %arg15[%c5_306, %c128_307], %240 {strides = array<i32>} : memref<8x1024xf32, #tpu.memory_space<vmem>>, vector<1x128xf32>,
    %c2_308 = arith.constant 2 : index
    %c640_309 = arith.constant 640 : index
    %242 = vector.load %arg14[%c2_308, %c640_309] : memref<8x1024xf32, #tpu.memory_space<vmem>>, vector<1x128xf32>
    %c5_310 = arith.constant 5 : index
    %c256_311 = arith.constant 256 : index
    %243 = vector.load %arg15[%c5_310, %c256_311] : memref<8x1024xf32, #tpu.memory_space<vmem>>, vector<1x128xf32>
    tpu.vector_store %arg15[%c5_310, %c256_311], %242 {strides = array<i32>} : memref<8x1024xf32, #tpu.memory_space<vmem>>, vector<1x128xf32>,
    %c3_312 = arith.constant 3 : index
    %c640_313 = arith.constant 640 : index
    %244 = vector.load %arg14[%c3_312, %c640_313] : memref<8x1024xf32, #tpu.memory_space<vmem>>, vector<1x128xf32>
    %c5_314 = arith.constant 5 : index
    %c384_315 = arith.constant 384 : index
    %245 = vector.load %arg15[%c5_314, %c384_315] : memref<8x1024xf32, #tpu.memory_space<vmem>>, vector<1x128xf32>
    tpu.vector_store %arg15[%c5_314, %c384_315], %244 {strides = array<i32>} : memref<8x1024xf32, #tpu.memory_space<vmem>>, vector<1x128xf32>,
    %c4_316 = arith.constant 4 : index
    %c640_317 = arith.constant 640 : index
    %246 = vector.load %arg14[%c4_316, %c640_317] : memref<8x1024xf32, #tpu.memory_space<vmem>>, vector<1x128xf32>
    %c5_318 = arith.constant 5 : index
    %c512_319 = arith.constant 512 : index
    %247 = vector.load %arg15[%c5_318, %c512_319] : memref<8x1024xf32, #tpu.memory_space<vmem>>, vector<1x128xf32>
    tpu.vector_store %arg15[%c5_318, %c512_319], %246 {strides = array<i32>} : memref<8x1024xf32, #tpu.memory_space<vmem>>, vector<1x128xf32>,
    %c5_320 = arith.constant 5 : index
    %c640_321 = arith.constant 640 : index
    %248 = vector.load %arg14[%c5_320, %c640_321] : memref<8x1024xf32, #tpu.memory_space<vmem>>, vector<1x128xf32>
    %c5_322 = arith.constant 5 : index
    %c640_323 = arith.constant 640 : index
    %249 = vector.load %arg15[%c5_322, %c640_323] : memref<8x1024xf32, #tpu.memory_space<vmem>>, vector<1x128xf32>
    tpu.vector_store %arg15[%c5_322, %c640_323], %248 {strides = array<i32>} : memref<8x1024xf32, #tpu.memory_space<vmem>>, vector<1x128xf32>,
    %c6_324 = arith.constant 6 : index
    %c640_325 = arith.constant 640 : index
    %250 = vector.load %arg14[%c6_324, %c640_325] : memref<8x1024xf32, #tpu.memory_space<vmem>>, vector<1x128xf32>
    %c5_326 = arith.constant 5 : index
    %c768_327 = arith.constant 768 : index
    %251 = vector.load %arg15[%c5_326, %c768_327] : memref<8x1024xf32, #tpu.memory_space<vmem>>, vector<1x128xf32>
    tpu.vector_store %arg15[%c5_326, %c768_327], %250 {strides = array<i32>} : memref<8x1024xf32, #tpu.memory_space<vmem>>, vector<1x128xf32>,
    %c7_328 = arith.constant 7 : index
    %c640_329 = arith.constant 640 : index
    %252 = vector.load %arg14[%c7_328, %c640_329] : memref<8x1024xf32, #tpu.memory_space<vmem>>, vector<1x128xf32>
    %c5_330 = arith.constant 5 : index
    %c896_331 = arith.constant 896 : index
    %253 = vector.load %arg15[%c5_330, %c896_331] : memref<8x1024xf32, #tpu.memory_space<vmem>>, vector<1x128xf32>
    tpu.vector_store %arg15[%c5_330, %c896_331], %252 {strides = array<i32>} : memref<8x1024xf32, #tpu.memory_space<vmem>>, vector<1x128xf32>,
    %c0_332 = arith.constant 0 : index
    %c768_333 = arith.constant 768 : index
    %254 = vector.load %arg14[%c0_332, %c768_333] : memref<8x1024xf32, #tpu.memory_space<vmem>>, vector<1x128xf32>
    %c6_334 = arith.constant 6 : index
    %c0_335 = arith.constant 0 : index
    %255 = vector.load %arg15[%c6_334, %c0_335] : memref<8x1024xf32, #tpu.memory_space<vmem>>, vector<1x128xf32>
    tpu.vector_store %arg15[%c6_334, %c0_335], %254 {strides = array<i32>} : memref<8x1024xf32, #tpu.memory_space<vmem>>, vector<1x128xf32>,
    %c1_336 = arith.constant 1 : index
    %c768_337 = arith.constant 768 : index
    %256 = vector.load %arg14[%c1_336, %c768_337] : memref<8x1024xf32, #tpu.memory_space<vmem>>, vector<1x128xf32>
    %c6_338 = arith.constant 6 : index
    %c128_339 = arith.constant 128 : index
    %257 = vector.load %arg15[%c6_338, %c128_339] : memref<8x1024xf32, #tpu.memory_space<vmem>>, vector<1x128xf32>
    tpu.vector_store %arg15[%c6_338, %c128_339], %256 {strides = array<i32>} : memref<8x1024xf32, #tpu.memory_space<vmem>>, vector<1x128xf32>,
    %c2_340 = arith.constant 2 : index
    %c768_341 = arith.constant 768 : index
    %258 = vector.load %arg14[%c2_340, %c768_341] : memref<8x1024xf32, #tpu.memory_space<vmem>>, vector<1x128xf32>
    %c6_342 = arith.constant 6 : index
    %c256_343 = arith.constant 256 : index
    %259 = vector.load %arg15[%c6_342, %c256_343] : memref<8x1024xf32, #tpu.memory_space<vmem>>, vector<1x128xf32>
    tpu.vector_store %arg15[%c6_342, %c256_343], %258 {strides = array<i32>} : memref<8x1024xf32, #tpu.memory_space<vmem>>, vector<1x128xf32>,
    %c3_344 = arith.constant 3 : index
    %c768_345 = arith.constant 768 : index
    %260 = vector.load %arg14[%c3_344, %c768_345] : memref<8x1024xf32, #tpu.memory_space<vmem>>, vector<1x128xf32>
    %c6_346 = arith.constant 6 : index
    %c384_347 = arith.constant 384 : index
    %261 = vector.load %arg15[%c6_346, %c384_347] : memref<8x1024xf32, #tpu.memory_space<vmem>>, vector<1x128xf32>
    tpu.vector_store %arg15[%c6_346, %c384_347], %260 {strides = array<i32>} : memref<8x1024xf32, #tpu.memory_space<vmem>>, vector<1x128xf32>,
    %c4_348 = arith.constant 4 : index
    %c768_349 = arith.constant 768 : index
    %262 = vector.load %arg14[%c4_348, %c768_349] : memref<8x1024xf32, #tpu.memory_space<vmem>>, vector<1x128xf32>
    %c6_350 = arith.constant 6 : index
    %c512_351 = arith.constant 512 : index
    %263 = vector.load %arg15[%c6_350, %c512_351] : memref<8x1024xf32, #tpu.memory_space<vmem>>, vector<1x128xf32>
    tpu.vector_store %arg15[%c6_350, %c512_351], %262 {strides = array<i32>} : memref<8x1024xf32, #tpu.memory_space<vmem>>, vector<1x128xf32>,
    %c5_352 = arith.constant 5 : index
    %c768_353 = arith.constant 768 : index
    %264 = vector.load %arg14[%c5_352, %c768_353] : memref<8x1024xf32, #tpu.memory_space<vmem>>, vector<1x128xf32>
    %c6_354 = arith.constant 6 : index
    %c640_355 = arith.constant 640 : index
    %265 = vector.load %arg15[%c6_354, %c640_355] : memref<8x1024xf32, #tpu.memory_space<vmem>>, vector<1x128xf32>
    tpu.vector_store %arg15[%c6_354, %c640_355], %264 {strides = array<i32>} : memref<8x1024xf32, #tpu.memory_space<vmem>>, vector<1x128xf32>,
    %c6_356 = arith.constant 6 : index
    %c768_357 = arith.constant 768 : index
    %266 = vector.load %arg14[%c6_356, %c768_357] : memref<8x1024xf32, #tpu.memory_space<vmem>>, vector<1x128xf32>
    %c6_358 = arith.constant 6 : index
    %c768_359 = arith.constant 768 : index
    %267 = vector.load %arg15[%c6_358, %c768_359] : memref<8x1024xf32, #tpu.memory_space<vmem>>, vector<1x128xf32>
    tpu.vector_store %arg15[%c6_358, %c768_359], %266 {strides = array<i32>} : memref<8x1024xf32, #tpu.memory_space<vmem>>, vector<1x128xf32>,
    %c7_360 = arith.constant 7 : index
    %c768_361 = arith.constant 768 : index
    %268 = vector.load %arg14[%c7_360, %c768_361] : memref<8x1024xf32, #tpu.memory_space<vmem>>, vector<1x128xf32>
    %c6_362 = arith.constant 6 : index
    %c896_363 = arith.constant 896 : index
    %269 = vector.load %arg15[%c6_362, %c896_363] : memref<8x1024xf32, #tpu.memory_space<vmem>>, vector<1x128xf32>
    tpu.vector_store %arg15[%c6_362, %c896_363], %268 {strides = array<i32>} : memref<8x1024xf32, #tpu.memory_space<vmem>>, vector<1x128xf32>,
    %c0_364 = arith.constant 0 : index
    %c896_365 = arith.constant 896 : index
    %270 = vector.load %arg14[%c0_364, %c896_365] : memref<8x1024xf32, #tpu.memory_space<vmem>>, vector<1x128xf32>
    %c7_366 = arith.constant 7 : index
    %c0_367 = arith.constant 0 : index
    %271 = vector.load %arg15[%c7_366, %c0_367] : memref<8x1024xf32, #tpu.memory_space<vmem>>, vector<1x128xf32>
    tpu.vector_store %arg15[%c7_366, %c0_367], %270 {strides = array<i32>} : memref<8x1024xf32, #tpu.memory_space<vmem>>, vector<1x128xf32>,
    %c1_368 = arith.constant 1 : index
    %c896_369 = arith.constant 896 : index
    %272 = vector.load %arg14[%c1_368, %c896_369] : memref<8x1024xf32, #tpu.memory_space<vmem>>, vector<1x128xf32>
    %c7_370 = arith.constant 7 : index
    %c128_371 = arith.constant 128 : index
    %273 = vector.load %arg15[%c7_370, %c128_371] : memref<8x1024xf32, #tpu.memory_space<vmem>>, vector<1x128xf32>
    tpu.vector_store %arg15[%c7_370, %c128_371], %272 {strides = array<i32>} : memref<8x1024xf32, #tpu.memory_space<vmem>>, vector<1x128xf32>,
    %c2_372 = arith.constant 2 : index
    %c896_373 = arith.constant 896 : index
    %274 = vector.load %arg14[%c2_372, %c896_373] : memref<8x1024xf32, #tpu.memory_space<vmem>>, vector<1x128xf32>
    %c7_374 = arith.constant 7 : index
    %c256_375 = arith.constant 256 : index
    %275 = vector.load %arg15[%c7_374, %c256_375] : memref<8x1024xf32, #tpu.memory_space<vmem>>, vector<1x128xf32>
    tpu.vector_store %arg15[%c7_374, %c256_375], %274 {strides = array<i32>} : memref<8x1024xf32, #tpu.memory_space<vmem>>, vector<1x128xf32>,
    %c3_376 = arith.constant 3 : index
    %c896_377 = arith.constant 896 : index
    %276 = vector.load %arg14[%c3_376, %c896_377] : memref<8x1024xf32, #tpu.memory_space<vmem>>, vector<1x128xf32>
    %c7_378 = arith.constant 7 : index
    %c384_379 = arith.constant 384 : index
    %277 = vector.load %arg15[%c7_378, %c384_379] : memref<8x1024xf32, #tpu.memory_space<vmem>>, vector<1x128xf32>
    tpu.vector_store %arg15[%c7_378, %c384_379], %276 {strides = array<i32>} : memref<8x1024xf32, #tpu.memory_space<vmem>>, vector<1x128xf32>,
    %c4_380 = arith.constant 4 : index
    %c896_381 = arith.constant 896 : index
    %278 = vector.load %arg14[%c4_380, %c896_381] : memref<8x1024xf32, #tpu.memory_space<vmem>>, vector<1x128xf32>
    %c7_382 = arith.constant 7 : index
    %c512_383 = arith.constant 512 : index
    %279 = vector.load %arg15[%c7_382, %c512_383] : memref<8x1024xf32, #tpu.memory_space<vmem>>, vector<1x128xf32>
    tpu.vector_store %arg15[%c7_382, %c512_383], %278 {strides = array<i32>} : memref<8x1024xf32, #tpu.memory_space<vmem>>, vector<1x128xf32>,
    %c5_384 = arith.constant 5 : index
    %c896_385 = arith.constant 896 : index
    %280 = vector.load %arg14[%c5_384, %c896_385] : memref<8x1024xf32, #tpu.memory_space<vmem>>, vector<1x128xf32>
    %c7_386 = arith.constant 7 : index
    %c640_387 = arith.constant 640 : index
    %281 = vector.load %arg15[%c7_386, %c640_387] : memref<8x1024xf32, #tpu.memory_space<vmem>>, vector<1x128xf32>
    tpu.vector_store %arg15[%c7_386, %c640_387], %280 {strides = array<i32>} : memref<8x1024xf32, #tpu.memory_space<vmem>>, vector<1x128xf32>,
    %c6_388 = arith.constant 6 : index
    %c896_389 = arith.constant 896 : index
    %282 = vector.load %arg14[%c6_388, %c896_389] : memref<8x1024xf32, #tpu.memory_space<vmem>>, vector<1x128xf32>
    %c7_390 = arith.constant 7 : index
    %c768_391 = arith.constant 768 : index
    %283 = vector.load %arg15[%c7_390, %c768_391] : memref<8x1024xf32, #tpu.memory_space<vmem>>, vector<1x128xf32>
    tpu.vector_store %arg15[%c7_390, %c768_391], %282 {strides = array<i32>} : memref<8x1024xf32, #tpu.memory_space<vmem>>, vector<1x128xf32>,
    %c7_392 = arith.constant 7 : index
    %c896_393 = arith.constant 896 : index
    %284 = vector.load %arg14[%c7_392, %c896_393] : memref<8x1024xf32, #tpu.memory_space<vmem>>, vector<1x128xf32>
    %c7_394 = arith.constant 7 : index
    %c896_395 = arith.constant 896 : index
    %285 = vector.load %arg15[%c7_394, %c896_395] : memref<8x1024xf32, #tpu.memory_space<vmem>>, vector<1x128xf32>
    tpu.vector_store %arg15[%c7_394, %c896_395], %284 {strides = array<i32>} : memref<8x1024xf32, #tpu.memory_space<vmem>>, vector<1x128xf32>,
    %c0_396 = arith.constant 0 : index
    %c0_397 = arith.constant 0 : index
    %286 = vector.load %arg15[%c0_396, %c0_397] : memref<8x1024xf32, #tpu.memory_space<vmem>>, vector<8x1024xf32>
    %c0_398 = arith.constant 0 : index
    %c0_399 = arith.constant 0 : index
    %287 = vector.load %arg8[%c0_398, %c0_399] : memref<1x32xf32, #tpu.memory_space<vmem>>, vector<1x32xf32>
    %c0_400 = arith.constant 0 : index
    %c0_401 = arith.constant 0 : index
    %288 = vector.load %arg7[%c0_400, %c0_401] : memref<1024x32xf32, #tpu.memory_space<vmem>>, vector<1024x32xf32>
    %cst_402 = arith.constant dense<0.000000e+00> : vector<8x32xf32>
    %289 = tpu.matmul %286, %288, %cst_402 {dimension_numbers = #tpu.dot_dimension_numbers<[1], [0], [0], [1], [0, 0, 1, 1], [], []>} : vector<8x1024xf32>, vector<1024x32xf32>, vector<8x32xf32> -> vector<8x32xf32>
    %290 = vector.broadcast %287 : vector<1x32xf32> to vector<8x32xf32>
    %291 = arith.addf %289, %290 : vector<8x32xf32>
    %cst_403 = arith.constant 0.000000e+00 : f32
    %292 = vector.broadcast %cst_403 : f32 to vector<8x32xf32>
    %293 = arith.maximumf %291, %292 : vector<8x32xf32>
    %c0_404 = arith.constant 0 : index
    %c0_405 = arith.constant 0 : index
    %294 = vector.load %arg10[%c0_404, %c0_405] : memref<1x1xf32, #tpu.memory_space<vmem>>, vector<1x1xf32>
    %c0_406 = arith.constant 0 : index
    %c0_407 = arith.constant 0 : index
    %295 = vector.load %arg9[%c0_406, %c0_407] : memref<32x1xf32, #tpu.memory_space<vmem>>, vector<32x1xf32>
    %cst_408 = arith.constant dense<0.000000e+00> : vector<8x1xf32>
    %296 = tpu.matmul %293, %295, %cst_408 {dimension_numbers = #tpu.dot_dimension_numbers<[1], [0], [0], [1], [0, 0, 1, 1], [], []>} : vector<8x32xf32>, vector<32x1xf32>, vector<8x1xf32> -> vector<8x1xf32>
    %297 = vector.broadcast %294 : vector<1x1xf32> to vector<8x1xf32>
    %298 = arith.addf %296, %297 : vector<8x1xf32>
    %299 = vector.extract_strided_slice %298 {offsets = [0, 0], sizes = [1, 1], strides = [1, 1]} : vector<8x1xf32> to vector<1x1xf32>
    %c0_409 = arith.constant 0 : index
    %c0_410 = arith.constant 0 : index
    %c0_411 = arith.constant 0 : index
    %300 = vector.load %arg11[%c0_409, %c0_410, %c0_411] : memref<1x1x8xf32, #tpu.memory_space<vmem>>, vector<1x1x1xf32>
    %301 = vector.shape_cast %300 : vector<1x1x1xf32> to vector<1x1xf32>
    %302 = vector.shape_cast %299 : vector<1x1xf32> to vector<1x1x1xf32>
    tpu.vector_store %arg11[%c0_409, %c0_410, %c0_411], %302 {strides = array<i32>} : memref<1x1x8xf32, #tpu.memory_space<vmem>>, vector<1x1x1xf32>,
    %303 = vector.extract_strided_slice %298 {offsets = [1, 0], sizes = [1, 1], strides = [1, 1]} : vector<8x1xf32> to vector<1x1xf32>
    %c0_412 = arith.constant 0 : index
    %c0_413 = arith.constant 0 : index
    %c1_414 = arith.constant 1 : index
    %304 = vector.load %arg11[%c0_412, %c0_413, %c1_414] : memref<1x1x8xf32, #tpu.memory_space<vmem>>, vector<1x1x1xf32>
    %305 = vector.shape_cast %304 : vector<1x1x1xf32> to vector<1x1xf32>
    %306 = vector.shape_cast %303 : vector<1x1xf32> to vector<1x1x1xf32>
    tpu.vector_store %arg11[%c0_412, %c0_413, %c1_414], %306 {strides = array<i32>} : memref<1x1x8xf32, #tpu.memory_space<vmem>>, vector<1x1x1xf32>,
    %307 = vector.extract_strided_slice %298 {offsets = [2, 0], sizes = [1, 1], strides = [1, 1]} : vector<8x1xf32> to vector<1x1xf32>
    %c0_415 = arith.constant 0 : index
    %c0_416 = arith.constant 0 : index
    %c2_417 = arith.constant 2 : index
    %308 = vector.load %arg11[%c0_415, %c0_416, %c2_417] : memref<1x1x8xf32, #tpu.memory_space<vmem>>, vector<1x1x1xf32>
    %309 = vector.shape_cast %308 : vector<1x1x1xf32> to vector<1x1xf32>
    %310 = vector.shape_cast %307 : vector<1x1xf32> to vector<1x1x1xf32>
    tpu.vector_store %arg11[%c0_415, %c0_416, %c2_417], %310 {strides = array<i32>} : memref<1x1x8xf32, #tpu.memory_space<vmem>>, vector<1x1x1xf32>,
    %311 = vector.extract_strided_slice %298 {offsets = [3, 0], sizes = [1, 1], strides = [1, 1]} : vector<8x1xf32> to vector<1x1xf32>
    %c0_418 = arith.constant 0 : index
    %c0_419 = arith.constant 0 : index
    %c3_420 = arith.constant 3 : index
    %312 = vector.load %arg11[%c0_418, %c0_419, %c3_420] : memref<1x1x8xf32, #tpu.memory_space<vmem>>, vector<1x1x1xf32>
    %313 = vector.shape_cast %312 : vector<1x1x1xf32> to vector<1x1xf32>
    %314 = vector.shape_cast %311 : vector<1x1xf32> to vector<1x1x1xf32>
    tpu.vector_store %arg11[%c0_418, %c0_419, %c3_420], %314 {strides = array<i32>} : memref<1x1x8xf32, #tpu.memory_space<vmem>>, vector<1x1x1xf32>,
    %315 = vector.extract_strided_slice %298 {offsets = [4, 0], sizes = [1, 1], strides = [1, 1]} : vector<8x1xf32> to vector<1x1xf32>
    %c0_421 = arith.constant 0 : index
    %c0_422 = arith.constant 0 : index
    %c4_423 = arith.constant 4 : index
    %316 = vector.load %arg11[%c0_421, %c0_422, %c4_423] : memref<1x1x8xf32, #tpu.memory_space<vmem>>, vector<1x1x1xf32>
    %317 = vector.shape_cast %316 : vector<1x1x1xf32> to vector<1x1xf32>
    %318 = vector.shape_cast %315 : vector<1x1xf32> to vector<1x1x1xf32>
    tpu.vector_store %arg11[%c0_421, %c0_422, %c4_423], %318 {strides = array<i32>} : memref<1x1x8xf32, #tpu.memory_space<vmem>>, vector<1x1x1xf32>,
    %319 = vector.extract_strided_slice %298 {offsets = [5, 0], sizes = [1, 1], strides = [1, 1]} : vector<8x1xf32> to vector<1x1xf32>
    %c0_424 = arith.constant 0 : index
    %c0_425 = arith.constant 0 : index
    %c5_426 = arith.constant 5 : index
    %320 = vector.load %arg11[%c0_424, %c0_425, %c5_426] : memref<1x1x8xf32, #tpu.memory_space<vmem>>, vector<1x1x1xf32>
    %321 = vector.shape_cast %320 : vector<1x1x1xf32> to vector<1x1xf32>
    %322 = vector.shape_cast %319 : vector<1x1xf32> to vector<1x1x1xf32>
    tpu.vector_store %arg11[%c0_424, %c0_425, %c5_426], %322 {strides = array<i32>} : memref<1x1x8xf32, #tpu.memory_space<vmem>>, vector<1x1x1xf32>,
    %323 = vector.extract_strided_slice %298 {offsets = [6, 0], sizes = [1, 1], strides = [1, 1]} : vector<8x1xf32> to vector<1x1xf32>
    %c0_427 = arith.constant 0 : index
    %c0_428 = arith.constant 0 : index
    %c6_429 = arith.constant 6 : index
    %324 = vector.load %arg11[%c0_427, %c0_428, %c6_429] : memref<1x1x8xf32, #tpu.memory_space<vmem>>, vector<1x1x1xf32>
    %325 = vector.shape_cast %324 : vector<1x1x1xf32> to vector<1x1xf32>
    %326 = vector.shape_cast %323 : vector<1x1xf32> to vector<1x1x1xf32>
    tpu.vector_store %arg11[%c0_427, %c0_428, %c6_429], %326 {strides = array<i32>} : memref<1x1x8xf32, #tpu.memory_space<vmem>>, vector<1x1x1xf32>,
    %327 = vector.extract_strided_slice %298 {offsets = [7, 0], sizes = [1, 1], strides = [1, 1]} : vector<8x1xf32> to vector<1x1xf32>
    %c0_430 = arith.constant 0 : index
    %c0_431 = arith.constant 0 : index
    %c7_432 = arith.constant 7 : index
    %328 = vector.load %arg11[%c0_430, %c0_431, %c7_432] : memref<1x1x8xf32, #tpu.memory_space<vmem>>, vector<1x1x1xf32>
    %329 = vector.shape_cast %328 : vector<1x1x1xf32> to vector<1x1xf32>
    %330 = vector.shape_cast %327 : vector<1x1xf32> to vector<1x1x1xf32>
    tpu.vector_store %arg11[%c0_430, %c0_431, %c7_432], %330 {strides = array<i32>} : memref<1x1x8xf32, #tpu.memory_space<vmem>>, vector<1x1x1xf32>,
    return
  }
  func.func @transform_0(%arg0: i32) -> (i32, i32) {
    %c0_i32 = arith.constant 0 : i32
    %c0_i32_0 = arith.constant 0 : i32
    %c0_i32_1 = arith.constant 0 : i32
    return %c0_i32, %c0_i32_0 : i32, i32
  }
  func.func @transform_1(%arg0: i32) -> (i32, i32) {
    %c0_i32 = arith.constant 0 : i32
    %c0_i32_0 = arith.constant 0 : i32
    return %c0_i32, %arg0 : i32, i32
  }
  func.func @transform_2(%arg0: i32) -> (i32, i32) {
    %c0_i32 = arith.constant 0 : i32
    %c0_i32_0 = arith.constant 0 : i32
    %c0_i32_1 = arith.constant 0 : i32
    return %c0_i32, %c0_i32_0 : i32, i32
  }
  func.func @transform_3(%arg0: i32) -> (i32, i32) {
    %c0_i32 = arith.constant 0 : i32
    %c0_i32_0 = arith.constant 0 : i32
    %c0_i32_1 = arith.constant 0 : i32
    return %c0_i32, %c0_i32_0 : i32, i32
  }
  func.func @transform_4(%arg0: i32) -> (i32, i32) {
    %c0_i32 = arith.constant 0 : i32
    %c0_i32_0 = arith.constant 0 : i32
    %c0_i32_1 = arith.constant 0 : i32
    return %c0_i32, %c0_i32_0 : i32, i32
  }
  func.func @transform_5(%arg0: i32) -> (i32, i32) {
    %c0_i32 = arith.constant 0 : i32
    %c0_i32_0 = arith.constant 0 : i32
    %c0_i32_1 = arith.constant 0 : i32
    return %c0_i32, %c0_i32_0 : i32, i32
  }
  func.func @transform_6(%arg0: i32) -> (i32, i32) {
    %c0_i32 = arith.constant 0 : i32
    %c0_i32_0 = arith.constant 0 : i32
    %c0_i32_1 = arith.constant 0 : i32
    return %c0_i32, %c0_i32_0 : i32, i32
  }
  func.func @transform_7(%arg0: i32) -> (i32, i32) {
    %c0_i32 = arith.constant 0 : i32
    %c0_i32_0 = arith.constant 0 : i32
    %c0_i32_1 = arith.constant 0 : i32
    return %c0_i32, %c0_i32_0 : i32, i32
  }
  func.func @transform_8(%arg0: i32) -> (i32, i32) {
    %c0_i32 = arith.constant 0 : i32
    %c0_i32_0 = arith.constant 0 : i32
    %c0_i32_1 = arith.constant 0 : i32
    return %c0_i32, %c0_i32_0 : i32, i32
  }
  func.func @transform_9(%arg0: i32) -> (i32, i32) {
    %c0_i32 = arith.constant 0 : i32
    %c0_i32_0 = arith.constant 0 : i32
    %c0_i32_1 = arith.constant 0 : i32
    return %c0_i32, %c0_i32_0 : i32, i32
  }
  func.func @transform_10(%arg0: i32) -> (i32, i32, i32) {
    %c0_i32 = arith.constant 0 : i32
    %c0_i32_0 = arith.constant 0 : i32
    %c0_i32_1 = arith.constant 0 : i32
    return %arg0, %c0_i32, %c0_i32_0 : i32, i32, i32
  }
}

</mosaic_0001>

<bundles_post_ra>
// kernel: cnnrul_forward_fused.1
= control target key start
LH: loop header
LB: loop body
LE: loop exit
PB: predicated region body
PF: predicated region fallthrough
CT: control target
= control target key end

     0   :  { %s2600_s15 = smov 0   ;;  %s3891_s0 = inlined_call_operand.vmem [shape: f32[9,1024], index: 0, kind: input, shape index: {}]   ;;  %s3892_s1 = inlined_call_operand.vmem [shape: f32[1,2048], index: 1, kind: input, shape index: {}]   ;;  %s3893_s2 = inlined_call_operand.vmem [shape: f32[8,16], index: 2, kind: input, shape index: {}]   ;;  %s3894_s3 = inlined_call_operand.vmem [shape: f32[8,1], index: 3, kind: input, shape index: {}]   ;;  %s3895_s4 = inlined_call_operand.vmem [shape: f32[8,72], index: 4, kind: input, shape index: {}]   ;;  %s3896_s5 = inlined_call_operand.vmem [shape: f32[8,1], index: 5, kind: input, shape index: {}]   ;;  %s3897_s6 = inlined_call_operand.vmem [shape: f32[1024,32], index: 6, kind: input, shape index: {}]   ;;  %s3898_s7 = inlined_call_operand.vmem [shape: f32[1,32], index: 7, kind: input, shape index: {}]   ;;  %s3899_s8 = inlined_call_operand.vmem [shape: f32[32,1], index: 8, kind: input, shape index: {}]   ;;  %s3900_s9 = inlined_call_operand.<no memory space> [shape: f32[1,1], index: 9, kind: input, shape index: {}]   ;;  %s3901_s10 = inlined_call_operand.vmem [shape: f32[2,1,8], index: 10, kind: output, shape index: {}]  }
   0x1   :  { %v15_v0 = vstv %s3900_s9 }
   0x2   :  { %16 = vst [vmem:[#allocation6] sm:$0x1] %v15_v0 }
   0x3 LB: > { %s2606_s16 = sadd.s32 4294967295, %s2522_s15   ;;  %p2373_p0 = scmp.ge.s32.totalorder %s2522_s15, 1  ;;  %s2522_s15 = sphi %s2600_s15, %s22_s15  }
   0x4   : > { %p314_p1 = scmp.lt.s32.totalorder %s2522_s15, 3 }
   0x6   : > { %p315_p2 = pnand %p2373_p0, %p314_p1 }
   0x7   : > { %s2374_s17 = sshll.u32 (!%p315_p2), %s2606_s16, 3  ;;  %s2525_s20 = smov (!%p315_p2), 9  }
   0x8   : > { %318 = sbr.rel (%p315_p2) target bundleno = 1449 (0x5a9), region = 60  ;;  %p350_p3 = scmp.lt.s32.totalorder (!%p315_p2), %s2374_s17, 15 }
   0x9   : > { %s2526_s21 = smov (!%p315_p2), 110   ;;  %s2527_s22 = smov (!%p315_p2), 126  }
   0xa   : > { %s2528_s23 = smov (!%p315_p2), 127   ;;  %s2529_s28 = smov (!%p315_p2), 118  }
   0xb   : > { %s2530_s29 = smov (!%p315_p2), 112   ;;  %s2531_s30 = smov (!%p315_p2), 120  }
   0xc   : > { %s2532_s11 = smov (!%p315_p2), 119   ;;  %s2533_s12 = smov (!%p315_p2), 111  }
   0xd   : > { %vm357_vm0 = vcmask 72704   ;;  %vm359_vm1 = vcmask 146504   ;;  %v2524_v1 = vmov 0.0   ;;  %s4018_s17 = smov (!%p350_p3, %s2374_s17), 15  ;;  %v370_v3 = vlaneseq  ;;  %p354_p4 = scmp.lt.s32.totalorder %s2606_s16, 1 }
   0xe   : > { %358 = vst.msk [vmem:[#allocation2] sm:$0xff] %vm357_vm0, %v2524_v1  ;;  %s352_s19 = scalar_lea.vmem %s3892_s1, %s4018_s17  ;;  %v385_v10 = vld [vmem:[%s3891_s0] ss:$8 sm:$0xf]  ;;  %vm409_vm5 = vcmask 1046528   ;;  %vm3905_vm7 = vcmask 1031168  }
   0xf   : > { %360 = vst.msk [vmem:[#allocation2 + $0x40] sm:$0xff] %vm359_vm1, %v2524_v1  ;;  %v361_v2 = vld [vmem:[%s352_s19] sm:$0xff]  ;;  %vm377_vm2 = vcmp.lt.s32.totalorder %v370_v3, 9  ;;  %vm371_vm3 = vcmp.ge.s32.totalorder %v370_v3, 9  ;;  %vm3902_vm9 = vcmask 916480   ;;  %vm3906_vm10 = vcmask 900096  }
  0x10   : > { %587 = vst [vmem:[#allocation3 + $0x40] sm:$0xfe] %v2524_v1  ;;  %364 = vrot.lane.b32.xlu0 %v361_v2, %s2525_s20  ;;  %v386_v11 = vld [vmem:[%s3891_s0] ss:$8 sm:$0xf0]  ;;  %vm411_vm11 = vcmask 1039360  }
  0x11   : > { %588 = vst [vmem:[#allocation3 + $0x48] sm:$0xfe] %v2524_v1  ;;  %v387_v14 = vor.u32 %v386_v11, %v385_v10  ;;  %v2377_v48 = vld [vmem:[%s3891_s0 + $0x2] ss:$8 sm:$0xf]  ;;  %vm505_vm14 = vcmask 965632  }
  0x12   : > { %589 = vst [vmem:[#allocation3 + $0x50] sm:$0xfe] %v2524_v1  ;;  %v2378_v49 = vld [vmem:[%s3891_s0 + $0x2] ss:$8 sm:$0xf0]  ;;  %vm3903_vm15 = vcmask 982016  }
  0x13   : > { %590 = vst [vmem:[#allocation3 + $0x58] sm:$0xfe] %v2524_v1  ;;  %vm388_vm4 = vcmp.ne.f32.partialorder %v387_v14, 0.0  ;;  %v425_v51 = vor.u32 %v2378_v49, %v2377_v48  ;;  %v2383_v56 = vld [vmem:[%s3891_s0 + $0x6] ss:$8 sm:$0xf] }
  0x14   : > { %591 = vst [vmem:[#allocation3 + $0x60] sm:$0xfe] %v2524_v1  ;;  %v2384_v57 = vld [vmem:[%s3891_s0 + $0x6] ss:$8 sm:$0xf0]  ;;  %s4020_s16 = smov (!%p354_p4, %s2606_s16), 1 }
  0x15   : > { %592 = vst [vmem:[#allocation3 + $0x68] sm:$0xfe] %v2524_v1  ;;  %vm426_vm6 = vcmp.ne.f32.partialorder %v425_v51, 0.0  ;;  %v519_v61 = vor.u32 %v2384_v57, %v2383_v56  ;;  %v2387_v3 = vld [vmem:[%s3891_s0 + $0x40] ss:$8 sm:$0xf] }
  0x16   : > { %593 = vst [vmem:[#allocation3 + $0x70] sm:$0xfe] %v2524_v1  ;;  %v362_v51 = vld [vmem:[%s3894_s3] sm:$0xff]  ;;  %s2536_s14 = smov 2   ;;  %s2537_s17 = smov 1  }
  0x17   : > { %594 = vst [vmem:[#allocation3 + $0x78] sm:$0xfe] %v2524_v1  ;;  %vm520_vm8 = vcmp.ne.f32.partialorder %v519_v61, 0.0  ;;  %s2538_s9 = smov 6   ;;  %s2539_s18 = smov 5  }
  0x18   : > { %s2540_s19 = smov 4  }
  0x82   : > { %v365_v4 = vpop.permute.xlu0 %364 }
  0x83   : > { %v366_v5 = vrot.slane %v365_v4, 7 }
  0x85   : > { %v367_v6 = vsel %vm357_vm0, %v366_v5, %v365_v4  ;;  %380 = vst.msk [vmem:[#allocation2 + $0x40] ss:$8 sm:$0x1] %vm377_vm2, %v366_v5  ;;  %v2388_v4 = vld [vmem:[%s3891_s0 + $0x40] ss:$8 sm:$0xf0] }
  0x86   : > { %374 = vst.msk [vmem:[#allocation2] ss:$8 sm:$0xf] %vm371_vm3, %v367_v6  ;;  %v569_v10 = vor.u32 %v2388_v4, %v2387_v3 }
  0x87   : > { %375 = vst.msk [vmem:[#allocation2] ss:$8 sm:$0xf0] %vm371_vm3, %v367_v6  ;;  %v2375_v6 = vld [vmem:[%s3891_s0 + $0x1] ss:$8 sm:$0xf] }
  0x88   : > { %vm570_vm12 = vcmp.ne.f32.partialorder %v569_v10, 0.0  ;;  %vm555_vm3 = vcmask 908288  }
  0x8c   : > { %v565_v7 = vld [vmem:[#allocation2 + $0x40] ss:$8 sm:$0x1] }
  0x8d   : > { %v421_v8 = vld [vmem:[#allocation2 + $0x40] ss:$8 sm:$0x1]  ;;  %575 = vrot.lane.b32.xlu1 %v565_v7, %s2526_s21  ;;  %v2376_v7 = vld [vmem:[%s3891_s0 + $0x1] ss:$8 sm:$0xf0] }
  0x8e   : > { %431 = vrot.lane.b32.xlu0 %v421_v8, %s2527_s22  ;;  %v395_v9 = vld [vmem:[#allocation2 + $0x40] ss:$8 sm:$0x1]  ;;  %v399_v11 = vor.u32 %v2376_v7, %v2375_v6 }
  0x8f   : > { %405 = vrot.lane.b32.xlu2 %v395_v9, %s2528_s23  ;;  %v382_v12 = vld [vmem:[#allocation2] ss:$8 sm:$0xf] }
  0x90   : > { %v383_v13 = vld [vmem:[#allocation2] ss:$8 sm:$0xf0]  ;;  %vm400_vm13 = vcmp.ne.f32.partialorder %v399_v11, 0.0 }
  0x91   : > { %v490_v15 = vld [vmem:[#allocation2 + $0x40] ss:$8 sm:$0x1]  ;;  %v384_v18 = vor.u32 %v383_v13, %v382_v12 }
  0x92   : > { %v515_v16 = vld [vmem:[#allocation2 + $0x40] ss:$8 sm:$0x1] }
  0x93   : > { %v446_v17 = vld [vmem:[#allocation2 + $0x40] ss:$8 sm:$0x1]  ;;  %v389_v25 = vsel %vm388_vm4, %v384_v18, 0.0 }
  0x94   : > { %v562_v19 = vld [vmem:[#allocation2] ss:$8 sm:$0xf]  ;;  %390 = vst [vmem:[#allocation3] ss:$8 sm:$0xf] %v389_v25 }
  0x95   : > { %500 = vrot.lane.b32.xlu1 %v490_v15, %s2529_s28  ;;  %v563_v20 = vld [vmem:[#allocation2] ss:$8 sm:$0xf0]  ;;  %391 = vst [vmem:[#allocation3] ss:$8 sm:$0xf0] %v389_v25 }
  0x96   : > { %525 = vrot.lane.b32.xlu0 %v515_v16, %s2530_s29  ;;  %v418_v21 = vld [vmem:[#allocation2] ss:$8 sm:$0xf]  ;;  %v564_v26 = vor.u32 %v563_v20, %v562_v19  ;;  %v2381_v18 = vld [vmem:[%s3891_s0 + $0x5] ss:$8 sm:$0xf] }
  0x97   : > { %456 = vrot.lane.b32.xlu2 %v446_v17, %s2531_s30  ;;  %v392_v22 = vld [vmem:[#allocation2] ss:$8 sm:$0xf]  ;;  %v2382_v19 = vld [vmem:[%s3891_s0 + $0x5] ss:$8 sm:$0xf0] }
  0x98   : > { %v393_v23 = vld [vmem:[#allocation2] ss:$8 sm:$0xf0] }
  0x99   : > { %v419_v24 = vld [vmem:[#allocation2] ss:$8 sm:$0xf0]  ;;  %v394_v27 = vor.u32 %v393_v23, %v392_v22  ;;  %v2379_v22 = vld [vmem:[%s3891_s0 + $0x3] ss:$8 sm:$0xf] }
  0x9a   : > { %v420_v28 = vor.u32 %v419_v24, %v418_v21  ;;  %v487_v29 = vld [vmem:[#allocation2] ss:$8 sm:$0xf]  ;;  %v2380_v23 = vld [vmem:[%s3891_s0 + $0x3] ss:$8 sm:$0xf0] }
  0x9b   : > { %v488_v30 = vld [vmem:[#allocation2] ss:$8 sm:$0xf0] }
  0x9c   : > { %v443_v31 = vld [vmem:[#allocation2] ss:$8 sm:$0xf]  ;;  %v489_v35 = vor.u32 %v488_v30, %v487_v29  ;;  %v450_v29 = vor.u32 %v2380_v23, %v2379_v22 }
  0x9d   : > { %403 = vrot.lane.b32.xlu1 %v394_v27, %s2528_s23  ;;  %v444_v32 = vld [vmem:[#allocation2] ss:$8 sm:$0xf0] }
  0x9e   : > { %573 = vrot.lane.b32.xlu0 %v564_v26, %s2526_s21  ;;  %v512_v33 = vld [vmem:[#allocation2] ss:$8 sm:$0xf]  ;;  %v445_v36 = vor.u32 %v444_v32, %v443_v31  ;;  %vm451_vm2 = vcmp.ne.f32.partialorder %v450_v29, 0.0 }
  0x9f   : > { %429 = vrot.lane.b32.xlu2 %v420_v28, %s2527_s22  ;;  %v513_v34 = vld [vmem:[#allocation2] ss:$8 sm:$0xf0]  ;;  %v494_v28 = vor.u32 %v2382_v19, %v2381_v18 }
  0xa0   : > { %v514_v37 = vor.u32 %v513_v34, %v512_v33  ;;  %v468_v38 = vld [vmem:[#allocation2] ss:$8 sm:$0xf] }
  0xa1   : > { %v469_v39 = vld [vmem:[#allocation2] ss:$8 sm:$0xf0]  ;;  %vm495_vm1 = vcmp.ne.f32.partialorder %v494_v28, 0.0 }
  0xa2   : > { %v537_v40 = vld [vmem:[#allocation2] ss:$8 sm:$0xf]  ;;  %v470_v42 = vor.u32 %v469_v39, %v468_v38  ;;  %v2385_v38 = vld [vmem:[%s3891_s0 + $0x7] ss:$8 sm:$0xf] }
  0xa3   : > { %v538_v41 = vld [vmem:[#allocation2] ss:$8 sm:$0xf0]  ;;  %v2386_v39 = vld [vmem:[%s3891_s0 + $0x7] ss:$8 sm:$0xf0] }
  0xa4   : > { %v539_v43 = vor.u32 %v538_v41, %v537_v40  ;;  %v540_v44 = vld [vmem:[#allocation2 + $0x40] ss:$8 sm:$0x1]  ;;  %v544_v49 = vor.u32 %v2386_v39, %v2385_v38 }
  0xa5   : > { %454 = vrot.lane.b32.xlu1 %v445_v36, %s2531_s30  ;;  %v471_v45 = vld [vmem:[#allocation2 + $0x40] ss:$8 sm:$0x1] }
  0xa6   : > { %498 = vrot.lane.b32.xlu0 %v489_v35, %s2529_s28  ;;  %vm545_vm4 = vcmp.ne.f32.partialorder %v544_v49, 0.0  ;;  %v848_v38 = vld [vmem:[%s3891_s0] ss:$8 sm:$0xf] }
  0xa7   : > { %523 = vrot.lane.b32.xlu2 %v514_v37, %s2530_s29  ;;  %v849_v39 = vld [vmem:[%s3891_s0] ss:$8 sm:$0xf0] }
  0xad   : > { %548 = vrot.lane.b32.xlu1 %v539_v43, %s2533_s12 }
  0xae   : > { %474 = vrot.lane.b32.xlu0 %v470_v42, %s2532_s11 }
  0xaf   : > { %550 = vrot.lane.b32.xlu2 %v540_v44, %s2533_s12 }
  0xb5   : > { %476 = vrot.lane.b32.xlu1 %v471_v45, %s2532_s11 }
  0xe9   : > { %v406_v46 = vpop.permute.xlu2 %405 }
  0xea   : > { %v408_v12 = vrot.slane %v406_v46, 1 }
  0xf1   : > { %v2639_v47 = vpop.permute.xlu2 %456 }
  0xf2   : > { %v459_v30 = vrot.slane %v2639_v47, 1 }
  0xf9   : > { %v430_v50 = vpop.permute.xlu2 %429 }
  0xfa   : > { %v433_v54 = vrot.slane %v430_v50, 1 }
  0xff   : > { %v576_v52 = vpop.permute.xlu1 %575 }
 0x100   : > { %v432_v53 = vpop.permute.xlu0 %431  ;;  %v578_v15 = vrot.slane %v576_v52, 1 }
 0x101   : > { %v434_v55 = vrot.slane %v432_v53, 1  ;;  %v524_v62 = vpop.permute.xlu2 %523 }
 0x102   : > { %v527_v1 = vrot.slane %v524_v62, 1 }
 0x103   : > { %v435_v58 = vsel %vm409_vm5, %v433_v54, %v434_v55  ;;  %v2534_v54 = vmov 0  }
 0x104   : > { %v437_v59 = vsel %vm3905_vm7, %v430_v50, %v435_v58  ;;  %2448 = vset.pattern.permute.xlu2 %v2534_v54  ;;  %2449 = vset.pattern.permute.xlu0 %v2534_v54 }
 0x105   : > { %v439_v60 = vsel %vm426_vm6, %v437_v59, 0.0  ;;  %614 = vperm.xlu2 %2448, %v362_v51   ;;  %vm3904_vm6 = vcmask 973824  }
 0x106   : > { %441 = vst [vmem:[#allocation3 + $0x2] ss:$8 sm:$0xf] %v439_v60 }
 0x107   : > { %442 = vst [vmem:[#allocation3 + $0x2] ss:$8 sm:$0xf0] %v439_v60  ;;  %v501_v63 = vpop.permute.xlu1 %500 }
 0x108   : > { %v526_v0 = vpop.permute.xlu0 %525  ;;  %v503_v33 = vrot.slane %v501_v63, 1 }
 0x109   : > { %v528_v2 = vrot.slane %v526_v0, 1  ;;  %v551_v47 = vpop.permute.xlu2 %550  ;;  %v595_v0 = vld [vmem:[%s3893_s2] sm:$0xff] }
 0x10a   : > { %v553_v52 = vrot.slane %v551_v47, 1 }
 0x10b   : > { %v529_v5 = vsel %vm409_vm5, %v527_v1, %v528_v2 }
 0x10c   : > { %v531_v8 = vsel %vm3902_vm9, %v524_v62, %v529_v5 }
 0x10d   : > { %v533_v9 = vsel %vm520_vm8, %v531_v8, 0.0  ;;  %vm617_vm8 = vcmask 130048  }
 0x10e   : > { %535 = vst [vmem:[#allocation3 + $0x6] ss:$8 sm:$0xf] %v533_v9 }
 0x10f   : > { %536 = vst [vmem:[#allocation3 + $0x6] ss:$8 sm:$0xf0] %v533_v9  ;;  %v404_v14 = vpop.permute.xlu1 %403 }
 0x110   : > { %v574_v13 = vpop.permute.xlu0 %573  ;;  %v407_v17 = vrot.slane %v404_v14, 1 }
 0x111   : > { %v577_v16 = vrot.slane %v574_v13, 1 }
 0x112   : > { %v410_v21 = vsel %vm409_vm5, %v407_v17, %v408_v12 }
 0x113   : > { %v579_v20 = vsel %vm409_vm5, %v577_v16, %v578_v15  ;;  %v412_v25 = vsel %vm411_vm11, %v404_v14, %v410_v21 }
 0x114   : > { %v581_v24 = vsel %vm3906_vm10, %v574_v13, %v579_v20  ;;  %v414_v27 = vsel %vm400_vm13, %v412_v25, 0.0 }
 0x115   : > { %v583_v26 = vsel %vm570_vm12, %v581_v24, 0.0  ;;  %416 = vst [vmem:[#allocation3 + $0x1] ss:$8 sm:$0xf] %v414_v27  ;;  %vm830_vm12 = vcmask 1047624  }
 0x116   : > { %585 = vst [vmem:[#allocation3 + $0x40] ss:$8 sm:$0xf] %v583_v26 }
 0x117   : > { %586 = vst [vmem:[#allocation3 + $0x40] ss:$8 sm:$0xf0] %v583_v26  ;;  %v455_v32 = vpop.permute.xlu1 %454 }
 0x118   : > { %v499_v31 = vpop.permute.xlu0 %498  ;;  %417 = vst [vmem:[#allocation3 + $0x1] ss:$8 sm:$0xf0] %v414_v27  ;;  %v458_v35 = vrot.slane %v455_v32, 1 }
 0x119   : > { %v502_v34 = vrot.slane %v499_v31, 1 }
 0x11a   : > { %v460_v37 = vsel %vm409_vm5, %v458_v35, %v459_v30 }
 0x11b   : > { %v504_v36 = vsel %vm409_vm5, %v502_v34, %v503_v33  ;;  %v462_v41 = vsel %vm3903_vm15, %v455_v32, %v460_v37 }
 0x11c   : > { %v506_v40 = vsel %vm505_vm14, %v499_v31, %v504_v36  ;;  %v464_v43 = vsel %vm451_vm2, %v462_v41, 0.0 }
 0x11d   : > { %v508_v42 = vsel %vm495_vm1, %v506_v40, 0.0  ;;  %v604_v44 = vld [vmem:[#allocation3 + $0x40] sm:$0xff]  ;;  %v605_v45 = vld [vmem:[#allocation3 + $0x48] sm:$0xff]  ;;  %v606_v46 = vld [vmem:[#allocation3 + $0x50] sm:$0xff]  ;;  %v850_v40 = vor.u32 %v849_v39, %v848_v38 }
 0x11e   : > { %510 = vst [vmem:[#allocation3 + $0x5] ss:$8 sm:$0xf] %v508_v42  ;;  %635 = vmatpush.msra.mxu0 %v604_v44  ;;  %655 = vmatpush.msra.mxu1 %v605_v45  ;;  %v607_v48 = vld [vmem:[#allocation3 + $0x58] sm:$0xff]  ;;  %v608_v5 = vld [vmem:[#allocation3 + $0x60] sm:$0xff]  ;;  %v609_v6 = vld [vmem:[#allocation3 + $0x68] sm:$0xff] }
 0x11f   : > { %511 = vst [vmem:[#allocation3 + $0x5] ss:$8 sm:$0xf0] %v508_v42  ;;  %675 = vmatpush.msra.mxu2 %v606_v46  ;;  %695 = vmatpush.msra.mxu3 %v607_v48  ;;  %v549_v50 = vpop.permute.xlu1 %548  ;;  %v610_v7 = vld [vmem:[#allocation3 + $0x70] sm:$0xff]  ;;  %v611_v8 = vld [vmem:[#allocation3 + $0x78] sm:$0xff] }
 0x120   : > { %466 = vst [vmem:[#allocation3 + $0x3] ss:$8 sm:$0xf] %v464_v43  ;;  %v552_v53 = vrot.slane %v549_v50, 1  ;;  %v475_v58 = vpop.permute.xlu0 %474 }
 0x121   : > { %467 = vst [vmem:[#allocation3 + $0x3] ss:$8 sm:$0xf0] %v464_v43  ;;  %v478_v60 = vrot.slane %v475_v58, 1 }
 0x122   : > { %v554_v55 = vsel %vm409_vm5, %v552_v53, %v553_v52  ;;  %v2400_v38 = vld [vmem:[%s3891_s0 + $0x2] ss:$8 sm:$0xf0] }
 0x123   : > { %v556_v56 = vsel %vm555_vm3, %v549_v50, %v554_v55 }
 0x124   : > { %v558_v57 = vsel %vm545_vm4, %v556_v56, 0.0 }
 0x125   : > { %560 = vst [vmem:[#allocation3 + $0x7] ss:$8 sm:$0xf] %v558_v57 }
 0x126   : > { %561 = vst [vmem:[#allocation3 + $0x7] ss:$8 sm:$0xf0] %v558_v57 }
 0x127   : > { %v477_v59 = vpop.permute.xlu1 %476 }
 0x128   : > { %v479_v61 = vrot.slane %v477_v59, 1 }
 0x12a   : > { %v480_v62 = vsel %vm409_vm5, %v478_v60, %v479_v61  ;;  %vm851_vm5 = vcmp.ne.f32.partialorder %v850_v40, 0.0 }
 0x12b   : > { %v482_v63 = vsel %vm3904_vm6, %v475_v58, %v480_v62  ;;  %v852_v41 = vsel %vm851_vm5, 1, %v2534_v54 }
 0x12c   : > { %485 = vst [vmem:[#allocation3 + $0x4] ss:$8 sm:$0xf] %v482_v63  ;;  %v854_v42 = vperm.slane %v852_v41, 1  ;;  %v853_v49 = vperm.slane %v852_v41, 0  ;;  %v855_v50 = vperm.slane %v852_v41, 2 }
 0x12d   : > { %486 = vst [vmem:[#allocation3 + $0x4] ss:$8 sm:$0xf0] %v482_v63  ;;  %v856_v51 = vperm.slane %v852_v41, 3 }
 0x12e   : > { %vm2731_vm13 = vcmp.eq.s32.totalorder %v854_v42, 1  ;;  %vm2744_vm1 = vcmp.eq.s32.totalorder %v853_v49, 1  ;;  %vm2759_vm2 = vcmp.eq.s32.totalorder %v855_v50, 1 }
 0x12f   : > { %vm2771_vm4 = vcmp.eq.s32.totalorder %v856_v51, 1 }
 0x133   : > { %v596_v1 = vld [vmem:[#allocation3] sm:$0xff]  ;;  %v597_v2 = vld [vmem:[#allocation3 + $0x8] sm:$0xff]  ;;  %v598_v3 = vld [vmem:[#allocation3 + $0x10] sm:$0xff] }
 0x134   : > { %636 = vmatpush.msra.mxu0 %v596_v1  ;;  %656 = vmatpush.msra.mxu1 %v597_v2  ;;  %v599_v4 = vld [vmem:[#allocation3 + $0x18] sm:$0xff]  ;;  %v600_v9 = vld [vmem:[#allocation3 + $0x20] sm:$0xff]  ;;  %v601_v10 = vld [vmem:[#allocation3 + $0x28] sm:$0xff]  ;;  %v857_v1 = vperm.slane %v852_v41, 4 }
 0x135   : > { %676 = vmatpush.msra.mxu2 %v598_v3  ;;  %696 = vmatpush.msra.mxu3 %v599_v4  ;;  %v602_v11 = vld [vmem:[#allocation3 + $0x30] sm:$0xff]  ;;  %v603_v12 = vld [vmem:[#allocation3 + $0x38] sm:$0xff]  ;;  %v858_v3 = vperm.slane %v852_v41, 5 }
 0x136   : > { %2389 = vmatmul.msk.f32.vlgmr.msra.gmra.mxu0 %vm617_vm8, %v595_v0  ;;  %2390 = vmatmul.msk.f32.vlgmr.msra.gmra.mxu1 %vm617_vm8, %v595_v0 }
 0x137   : > { %2391 = vmatmul.msk.f32.vlgmr.msra.gmra.mxu2 %vm617_vm8, %v595_v0  ;;  %2392 = vmatmul.msk.f32.vlgmr.msra.gmra.mxu3 %vm617_vm8, %v595_v0  ;;  %vm2791_vm5 = vcmp.eq.s32.totalorder %v858_v3, 1 }
 0x138   : > { %715 = vmatpush.msrb.mxu0 %v608_v5  ;;  %735 = vmatpush.msrb.mxu1 %v609_v6 }
 0x139   : > { %755 = vmatpush.msrb.mxu2 %v610_v7  ;;  %775 = vmatpush.msrb.mxu3 %v611_v8 }
 0x13a   : > { %716 = vmatpush.msrb.mxu0 %v600_v9  ;;  %736 = vmatpush.msrb.mxu1 %v601_v10 }
 0x13b   : > { %756 = vmatpush.msrb.mxu2 %v602_v11  ;;  %776 = vmatpush.msrb.mxu3 %v603_v12 }
 0x13e   : > { %2393 = vmatmul.msk.f32.vlgmr.msrb.gmra.mxu0 %vm617_vm8, %v595_v0  ;;  %2394 = vmatmul.msk.f32.vlgmr.msrb.gmra.mxu1 %vm617_vm8, %v595_v0 }
 0x13f   : > { %2395 = vmatmul.msk.f32.vlgmr.msrb.gmra.mxu2 %vm617_vm8, %v595_v0  ;;  %2396 = vmatmul.msk.f32.vlgmr.msrb.gmra.mxu3 %vm617_vm8, %v595_v0  ;;  %vm2787_vm8 = vcmp.eq.s32.totalorder %v857_v1, 1 }
 0x15f   : > { %v615_v13 = vpop.permute.xlu2 %614 }
 0x1b3   : > { %v638_v14 = vpop.f32.mrf.mxu0  ;;  %v658_v15 = vpop.f32.mrf.mxu1 }
 0x1b4   : > { %v639_v16 = vadd.f32 %v638_v14, %v615_v13  ;;  %v659_v17 = vadd.f32 %v658_v15, %v615_v13  ;;  %v859_v14 = vperm.slane %v852_v41, 6 }
 0x1b6   : > { %v781_v18 = vmax.f32 %v639_v16, 0.0  ;;  %v782_v19 = vmax.f32 %v659_v17, 0.0  ;;  %v860_v16 = vperm.slane %v852_v41, 7 }
 0x1b8   : > { %800 = vrot.lane.b32.xlu0 %v782_v19, %s2525_s20  ;;  %798 = vrot.lane.b32.xlu1 %v781_v18, %s2525_s20 }
 0x1ba   : > { %v678_v20 = vpop.f32.mrf.mxu2  ;;  %v698_v21 = vpop.f32.mrf.mxu3 }
 0x1bb   : > { %v679_v22 = vadd.f32 %v678_v20, %v615_v13  ;;  %v699_v23 = vadd.f32 %v698_v21, %v615_v13  ;;  %v718_v24 = vpop.f32.mrf.mxu0  ;;  %v738_v29 = vpop.f32.mrf.mxu1 }
 0x1bc   : > { %v719_v25 = vadd.f32 %v718_v24, %v615_v13  ;;  %v739_v30 = vadd.f32 %v738_v29, %v615_v13  ;;  %v2402_v29 = vld [vmem:[%s3891_s0 + $0x3] ss:$8 sm:$0xf0] }
 0x1bd   : > { %v784_v26 = vmax.f32 %v699_v23, 0.0  ;;  %v783_v27 = vmax.f32 %v679_v22, 0.0  ;;  %v2407_v22 = vld [vmem:[%s3891_s0 + $0x7] ss:$8 sm:$0xf] }
 0x1be   : > { %v785_v28 = vmax.f32 %v719_v25, 0.0  ;;  %v786_v35 = vmax.f32 %v739_v30, 0.0  ;;  %v2408_v23 = vld [vmem:[%s3891_s0 + $0x7] ss:$8 sm:$0xf0] }
 0x1bf   : > { %804 = vrot.lane.b32.xlu2 %v784_v26, %s2525_s20  ;;  %v1401_v25 = vor.u32 %v2408_v23, %v2407_v22  ;;  %v2409_v26 = vld [vmem:[%s3891_s0 + $0x40] ss:$8 sm:$0xf] }
 0x1c0   : > { %806 = vrot.lane.b32.xlu0 %v785_v28, %s2525_s20  ;;  %802 = vrot.lane.b32.xlu1 %v783_v27, %s2525_s20  ;;  %v2410_v27 = vld [vmem:[%s3891_s0 + $0x40] ss:$8 sm:$0xf0]  ;;  %v2401_v28 = vld [vmem:[%s3891_s0 + $0x3] ss:$8 sm:$0xf] }
 0x1c2   : > { %v758_v31 = vpop.f32.mrf.mxu2  ;;  %v778_v32 = vpop.f32.mrf.mxu3 }
 0x1c3   : > { %v759_v33 = vadd.f32 %v758_v31, %v615_v13  ;;  %v779_v34 = vadd.f32 %v778_v32, %v615_v13  ;;  %v1490_v32 = vor.u32 %v2410_v27, %v2409_v26 }
 0x1c5   : > { %v787_v36 = vmax.f32 %v759_v33, 0.0  ;;  %v788_v37 = vmax.f32 %v779_v34, 0.0  ;;  %v1074_v33 = vor.u32 %v2402_v29, %v2401_v28 }
 0x1c7   : > { %808 = vrot.lane.b32.xlu2 %v786_v35, %s2525_s20  ;;  %v2403_v35 = vld [vmem:[%s3891_s0 + $0x5] ss:$8 sm:$0xf] }
 0x1c8   : > { %810 = vrot.lane.b32.xlu0 %v787_v36, %s2525_s20  ;;  %812 = vrot.lane.b32.xlu1 %v788_v37, %s2525_s20  ;;  %v2404_v36 = vld [vmem:[%s3891_s0 + $0x5] ss:$8 sm:$0xf0]  ;;  %v2399_v37 = vld [vmem:[%s3891_s0 + $0x2] ss:$8 sm:$0xf] }
 0x1c9   : > { %v985_v49 = vor.u32 %v2400_v38, %v2399_v37 }
 0x1cb   : > { %vm986_vm9 = vcmp.ne.f32.partialorder %v985_v49, 0.0 }
 0x219   : > { %v805_v43 = vpop.permute.xlu2 %804 }
 0x221   : > { %v809_v52 = vpop.permute.xlu2 %808 }
 0x22a   : > { %v801_v45 = vpop.permute.xlu0 %800  ;;  %v799_v46 = vpop.permute.xlu1 %798 }
 0x22b   : > { %v2736_v47 = vsel %vm357_vm0, %v799_v46, %v801_v45  ;;  %831 = vst.msk [vmem:[#allocation2] sm:$0xff] %vm830_vm12, %v799_v46  ;;  %vm868_vm12 = vcmp.eq.s32.totalorder %v860_v16, 1 }
 0x22c   : > { %832 = vst [vmem:[#allocation2 + $0x8] sm:$0xff] %v2736_v47  ;;  %v870_v48 = vsel %vm2731_vm13, %v2736_v47, 0.0 }
 0x22d   : > { %878 = vst [vmem:[#allocation3 + $0x8] sm:$0xff] %v870_v48  ;;  %v1223_v48 = vor.u32 %v2404_v36, %v2403_v35 }
 0x232   : > { %v807_v53 = vpop.permute.xlu0 %806  ;;  %v803_v55 = vpop.permute.xlu1 %802  ;;  %v2742_v56 = vld [vmem:[#allocation2] sm:$0xff] }
 0x233   : > { %v2749_v58 = vsel %vm357_vm0, %v805_v43, %v807_v53  ;;  %v2752_v59 = vsel %vm357_vm0, %v807_v53, %v809_v52  ;;  %v2755_v60 = vsel %vm357_vm0, %v801_v45, %v803_v55  ;;  %1518 = vrot.lane.b32.xlu2 %v2742_v56, %s2526_s21  ;;  %v2765_v62 = vsel %vm357_vm0, %v803_v55, %v805_v43  ;;  %v2397_v53 = vld [vmem:[%s3891_s0 + $0x1] ss:$8 sm:$0xf] }
 0x234   : > { %835 = vst [vmem:[#allocation2 + $0x20] sm:$0xff] %v2749_v58  ;;  %1429 = vrot.lane.b32.xlu1 %v2742_v56, %s2533_s12  ;;  %1340 = vrot.lane.b32.xlu0 %v2742_v56, %s2530_s29  ;;  %v869_v0 = vsel %vm2744_vm1, %v2742_v56, 0.0  ;;  %v871_v2 = vsel %vm2759_vm2, %v2755_v60, 0.0  ;;  %v872_v4 = vsel %vm2771_vm4, %v2765_v62, 0.0 }
 0x235   : > { %836 = vst [vmem:[#allocation2 + $0x28] sm:$0xff] %v2752_v59  ;;  %v2398_v55 = vld [vmem:[%s3891_s0 + $0x1] ss:$8 sm:$0xf0] }
 0x236   : > { %833 = vst [vmem:[#allocation2 + $0x10] sm:$0xff] %v2755_v60 }
 0x237   : > { %834 = vst [vmem:[#allocation2 + $0x18] sm:$0xff] %v2765_v62 }
 0x238   : > { %877 = vst [vmem:[#allocation3] sm:$0xff] %v869_v0 }
 0x239   : > { %879 = vst [vmem:[#allocation3 + $0x10] sm:$0xff] %v871_v2 }
 0x23a   : > { %v811_v6 = vpop.permute.xlu0 %810  ;;  %v813_v7 = vpop.permute.xlu1 %812  ;;  %880 = vst [vmem:[#allocation3 + $0x18] sm:$0xff] %v872_v4  ;;  %v2967_v4 = vsel %vm986_vm9, 1, %v2534_v54 }
 0x23b   : > { %v2796_v9 = vsel %vm357_vm0, %v809_v52, %v811_v6  ;;  %v2799_v10 = vsel %vm357_vm0, %v811_v6, %v813_v7  ;;  %839 = vst.msk [vmem:[#allocation2 + $0x40] sm:$0xff] %vm357_vm0, %v813_v7  ;;  %1251 = vrot.lane.b32.xlu2 %v2742_v56, %s2529_s28  ;;  %v844_v11 = vld [vmem:[#allocation2 + $0x20] sm:$0xff]  ;;  %vm867_vm0 = vcmp.eq.s32.totalorder %v859_v14, 1  ;;  %v896_v7 = vor.u32 %v2398_v55, %v2397_v53 }
 0x23c   : > { %837 = vst [vmem:[#allocation2 + $0x30] sm:$0xff] %v2796_v9  ;;  %1102 = vrot.lane.b32.xlu1 %v2742_v56, %s2531_s30  ;;  %1520 = vrot.lane.b32.xlu0 %v2736_v47, %s2526_s21  ;;  %v873_v12 = vsel %vm2787_vm8, %v844_v11, 0.0  ;;  %v845_v13 = vld [vmem:[#allocation2 + $0x28] sm:$0xff]  ;;  %vm1402_vm8 = vcmp.ne.f32.partialorder %v1401_v25, 0.0  ;;  %v988_v11 = vperm.slane %v2967_v4, 0 }
 0x23d   : > { %838 = vst [vmem:[#allocation2 + $0x38] sm:$0xff] %v2799_v10  ;;  %v874_v15 = vsel %vm2791_vm5, %v845_v13, 0.0  ;;  %v2909_v31 = vsel %vm1402_vm8, 1, %v2534_v54  ;;  %vm1491_vm5 = vcmp.ne.f32.partialorder %v1490_v32, 0.0  ;;  %vm1224_vm8 = vcmp.ne.f32.partialorder %v1223_v48, 0.0 }
 0x23e   : > { %881 = vst [vmem:[#allocation3 + $0x20] sm:$0xff] %v873_v12  ;;  %v1404_v34 = vperm.slane %v2909_v31, 0  ;;  %v2939_v43 = vsel %vm1491_vm5, 1, %v2534_v54  ;;  %v2964_v3 = vsel %vm1224_vm8, 1, %v2534_v54  ;;  %vm897_vm8 = vcmp.ne.f32.partialorder %v896_v7, 0.0 }
 0x23f   : > { %882 = vst [vmem:[#allocation3 + $0x28] sm:$0xff] %v874_v15  ;;  %v1493_v50 = vperm.slane %v2939_v43, 0  ;;  %v1226_v8 = vperm.slane %v2964_v3, 0  ;;  %v2405_v12 = vld [vmem:[%s3891_s0 + $0x6] ss:$8 sm:$0xf] }
 0x240   : > { %v2406_v13 = vld [vmem:[%s3891_s0 + $0x6] ss:$8 sm:$0xf0]  ;;  %v1495_v35 = vperm.slane %v2939_v43, 2  ;;  %v1406_v48 = vperm.slane %v2909_v31, 2  ;;  %v1227_v7 = vperm.slane %v2964_v3, 1 }
 0x241   : > { %vm1501_vm5 = vcmp.eq.s32.totalorder %v1493_v50, 1  ;;  %vm2988_vm9 = vcmp.eq.s32.totalorder %v1226_v8, 1  ;;  %v1312_v22 = vor.u32 %v2406_v13, %v2405_v12  ;;  %v1228_v8 = vperm.slane %v2964_v3, 2 }
 0x242   : > { %v1487_v52 = vld [vmem:[#allocation2 + $0x40] sm:$0xff] }
 0x243   : > { %1170 = vrot.lane.b32.xlu2 %v2742_v56, %s2532_s11  ;;  %v846_v17 = vld [vmem:[#allocation2 + $0x30] sm:$0xff] }
 0x244   : > { %1013 = vrot.lane.b32.xlu1 %v2742_v56, %s2527_s22  ;;  %1253 = vrot.lane.b32.xlu0 %v2736_v47, %s2529_s28  ;;  %v847_v18 = vld [vmem:[#allocation2 + $0x38] sm:$0xff]  ;;  %v875_v19 = vsel %vm867_vm0, %v846_v17, 0.0  ;;  %vm1075_vm0 = vcmp.ne.f32.partialorder %v1074_v33, 0.0 }
 0x245   : > { %v876_v20 = vsel %vm868_vm12, %v847_v18, 0.0  ;;  %883 = vst [vmem:[#allocation3 + $0x30] sm:$0xff] %v875_v19  ;;  %vm2932_vm12 = vcmp.eq.s32.totalorder %v1404_v34, 1  ;;  %v2942_v45 = vsel %vm1075_vm0, 1, %v2534_v54  ;;  %v3001_v19 = vsel %vm897_vm8, 1, %v2534_v54 }
 0x246   : > { %884 = vst [vmem:[#allocation3 + $0x38] sm:$0xff] %v876_v20  ;;  %v1077_v51 = vperm.slane %v2942_v45, 0  ;;  %v899_v23 = vperm.slane %v3001_v19, 0  ;;  %v1494_v34 = vperm.slane %v2939_v43, 1  ;;  %v900_v57 = vperm.slane %v3001_v19, 1 }
 0x248   : > { %vm2959_vm0 = vcmp.eq.s32.totalorder %v1077_v51, 1  ;;  %vm3015_vm8 = vcmp.eq.s32.totalorder %v899_v23, 1 }
 0x24b   : > { %1431 = vrot.lane.b32.xlu2 %v2736_v47, %s2533_s12 }
 0x24c   : > { %924 = vrot.lane.b32.xlu1 %v2742_v56, %s2528_s23  ;;  %1172 = vrot.lane.b32.xlu0 %v2736_v47, %s2532_s11 }
 0x253   : > { %1104 = vrot.lane.b32.xlu2 %v2736_v47, %s2531_s30 }
 0x254   : > { %1342 = vrot.lane.b32.xlu1 %v2736_v47, %s2530_s29  ;;  %1524 = vrot.lane.b32.xlu0 %v2765_v62, %s2526_s21 }
 0x25b   : > { %1015 = vrot.lane.b32.xlu2 %v2736_v47, %s2527_s22 }
 0x25c   : > { %1435 = vrot.lane.b32.xlu0 %v2765_v62, %s2533_s12  ;;  %1176 = vrot.lane.b32.xlu1 %v2765_v62, %s2532_s11 }
 0x263   : > { %926 = vrot.lane.b32.xlu2 %v2736_v47, %s2528_s23 }
 0x264   : > { %1346 = vrot.lane.b32.xlu0 %v2765_v62, %s2530_s29  ;;  %1108 = vrot.lane.b32.xlu1 %v2765_v62, %s2531_s30 }
 0x26b   : > { %1522 = vrot.lane.b32.xlu2 %v2755_v60, %s2526_s21 }
 0x26c   : > { %1257 = vrot.lane.b32.xlu0 %v2765_v62, %s2529_s28  ;;  %928 = vrot.lane.b32.xlu1 %v2755_v60, %s2528_s23 }
 0x273   : > { %1433 = vrot.lane.b32.xlu2 %v2755_v60, %s2533_s12 }
 0x274   : > { %1174 = vrot.lane.b32.xlu0 %v2755_v60, %s2532_s11  ;;  %1526 = vrot.lane.b32.xlu1 %v2749_v58, %s2526_s21 }
 0x27b   : > { %1344 = vrot.lane.b32.xlu2 %v2755_v60, %s2530_s29 }
 0x27c   : > { %1106 = vrot.lane.b32.xlu0 %v2755_v60, %s2531_s30  ;;  %1437 = vrot.lane.b32.xlu1 %v2749_v58, %s2533_s12 }
 0x283   : > { %1255 = vrot.lane.b32.xlu2 %v2755_v60, %s2529_s28 }
 0x284   : > { %1019 = vrot.lane.b32.xlu0 %v2765_v62, %s2527_s22  ;;  %1348 = vrot.lane.b32.xlu1 %v2749_v58, %s2530_s29 }
 0x28b   : > { %1017 = vrot.lane.b32.xlu2 %v2755_v60, %s2527_s22 }
 0x28c   : > { %932 = vrot.lane.b32.xlu0 %v2749_v58, %s2528_s23  ;;  %1259 = vrot.lane.b32.xlu1 %v2749_v58, %s2529_s28 }
 0x28d   : > { %v1519_v21 = vpop.permute.xlu2 %1518 }
 0x293   : > { %930 = vrot.lane.b32.xlu2 %v2765_v62, %s2528_s23 }
 0x294   : > { %1439 = vrot.lane.b32.xlu0 %v2752_v59, %s2533_s12  ;;  %1021 = vrot.lane.b32.xlu1 %v2749_v58, %s2527_s22 }
 0x295   : > { %v2886_v24 = vpop.permute.xlu2 %1251 }
 0x29b   : > { %1178 = vrot.lane.b32.xlu2 %v2749_v58, %s2532_s11 }
 0x29c   : > { %1350 = vrot.lane.b32.xlu0 %v2752_v59, %s2530_s29  ;;  %1528 = vrot.lane.b32.xlu1 %v2752_v59, %s2526_s21 }
 0x29d   : > { %v2906_v30 = vpop.permute.xlu2 %1170 }
 0x2a3   : > { %1110 = vrot.lane.b32.xlu2 %v2749_v58, %s2531_s30 }
 0x2a4   : > { %1261 = vrot.lane.b32.xlu0 %v2752_v59, %s2529_s28  ;;  %1180 = vrot.lane.b32.xlu1 %v2752_v59, %s2532_s11 }
 0x2a5   : > { %v2930_v39 = vpop.permute.xlu2 %1431 }
 0x2a6   : > { %v2936_v41 = vpop.permute.xlu0 %1340  ;;  %v1430_v42 = vpop.permute.xlu1 %1429 }
 0x2a7   : > { %v1447_v46 = vsel %vm555_vm3, %v1430_v42, %v2930_v39 }
 0x2ab   : > { %1534 = vrot.lane.b32.xlu2 %v1487_v52, %s2526_s21 }
 0x2ac   : > { %1445 = vrot.lane.b32.xlu1 %v1487_v52, %s2533_s12  ;;  %1356 = vrot.lane.b32.xlu0 %v1487_v52, %s2530_s29 }
 0x2ad   : > { %v2957_v58 = vpop.permute.xlu2 %1104 }
 0x2ae   : > { %v1521_v1 = vpop.permute.xlu0 %1520  ;;  %v1103_v2 = vpop.permute.xlu1 %1102 }
 0x2af   : > { %v1536_v5 = vsel %vm3906_vm10, %v1519_v21, %v1521_v1  ;;  %v2972_v6 = vsel %vm3903_vm15, %v1103_v2, %v2957_v58  ;;  %vm1503_vm15 = vcmp.eq.s32.totalorder %v1495_v35, 1 }
 0x2b0   : > { %2456 = vmatpush.msk.msra.mxu0 %vm1501_vm5, %v1536_v5  ;;  %vm1313_vm5 = vcmp.ne.f32.partialorder %v1312_v22, 0.0  ;;  %v1496_v22 = vperm.slane %v2939_v43, 3 }
 0x2b1   : > { %v3022_v28 = vsel %vm1313_vm5, 1, %v2534_v54  ;;  %vm1502_vm5 = vcmp.eq.s32.totalorder %v1494_v34, 1  ;;  %v1407_v34 = vperm.slane %v2909_v31, 3 }
 0x2b2   : > { %2457 = vmatpush.msk.msra.mxu0 %vm2932_vm12, %v1447_v46  ;;  %vm2994_vm12 = vcmp.eq.s32.totalorder %v988_v11, 1  ;;  %v1315_v36 = vperm.slane %v3022_v28, 0  ;;  %v1405_v46 = vperm.slane %v2909_v31, 1  ;;  %v1316_v53 = vperm.slane %v3022_v28, 1 }
 0x2b3   : > { %1118 = vrot.lane.b32.xlu2 %v1487_v52, %s2531_s30  ;;  %v1317_v55 = vperm.slane %v3022_v28, 2 }
 0x2b4   : > { %1267 = vrot.lane.b32.xlu0 %v1487_v52, %s2529_s28  ;;  %1532 = vrot.lane.b32.xlu1 %v2799_v10, %s2526_s21 }
 0x2b5   : > { %v2992_v15 = vpop.permute.xlu2 %1015 }
 0x2b6   : > { %v2998_v17 = vpop.permute.xlu0 %1253  ;;  %v1014_v18 = vpop.permute.xlu1 %1013 }
 0x2b7   : > { %v1269_v20 = vsel %vm505_vm14, %v2886_v24, %v2998_v17  ;;  %v1031_v21 = vsel %vm3905_vm7, %v1014_v18, %v2992_v15  ;;  %vm3930_vm7 = vcmask 916480  }
 0x2bb   : > { %1029 = vrot.lane.b32.xlu2 %v1487_v52, %s2527_s22 }
 0x2bc   : > { %1186 = vrot.lane.b32.xlu0 %v1487_v52, %s2532_s11  ;;  %1352 = vrot.lane.b32.xlu1 %v2796_v9, %s2530_s29 }
 0x2bd   : > { %v3013_v25 = vpop.permute.xlu2 %926 }
 0x2be   : > { %v3019_v24 = vpop.permute.xlu0 %1172  ;;  %v925_v27 = vpop.permute.xlu1 %924 }
 0x2bf   : > { %v1188_v29 = vsel %vm3904_vm6, %v2906_v30, %v3019_v24  ;;  %v942_v32 = vsel %vm411_vm11, %v925_v27, %v3013_v25  ;;  %vm1323_vm6 = vcmp.eq.s32.totalorder %v1315_v36, 1 }
 0x2c0   : > { %v958_v33 = vsel %vm3015_vm8, %v942_v32, 0.0 }
 0x2c1   : > { %966 = vst [vmem:[#allocation3 + $0x40] sm:$0xff] %v958_v33  ;;  %v1078_v33 = vperm.slane %v2942_v45, 1 }
 0x2c3   : > { %1441 = vrot.lane.b32.xlu2 %v2796_v9, %s2533_s12 }
 0x2c4   : > { %940 = vrot.lane.b32.xlu0 %v1487_v52, %s2528_s23  ;;  %1263 = vrot.lane.b32.xlu1 %v2796_v9, %s2529_s28 }
 0x2c5   : > { %v1523_v54 = vpop.permute.xlu2 %1522 }
 0x2c6   : > { %v3039_v30 = vpop.permute.xlu0 %1524  ;;  %v1537_v37 = vsel %vm3906_vm10, %v1521_v1, %v1523_v54  ;;  %v1343_v38 = vpop.permute.xlu1 %1342 }
 0x2c7   : > { %v1538_v40 = vsel %vm3906_vm10, %v1523_v54, %v3039_v30  ;;  %v1358_v42 = vsel %vm3930_vm7, %v2936_v41, %v1343_v38  ;;  %2458 = vmatpush.msk.msra.mxu1 %vm1502_vm5, %v1537_v37  ;;  %vm1413_vm7 = vcmp.eq.s32.totalorder %v1405_v46, 1  ;;  %vm1414_vm10 = vcmp.eq.s32.totalorder %v1406_v48, 1 }
 0x2c8   : > { %2459 = vmatpush.msk.msra.mxu0 %vm1323_vm6, %v1358_v42  ;;  %2460 = vmatpush.msk.msra.mxu2 %vm1503_vm15, %v1538_v40  ;;  %vm3907_vm15 = vcmask 588800   ;;  %vm1324_vm6 = vcmp.eq.s32.totalorder %v1316_v53, 1  ;;  %v789_v42 = vld [vmem:[%s3896_s5] sm:$0xff]  ;;  %v990_v46 = vperm.slane %v2967_v4, 2  ;;  %v1318_v48 = vperm.slane %v3022_v28, 3 }
 0x2ca   : > { %2461 = vmatpush.msk.msra.mxu0 %vm2988_vm9, %v1269_v20 }
 0x2cb   : > { %1354 = vrot.lane.b32.xlu2 %v2799_v10, %s2530_s29 }
 0x2cc   : > { %1530 = vrot.lane.b32.xlu0 %v2796_v9, %s2526_s21  ;;  %1182 = vrot.lane.b32.xlu1 %v2796_v9, %s2532_s11 }
 0x2cd   : > { %v1434_v41 = vpop.permute.xlu2 %1433  ;;  %1661 = vmatpush.msra.mxu0 %v1188_v29 }
 0x2ce   : > { %v3056_v49 = vpop.permute.xlu0 %1435  ;;  %v1448_v50 = vsel %vm555_vm3, %v2930_v39, %v1434_v41  ;;  %v3060_v51 = vpop.permute.xlu1 %1176  ;;  %v3078_v39 = vld [vmem:[%s3895_s4] sm:$0xff] }
 0x2cf   : > { %v1449_v52 = vsel %vm555_vm3, %v1434_v41, %v3056_v49  ;;  %2462 = vmatpush.msk.msra.mxu0 %vm2959_vm0, %v2972_v6  ;;  %2463 = vmatpush.msk.msra.mxu1 %vm1413_vm7, %v1448_v50  ;;  %vm3931_vm0 = vcmask 916480   ;;  %vm1504_vm7 = vcmp.eq.s32.totalorder %v1496_v22, 1 }
 0x2d0   : > { %2465 = vmatpush.msk.msra.mxu2 %vm1414_vm10, %v1449_v52  ;;  %vm1325_vm10 = vcmp.eq.s32.totalorder %v1317_v55, 1  ;;  %vm3932_vm9 = vmmov %vm3931_vm0  ;;  %v1080_v55 = vperm.slane %v2942_v45, 3 }
 0x2d1   : > { %2464 = vmatpush.msk.msra.mxu0 %vm2994_vm12, %v1031_v21  ;;  %vm1236_vm12 = vcmp.eq.s32.totalorder %v1228_v8, 1  ;;  %v989_v21 = vperm.slane %v2967_v4, 1 }
 0x2d3   : > { %1265 = vrot.lane.b32.xlu2 %v2799_v10, %s2529_s28  ;;  %2466 = vmatpush.msk.msra.mxu0 %vm3015_vm8, %v942_v32  ;;  %vm3105_vm8 = vcmp.eq.s32.totalorder %v900_v57, 1  ;;  %vm3127_vm5 = vcmp.eq.s32.totalorder %v989_v21, 1  ;;  %v901_v32 = vperm.slane %v3001_v19, 2 }
 0x2d4   : > { %1443 = vrot.lane.b32.xlu0 %v2799_v10, %s2533_s12  ;;  %1116 = vrot.lane.b32.xlu1 %v2799_v10, %s2531_s30  ;;  %s2535_s12 = smov 3  }
 0x2d5   : > { %v1345_v0 = vpop.permute.xlu2 %1344  ;;  %2467 = vmatpush.msk.msra.mxu0 %vm2744_vm1, %v2742_v56  ;;  %vm1235_vm1 = vcmp.eq.s32.totalorder %v1227_v7, 1 }
 0x2d6   : > { %v3087_v1 = vpop.permute.xlu0 %1346  ;;  %v1359_v2 = vsel %vm3931_vm0, %v1343_v38, %v1345_v0  ;;  %v3090_v5 = vpop.permute.xlu1 %1108  ;;  %2411 = vmatmul.msk.f32.vlgmr.msra.gmra.mxu0 %vm3907_vm15, %v3078_v39 }
 0x2d7   : > { %v1360_v6 = vsel %vm3932_vm9, %v1345_v0, %v3087_v1  ;;  %2468 = vmatpush.msk.msra.mxu1 %vm1324_vm6, %v1359_v2  ;;  %vm3937_vm6 = vcmask 1031168   ;;  %vm3940_vm9 = vcmask 900096   ;;  %v902_v0 = vperm.slane %v3001_v19, 3 }
 0x2d8   : > { %2469 = vmatpush.msk.msra.mxu2 %vm1325_vm10, %v1360_v6  ;;  %vm3938_vm10 = vcmask 973824   ;;  %v1229_v2 = vperm.slane %v2964_v3, 3 }
 0x2d9   : > { %vm3939_vm0 = vmmov %vm3938_vm10 }
 0x2db   : > { %1184 = vrot.lane.b32.xlu2 %v2799_v10, %s2532_s11  ;;  %s3878_s11 = scalar_lea.vmem %s3901_s10, %s4020_s16  ;;  %s2541_s16 = smov 7  }
 0x2dc   : > { %1114 = vrot.lane.b32.xlu0 %v2796_v9, %s2531_s30  ;;  %1027 = vrot.lane.b32.xlu1 %v2799_v10, %s2527_s22 }
 0x2dd   : > { %v1256_v56 = vpop.permute.xlu2 %1255 }
 0x2de   : > { %v3109_v12 = vpop.permute.xlu0 %1257  ;;  %v1270_v13 = vsel %vm505_vm14, %v2998_v17, %v1256_v56  ;;  %v929_v14 = vpop.permute.xlu1 %928 }
 0x2df   : > { %v1271_v16 = vsel %vm505_vm14, %v1256_v56, %v3109_v12  ;;  %v943_v18 = vsel %vm411_vm11, %v3013_v25, %v929_v14  ;;  %2470 = vmatpush.msk.msra.mxu1 %vm1235_vm1, %v1270_v13  ;;  %vm3152_vm1 = vcmp.eq.s32.totalorder %v901_v32, 1  ;;  %v991_v56 = vperm.slane %v2967_v4, 3 }
 0x2e0   : > { %v959_v20 = vsel %vm3105_vm8, %v943_v18, 0.0  ;;  %2471 = vmatpush.msk.msra.mxu2 %vm1236_vm12, %v1271_v16  ;;  %vm1086_vm12 = vcmp.eq.s32.totalorder %v1078_v33, 1  ;;  %v1409_v32 = vperm.slane %v2909_v31, 5 }
 0x2e1   : > { %967 = vst [vmem:[#allocation3 + $0x48] sm:$0xff] %v959_v20  ;;  %v1497_v20 = vperm.slane %v2939_v43, 4 }
 0x2e3   : > { %938 = vrot.lane.b32.xlu2 %v2799_v10, %s2528_s23 }
 0x2e4   : > { %1025 = vrot.lane.b32.xlu0 %v2796_v9, %s2527_s22  ;;  %936 = vrot.lane.b32.xlu1 %v2796_v9, %s2528_s23 }
 0x2e5   : > { %v1018_v23 = vpop.permute.xlu2 %1017 }
 0x2e6   : > { %v1175_v25 = vpop.permute.xlu0 %1174  ;;  %v1032_v26 = vsel %vm3937_vm6, %v2992_v15, %v1018_v23  ;;  %v3133_v27 = vpop.permute.xlu1 %1526  ;;  %v1079_v15 = vperm.slane %v2942_v45, 2 }
 0x2e7   : > { %v1189_v10 = vsel %vm3938_vm10, %v3019_v24, %v1175_v25  ;;  %v1190_v29 = vsel %vm3939_vm0, %v1175_v25, %v3060_v51  ;;  %v1539_v9 = vsel %vm3940_vm9, %v3039_v30, %v3133_v27  ;;  %vm1415_vm10 = vcmp.eq.s32.totalorder %v1407_v34, 1 }
 0x2e8   : > { %1681 = vmatpush.msra.mxu1 %v1189_v10  ;;  %1701 = vmatpush.msra.mxu2 %v1190_v29  ;;  %vm1087_vm6 = vcmp.eq.s32.totalorder %v1079_v15, 1  ;;  %vm998_vm9 = vcmp.eq.s32.totalorder %v990_v46, 1  ;;  %v1320_v46 = vperm.slane %v3022_v28, 5 }
 0x2e9   : > { %2472 = vmatpush.msk.msra.mxu3 %vm1504_vm7, %v1539_v9  ;;  %vm3943_vm7 = vcmask 982016  }
 0x2ea   : > { %vm3944_vm0 = vmmov %vm3943_vm7 }
 0x2eb   : > { %1112 = vrot.lane.b32.xlu2 %v2752_v59, %s2531_s30 }
 0x2ec   : > { %1023 = vrot.lane.b32.xlu0 %v2752_v59, %s2527_s22  ;;  %934 = vrot.lane.b32.xlu1 %v2752_v59, %s2528_s23 }
 0x2ed   : > { %v931_v35 = vpop.permute.xlu2 %930 }
 0x2ee   : > { %v1107_v36 = vpop.permute.xlu0 %1106  ;;  %v944_v54 = vsel %vm411_vm11, %v929_v14, %v931_v35  ;;  %v1438_v30 = vpop.permute.xlu1 %1437 }
 0x2ef   : > { %v1121_v37 = vsel %vm3943_vm7, %v2957_v58, %v1107_v36  ;;  %v1122_v38 = vsel %vm3944_vm0, %v1107_v36, %v3090_v5  ;;  %v960_v59 = vsel %vm3152_vm1, %v944_v54, 0.0  ;;  %v1450_v40 = vsel %vm555_vm3, %v3056_v49, %v1438_v30 }
 0x2f0   : > { %968 = vst [vmem:[#allocation3 + $0x50] sm:$0xff] %v960_v59  ;;  %2473 = vmatpush.msk.msra.mxu1 %vm1086_vm12, %v1121_v37  ;;  %2474 = vmatpush.msk.msra.mxu2 %vm1087_vm6, %v1122_v38  ;;  %vm1326_vm7 = vcmp.eq.s32.totalorder %v1318_v48, 1  ;;  %vm3945_vm0 = vcmask 973824   ;;  %vm3946_vm12 = vcmask 1031168   ;;  %vm3947_vm6 = vcmask 916480  }
 0x2f1   : > { %2475 = vmatpush.msk.msra.mxu3 %vm1415_vm10, %v1450_v40  ;;  %vm999_vm10 = vcmp.eq.s32.totalorder %v991_v56, 1  ;;  %v1500_v36 = vperm.slane %v2939_v43, 7  ;;  %v1321_v48 = vperm.slane %v3022_v28, 6 }
 0x2f2   : > { %2476 = vmatpush.msk.msra.mxu1 %vm3127_vm5, %v1032_v26  ;;  %vm3196_vm5 = vcmp.eq.s32.totalorder %v902_v0, 1  ;;  %v1230_v26 = vperm.slane %v2964_v3, 4 }
 0x2f3   : > { %1643 = vperm.xlu2 %2448, %v789_v42   ;;  %v1233_v42 = vperm.slane %v2964_v3, 7 }
 0x2f4   : > { %2477 = vmatpush.msk.msra.mxu1 %vm3105_vm8, %v943_v18  ;;  %vm3192_vm8 = vcmp.eq.s32.totalorder %v1080_v55, 1  ;;  %v1319_v18 = vperm.slane %v3022_v28, 4 }
 0x2f5   : > { %v3172_v58 = vpop.permute.xlu2 %1178 }
 0x2f6   : > { %v1020_v41 = vpop.permute.xlu0 %1019  ;;  %v1191_v49 = vsel %vm3945_vm0, %v3060_v51, %v3172_v58  ;;  %v1349_v50 = vpop.permute.xlu1 %1348  ;;  %2478 = vmatpush.msk.msra.mxu1 %vm2731_vm13, %v2736_v47  ;;  %vm1237_vm13 = vcmp.eq.s32.totalorder %v1229_v2, 1  ;;  %vm1505_vm0 = vcmp.eq.s32.totalorder %v1497_v20, 1  ;;  %v1231_v2 = vperm.slane %v2964_v3, 5 }
 0x2f7   : > { %v1033_v52 = vsel %vm3946_vm12, %v1018_v23, %v1020_v41  ;;  %v1361_v53 = vsel %vm3947_vm6, %v3087_v1, %v1349_v50  ;;  %2412 = vmatmul.msk.f32.vlgmr.msra.gmra.mxu1 %vm3907_vm15, %v3078_v39  ;;  %v1232_v51 = vperm.slane %v2964_v3, 6  ;;  %v1498_v3 = vperm.slane %v2939_v43, 5 }
 0x2f8   : > { %2479 = vmatpush.msk.msra.mxu2 %vm998_vm9, %v1033_v52  ;;  %2480 = vmatpush.msk.msra.mxu3 %vm1326_vm7, %v1361_v53  ;;  %vm3955_vm9 = vmmov %vm3946_vm12  ;;  %vm1327_vm7 = vcmp.eq.s32.totalorder %v1319_v18, 1 }
 0x2f9   : > { %vm3956_vm12 = vmmov %vm3947_vm6  ;;  %vm3957_vm6 = vcmask 900096  }
 0x2fa   : > { %2481 = vmatpush.msk.msra.mxu2 %vm3152_vm1, %v944_v54  ;;  %vm3952_vm1 = vcmask 982016  }
 0x2fc   : > { %2482 = vmatpush.msk.msra.mxu2 %vm2759_vm2, %v2755_v60  ;;  %v1408_v60 = vperm.slane %v2909_v31, 4 }
 0x2fd   : > { %v3200_v47 = vpop.permute.xlu2 %1110  ;;  %2413 = vmatmul.msk.f32.vlgmr.msra.gmra.mxu2 %vm3907_vm15, %v3078_v39 }
 0x2fe   : > { %v3205_v1 = vpop.permute.xlu0 %932  ;;  %v1123_v6 = vsel %vm3952_vm1, %v3090_v5, %v3200_v47  ;;  %v1260_v7 = vpop.permute.xlu1 %1259  ;;  %vm3220_vm2 = vcmp.eq.s32.totalorder %v1408_v60, 1  ;;  %vm1508_vm1 = vcmp.eq.s32.totalorder %v1500_v36, 1  ;;  %v906_v5 = vperm.slane %v3001_v19, 7 }
 0x2ff   : > { %v945_v8 = vsel %vm411_vm11, %v931_v35, %v3205_v1  ;;  %v1272_v57 = vsel %vm505_vm14, %v3109_v12, %v1260_v7  ;;  %v1322_v35 = vperm.slane %v3022_v28, 7 }
 0x300   : > { %v961_v61 = vsel %vm3196_vm5, %v945_v8, 0.0  ;;  %2483 = vmatpush.msk.msra.mxu3 %vm1237_vm13, %v1272_v57 }
 0x301   : > { %969 = vst [vmem:[#allocation3 + $0x58] sm:$0xff] %v961_v61  ;;  %vm3269_vm13 = vcmp.eq.s32.totalorder %v1322_v35, 1  ;;  %v1084_v35 = vperm.slane %v2942_v45, 7 }
 0x302   : > { %1721 = vmatpush.msra.mxu3 %v1191_v49 }
 0x304   : > { %2484 = vmatpush.msk.msra.mxu3 %vm3192_vm8, %v1123_v6  ;;  %vm1238_vm8 = vcmp.eq.s32.totalorder %v1230_v26, 1  ;;  %v993_v6 = vperm.slane %v2967_v4, 5 }
 0x305   : > { %v1535_v11 = vpop.permute.xlu2 %1534 }
 0x306   : > { %v1440_v12 = vpop.permute.xlu0 %1439  ;;  %v3226_v13 = vpop.permute.xlu1 %1021 }
 0x307   : > { %v1451_v14 = vsel %vm555_vm3, %v1438_v30, %v1440_v12  ;;  %v1034_v16 = vsel %vm3955_vm9, %v1020_v41, %v3226_v13  ;;  %vm3280_vm9 = vcmp.eq.s32.totalorder %v1233_v42, 1  ;;  %v1082_v42 = vperm.slane %v2942_v45, 5 }
 0x308   : > { %2485 = vmatpush.msk.msra.mxu3 %vm999_vm10, %v1034_v16  ;;  %vm3964_vm10 = vmmov %vm3957_vm6 }
 0x30a   : > { %2486 = vmatpush.msk.msra.mxu3 %vm3196_vm5, %v945_v8  ;;  %vm3257_vm5 = vcmp.eq.s32.totalorder %v1409_v32, 1  ;;  %v1410_v32 = vperm.slane %v2909_v31, 6 }
 0x30c   : > { %2487 = vmatpush.msk.msra.mxu3 %vm2771_vm4, %v2765_v62  ;;  %vm3958_vm4 = vcmask 973824  }
 0x30d   : > { %v3235_v21 = vpop.permute.xlu2 %1118  ;;  %2414 = vmatmul.msk.f32.vlgmr.msra.gmra.mxu3 %vm3907_vm15, %v3078_v39 }
 0x30e   : > { %v1351_v22 = vpop.permute.xlu0 %1350  ;;  %v3240_v17 = vpop.permute.xlu1 %1528 }
 0x30f   : > { %v1362_v23 = vsel %vm3956_vm12, %v1349_v50, %v1351_v22  ;;  %v1540_v25 = vsel %vm3957_vm6, %v3133_v27, %v3240_v17 }
 0x310   : > { %2488 = vmatpush.msk.msrb.mxu0 %vm1505_vm0, %v1540_v25  ;;  %vm3288_vm0 = vcmp.eq.s32.totalorder %v1321_v48, 1  ;;  %v994_v48 = vperm.slane %v2967_v4, 6 }
 0x312   : > { %2489 = vmatpush.msk.msrb.mxu0 %vm3220_vm2, %v1451_v14  ;;  %vm3963_vm2 = vmmov %vm3956_vm12 }
 0x313   : > { %vm3971_vm12 = vmmov %vm3963_vm2 }
 0x314   : > { %2490 = vmatpush.msk.msrb.mxu0 %vm1327_vm7, %v1362_v23  ;;  %vm3284_vm7 = vcmp.eq.s32.totalorder %v1320_v46, 1  ;;  %vm3972_vm6 = vmmov %vm3963_vm2  ;;  %v1083_v46 = vperm.slane %v2942_v45, 6 }
 0x315   : > { %v3251_v62 = vpop.permute.xlu2 %1029 }
 0x316   : > { %v1262_v63 = vpop.permute.xlu0 %1261  ;;  %v1181_v10 = vpop.permute.xlu1 %1180 }
 0x317   : > { %v1273_v29 = vsel %vm505_vm14, %v1260_v7, %v1262_v63  ;;  %v1192_v9 = vsel %vm3958_vm4, %v3172_v58, %v1181_v10  ;;  %vm3303_vm4 = vcmp.eq.s32.totalorder %v1232_v51, 1  ;;  %v2452_v51 = vld [vmem:[#allocation3 + $0x38] sm:$0xff]  ;;  %v903_v7 = vperm.slane %v3001_v19, 4 }
 0x318   : > { %2491 = vmatpush.msk.msrb.mxu0 %vm1238_vm8, %v1273_v29  ;;  %vm3299_vm8 = vcmp.eq.s32.totalorder %v1231_v2, 1  ;;  %v1081_v29 = vperm.slane %v2942_v45, 4  ;;  %v1977_v45 = vld [vmem:[%s3897_s6 + $0x70] sm:$0xff] }
 0x31a   : > { %1741 = vmatpush.msrb.mxu0 %v1192_v9 }
 0x31d   : > { %v3261_v33 = vpop.permute.xlu2 %1441 }
 0x31e   : > { %v1357_v15 = vpop.permute.xlu0 %1356  ;;  %v1452_v34 = vsel %vm555_vm3, %v1440_v12, %v3261_v33  ;;  %v3265_v24 = vpop.permute.xlu1 %1445 }
 0x325   : > { %v1355_v30 = vpop.permute.xlu2 %1354 }
 0x326   : > { %v1268_v37 = vpop.permute.xlu0 %1267  ;;  %v3274_v38 = vsel %vm3963_vm2, %v1355_v30, %v1357_v15  ;;  %v1533_v59 = vpop.permute.xlu1 %1532  ;;  %vm3313_vm2 = vcmp.eq.s32.totalorder %v906_v5, 1  ;;  %v1411_v15 = vperm.slane %v2909_v31, 7 }
 0x327   : > { %v1543_v40 = vsel %vm3964_vm10, %v1533_v59, %v1535_v11  ;;  %v1499_v11 = vperm.slane %v2939_v43, 6  ;;  %vm3317_vm10 = vcmp.eq.s32.totalorder %v1498_v3, 1 }
 0x328   : > { %2492 = vmatpush.msk.msrb.mxu3 %vm1508_vm1, %v1543_v40  ;;  %vm3977_vm1 = vcmask 973824  }
 0x329   : > { %vm3986_vm15 = vmmov %vm3977_vm1 }
 0x32d   : > { %v1266_v41 = vpop.permute.xlu2 %1265 }
 0x32e   : > { %v1187_v52 = vpop.permute.xlu0 %1186  ;;  %v3293_v53 = vsel %vm505_vm14, %v1266_v41, %v1268_v37  ;;  %v1353_v55 = vpop.permute.xlu1 %1352 }
 0x32f   : > { %v1363_v28 = vsel %vm3971_vm12, %v1351_v22, %v1353_v55  ;;  %v1364_v0 = vsel %vm3972_vm6, %v1353_v55, %v1355_v30  ;;  %vm3321_vm12 = vcmp.eq.s32.totalorder %v1499_v11, 1 }
 0x335   : > { %v1185_v44 = vpop.permute.xlu2 %1184 }
 0x336   : > { %v941_v8 = vpop.permute.xlu0 %940  ;;  %v1195_v57 = vsel %vm3977_vm1, %v1185_v44, %v1187_v52  ;;  %v1264_v61 = vpop.permute.xlu1 %1263 }
 0x337   : > { %v1274_v60 = vsel %vm505_vm14, %v1262_v63, %v1264_v61  ;;  %v1275_v56 = vsel %vm505_vm14, %v1264_v61, %v1266_v41  ;;  %vm3984_vm14 = vcmask 900096   ;;  %v905_v41 = vperm.slane %v3001_v19, 6 }
 0x338   : > { %vm3985_vm6 = vmmov %vm3984_vm14 }
 0x33d   : > { %v3325_v18 = vpop.permute.xlu2 %938 }
 0x33e   : > { %v1531_v20 = vpop.permute.xlu0 %1530  ;;  %v3329_v22 = vsel %vm411_vm11, %v3325_v18, %v941_v8  ;;  %v1183_v43 = vpop.permute.xlu1 %1182  ;;  %v904_v8 = vperm.slane %v3001_v19, 5 }
 0x33f   : > { %v1541_v23 = vsel %vm3984_vm14, %v3240_v17, %v1531_v20  ;;  %v1542_v25 = vsel %vm3985_vm6, %v1531_v20, %v1533_v59  ;;  %v965_v26 = vsel %vm3313_vm2, %v3329_v22, 0.0  ;;  %v1193_v63 = vsel %vm3977_vm1, %v1181_v10, %v1183_v43  ;;  %v1971_v20 = vld [vmem:[%s3897_s6 + $0x40] sm:$0xff] }
 0x340   : > { %973 = vst [vmem:[#allocation3 + $0x78] sm:$0xff] %v965_v26  ;;  %v1194_v9 = vsel %vm3986_vm15, %v1183_v43, %v1185_v44  ;;  %2493 = vmatpush.msk.msrb.mxu1 %vm3317_vm10, %v1541_v23  ;;  %2494 = vmatpush.msk.msrb.mxu2 %vm3321_vm12, %v1542_v25  ;;  %vm1089_vm14 = vcmp.eq.s32.totalorder %v1081_v29, 1  ;;  %vm3349_vm6 = vcmp.eq.s32.totalorder %v1410_v32, 1  ;;  %vm3353_vm15 = vcmp.eq.s32.totalorder %v1411_v15, 1  ;;  %v2455_v29 = vld [vmem:[#allocation3 + $0x28] sm:$0xff] }
 0x341   : > { %vm3357_vm1 = vcmp.eq.s32.totalorder %v1084_v35, 1  ;;  %v992_v44 = vperm.slane %v2967_v4, 4 }
 0x342   : > { %2495 = vmatpush.msk.msrb.mxu1 %vm3257_vm5, %v1452_v34  ;;  %vm3993_vm5 = vcmask 982016  }
 0x343   : > { %vm3994_vm10 = vmmov %vm3993_vm5 }
 0x344   : > { %2496 = vmatpush.msk.msrb.mxu1 %vm3284_vm7, %v1363_v28  ;;  %vm1091_vm7 = vcmp.eq.s32.totalorder %v1083_v46, 1  ;;  %v2010_v46 = vld [vmem:[%s3897_s6 + $0x178] sm:$0xff] }
 0x345   : > { %v1113_v31 = vpop.permute.xlu2 %1112 }
 0x346   : > { %v1444_v30 = vpop.permute.xlu0 %1443  ;;  %v1124_v27 = vsel %vm3993_vm5, %v3200_v47, %v1113_v31  ;;  %v1117_v34 = vpop.permute.xlu1 %1116  ;;  %2497 = vmatpush.msk.msrb.mxu1 %vm3299_vm8, %v1274_v60  ;;  %v995_v47 = vperm.slane %v2967_v4, 7 }
 0x347   : > { %v1453_v37 = vsel %vm555_vm3, %v3261_v33, %v1444_v30  ;;  %v1454_v59 = vsel %vm555_vm3, %v1444_v30, %v3265_v24  ;;  %v1127_v40 = vsel %vm3994_vm10, %v1117_v34, %v3235_v21  ;;  %2498 = vmatpush.msk.msrb.mxu0 %vm1089_vm14, %v1124_v27  ;;  %vm1090_vm3 = vcmp.eq.s32.totalorder %v1082_v42, 1  ;;  %v1994_v42 = vld [vmem:[%s3897_s6 + $0xf8] sm:$0xff] }
 0x348   : > { %1761 = vmatpush.msrb.mxu1 %v1193_v63  ;;  %2499 = vmatpush.msk.msrb.mxu2 %vm3349_vm6, %v1453_v37  ;;  %vm3385_vm8 = vcmp.eq.s32.totalorder %v995_v47, 1  ;;  %vm4003_vm6 = vcmask 588800   ;;  %v2454_v63 = vld [vmem:[#allocation3 + $0x20] sm:$0xff]  ;;  %v2026_v47 = vld [vmem:[%s3897_s6 + $0x1f8] sm:$0xff] }
 0x349   : > { %2500 = vmatpush.msk.msrb.mxu3 %vm3353_vm15, %v1454_v59  ;;  %vm3431_vm15 = vcmp.eq.s32.totalorder %v993_v6, 1  ;;  %v2021_v6 = vld [vmem:[%s3897_s6 + $0x1d0] sm:$0xff] }
 0x34a   : > { %2501 = vmatpush.msk.msrb.mxu2 %vm3288_vm0, %v1364_v0  ;;  %vm3997_vm0 = vmmov %vm3993_vm5 }
 0x34b   : > { %2502 = vmatpush.msk.msrb.mxu3 %vm3269_vm13, %v3274_v38  ;;  %vm3998_vm12 = vmmov %vm3997_vm0  ;;  %vm3999_vm13 = vcmask 1031168  }
 0x34c   : > { %2503 = vmatpush.msk.msrb.mxu2 %vm3303_vm4, %v1275_v56  ;;  %vm3407_vm4 = vcmp.eq.s32.totalorder %v905_v41, 1  ;;  %vm4002_vm14 = vmmov %vm3999_vm13  ;;  %v2024_v41 = vld [vmem:[%s3897_s6 + $0x1e8] sm:$0xff] }
 0x34d   : > { %2504 = vmatpush.msk.msrb.mxu3 %vm3280_vm9, %v3293_v53  ;;  %v3402_v58 = vpop.permute.xlu2 %1643  ;;  %vm1002_vm9 = vcmp.eq.s32.totalorder %v994_v48, 1  ;;  %vm4009_vm5 = vmmov %vm3999_vm13  ;;  %v2008_v48 = vld [vmem:[%s3897_s6 + $0x168] sm:$0xff] }
 0x34e   : > { %v1115_v21 = vpop.permute.xlu0 %1114  ;;  %v1028_v33 = vpop.permute.xlu1 %1027  ;;  %1781 = vmatpush.msrb.mxu2 %v1194_v9  ;;  %vm4010_vm10 = vmmov %vm4009_vm5 }
 0x34f   : > { %v1125_v24 = vsel %vm3997_vm0, %v1113_v31, %v1115_v21  ;;  %v1126_v54 = vsel %vm3998_vm12, %v1115_v21, %v1117_v34  ;;  %v1038_v38 = vsel %vm3999_vm13, %v1028_v33, %v3251_v62  ;;  %1801 = vmatpush.msrb.mxu3 %v1195_v57  ;;  %v2453_v57 = vld [vmem:[#allocation3 + $0x30] sm:$0xff]  ;;  %v1993_v21 = vld [vmem:[%s3897_s6 + $0xf0] sm:$0xff]  ;;  %v2007_v62 = vld [vmem:[%s3897_s6 + $0x160] sm:$0xff]  ;;  %vm2263_vm0 = vcmask 261120  }
 0x350   : > { %2505 = vmatpush.msk.msrb.mxu1 %vm1090_vm3, %v1125_v24  ;;  %2506 = vmatpush.msk.msrb.mxu2 %vm1091_vm7, %v1126_v54  ;;  %vm3440_vm3 = vcmp.eq.s32.totalorder %v903_v7, 1  ;;  %vm3444_vm7 = vcmp.eq.s32.totalorder %v904_v8, 1  ;;  %v2025_v24 = vld [vmem:[%s3897_s6 + $0x1f0] sm:$0xff]  ;;  %v1976_v54 = vld [vmem:[%s3897_s6 + $0x68] sm:$0xff]  ;;  %vm2287_vm12 = vcmask 0   ;;  %vm2293_vm13 = vcmask 9225  }
 0x351   : > { %2507 = vmatpush.msk.msrb.mxu3 %vm3357_vm1, %v1127_v40  ;;  %vm4008_vm1 = vmmov %vm4003_vm6  ;;  %v1978_v40 = vld [vmem:[%s3897_s6 + $0x78] sm:$0xff] }
 0x353   : > { %v1667_v49 = vpop.f32.mrf.mxu0  ;;  %2508 = vmatpush.msk.msrb.mxu3 %vm3385_vm8, %v1038_v38  ;;  %vm4016_vm8 = vmmov %vm4008_vm1  ;;  %v1992_v38 = vld [vmem:[%s3897_s6 + $0xe8] sm:$0xff] }
 0x354   : > { %v1668_v50 = vadd.f32 %v1667_v49, %v3402_v58  ;;  %v1975_v49 = vld [vmem:[%s3897_s6 + $0x60] sm:$0xff] }
 0x355   : > { %2509 = vmatpush.msk.msrb.mxu3 %vm3313_vm2, %v3329_v22  ;;  %vm3427_vm2 = vcmp.eq.s32.totalorder %v992_v44, 1  ;;  %v2005_v44 = vld [vmem:[%s3897_s6 + $0x150] sm:$0xff] }
 0x356   : > { %v1026_v52 = vpop.permute.xlu0 %1025  ;;  %v937_v53 = vpop.permute.xlu1 %936  ;;  %v1810_v55 = vmax.f32 %v1668_v50, 0.0  ;;  %v1991_v50 = vld [vmem:[%s3897_s6 + $0xe0] sm:$0xff] }
 0x357   : > { %v1037_v28 = vsel %vm4002_vm14, %v1026_v52, %v1028_v33  ;;  %v948_v0 = vsel %vm411_vm11, %v937_v53, %v3325_v18  ;;  %1805 = vmatpush.msrb.mxu3 %v2452_v51  ;;  %v2009_v33 = vld [vmem:[%s3897_s6 + $0x170] sm:$0xff]  ;;  %vm2308_vm14 = vcmask 36900  }
 0x358   : > { %v964_v2 = vsel %vm3407_vm4, %v948_v0, 0.0  ;;  %1818 = vst [vmem:[#allocation4] sm:$0xff] %v1810_v55  ;;  %2418 = vmatmul.msk.f32.vlgmr.msrb.gmra.mxu3 %vm4003_vm6, %v3078_v39  ;;  %2510 = vmatpush.msk.msrb.mxu2 %vm1002_vm9, %v1037_v28  ;;  %v1990_v55 = vld [vmem:[%s3897_s6 + $0xd8] sm:$0xff]  ;;  %v1989_v51 = vld [vmem:[%s3897_s6 + $0xd0] sm:$0xff]  ;;  %vm2298_vm9 = vcmask 18450   ;;  %vm2313_vm6 = vcmask 46125  }
 0x359   : > { %972 = vst [vmem:[#allocation3 + $0x70] sm:$0xff] %v964_v2  ;;  %2154 = vmatpush.msra.mxu3 %v2026_v47  ;;  %v2006_v28 = vld [vmem:[%s3897_s6 + $0x158] sm:$0xff]  ;;  %v1973_v2 = vld [vmem:[%s3897_s6 + $0x50] sm:$0xff] }
 0x35a   : > { %2511 = vmatpush.msk.msrb.mxu2 %vm3407_vm4, %v948_v0  ;;  %v2022_v0 = vld [vmem:[%s3897_s6 + $0x1d8] sm:$0xff]  ;;  %vm2303_vm4 = vcmask 27675  }
 0x35b   : > { %2155 = vmatpush.msra.mxu3 %v2025_v24 }
 0x35c   : > { %1785 = vmatpush.msrb.mxu2 %v2453_v57 }
 0x35d   : > { %2417 = vmatmul.msk.f32.vlgmr.msrb.gmra.mxu2 %vm4008_vm1, %v3078_v39  ;;  %2156 = vmatpush.msra.mxu3 %v2024_v41  ;;  %v2013_v41 = vld [vmem:[%s3897_s6 + $0x190] sm:$0xff] }
 0x35e   : > { %v1024_v56 = vpop.permute.xlu0 %1023  ;;  %v935_v5 = vpop.permute.xlu1 %934  ;;  %2134 = vmatpush.msra.mxu2 %v2010_v46 }
 0x35f   : > { %v1826_v4 = vld [vmem:[#allocation4] ss:$0 sm:$0xff]  ;;  %v1828_v3 = vld [vmem:[#allocation4 + $0x1] ss:$0 sm:$0xff]  ;;  %v1830_v11 = vld [vmem:[#allocation4 + $0x2] ss:$0 sm:$0xff]  ;;  %v1035_v19 = vsel %vm4009_vm5, %v3226_v13, %v1024_v56  ;;  %v1036_v12 = vsel %vm4010_vm10, %v1024_v56, %v1026_v52  ;;  %v946_v22 = vsel %vm411_vm11, %v3205_v1, %v935_v5  ;;  %v947_v43 = vsel %vm411_vm11, %v935_v5, %v937_v53 }
 0x360   : > { %1827 = vst [vmem:[#allocation5] sm:$0x1] %v1826_v4  ;;  %v1832_v14 = vld [vmem:[#allocation4 + $0x3] ss:$0 sm:$0xff]  ;;  %v1834_v16 = vld [vmem:[#allocation4 + $0x4] ss:$0 sm:$0xff]  ;;  %2512 = vmatpush.msk.msrb.mxu0 %vm3427_vm2, %v1035_v19  ;;  %2513 = vmatpush.msk.msrb.mxu1 %vm3431_vm15, %v1036_v12  ;;  %vm4015_vm11 = vmmov %vm4008_vm1 }
 0x361   : > { %1829 = vst [vmem:[#allocation5 + $0x8] sm:$0x1] %v1828_v3  ;;  %v1836_v13 = vld [vmem:[#allocation4 + $0x5] ss:$0 sm:$0xff]  ;;  %v1838_v23 = vld [vmem:[#allocation4 + $0x6] ss:$0 sm:$0xff]  ;;  %2135 = vmatpush.msra.mxu2 %v2009_v33 }
 0x362   : > { %1831 = vst [vmem:[#allocation5 + $0x10] sm:$0x1] %v1830_v11  ;;  %v1840_v25 = vld [vmem:[#allocation4 + $0x7] ss:$0 sm:$0xff]  ;;  %v962_v26 = vsel %vm3440_vm3, %v946_v22, 0.0  ;;  %v963_v1 = vsel %vm3444_vm7, %v947_v43, 0.0  ;;  %2514 = vmatpush.msk.msrb.mxu0 %vm3440_vm3, %v946_v22  ;;  %2515 = vmatpush.msk.msrb.mxu1 %vm3444_vm7, %v947_v43 }
 0x363   : > { %1833 = vst [vmem:[#allocation5 + $0x18] sm:$0x1] %v1832_v14  ;;  %v2023_v52 = vld [vmem:[%s3897_s6 + $0x1e0] sm:$0xff]  ;;  %v1974_v53 = vld [vmem:[%s3897_s6 + $0x58] sm:$0xff]  ;;  %2136 = vmatpush.msra.mxu2 %v2008_v48  ;;  %v1972_v19 = vld [vmem:[%s3897_s6 + $0x48] sm:$0xff]  ;;  %vm2318_vm2 = vcmask 55350  }
 0x364   : > { %1835 = vst [vmem:[#allocation5 + $0x20] sm:$0x1] %v1834_v16  ;;  %1745 = vmatpush.msrb.mxu0 %v2454_v63  ;;  %1765 = vmatpush.msrb.mxu1 %v2455_v29  ;;  %v1988_v12 = vld [vmem:[%s3897_s6 + $0xc8] sm:$0xff]  ;;  %v1987_v22 = vld [vmem:[%s3897_s6 + $0xc0] sm:$0xff]  ;;  %v1969_v63 = vld [vmem:[%s3897_s6 + $0x30] sm:$0xff]  ;;  %vm2323_vm15 = vcmask 64575  }
 0x365   : > { %1837 = vst [vmem:[#allocation5 + $0x28] sm:$0x1] %v1836_v13  ;;  %2415 = vmatmul.msk.f32.vlgmr.msrb.gmra.mxu0 %vm4015_vm11, %v3078_v39  ;;  %2416 = vmatmul.msk.f32.vlgmr.msrb.gmra.mxu1 %vm4016_vm8, %v3078_v39  ;;  %v2004_v14 = vld [vmem:[%s3897_s6 + $0x148] sm:$0xff]  ;;  %v2003_v43 = vld [vmem:[%s3897_s6 + $0x140] sm:$0xff]  ;;  %v1985_v29 = vld [vmem:[%s3897_s6 + $0xb0] sm:$0xff] }
 0x366   : > { %1839 = vst [vmem:[#allocation5 + $0x30] sm:$0x1] %v1838_v23  ;;  %2094 = vmatpush.msra.mxu0 %v1978_v40  ;;  %2114 = vmatpush.msra.mxu1 %v1994_v42  ;;  %v2020_v16 = vld [vmem:[%s3897_s6 + $0x1c8] sm:$0xff]  ;;  %v2019_v13 = vld [vmem:[%s3897_s6 + $0x1c0] sm:$0xff]  ;;  %v1970_v23 = vld [vmem:[%s3897_s6 + $0x38] sm:$0xff] }
 0x367   : > { %1841 = vst [vmem:[#allocation5 + $0x38] sm:$0x1] %v1840_v25  ;;  %2137 = vmatpush.msra.mxu2 %v2007_v62  ;;  %2157 = vmatpush.msra.mxu3 %v2023_v52  ;;  %v1986_v25 = vld [vmem:[%s3897_s6 + $0xb8] sm:$0xff]  ;;  %v1997_v48 = vld [vmem:[%s3897_s6 + $0x110] sm:$0xff]  ;;  %v1996_v62 = vld [vmem:[%s3897_s6 + $0x108] sm:$0xff] }
 0x368   : > { %970 = vst [vmem:[#allocation3 + $0x60] sm:$0xff] %v962_v26  ;;  %2095 = vmatpush.msra.mxu0 %v1977_v45  ;;  %2115 = vmatpush.msra.mxu1 %v1993_v21  ;;  %v2002_v26 = vld [vmem:[%s3897_s6 + $0x138] sm:$0xff]  ;;  %v2012_v52 = vld [vmem:[%s3897_s6 + $0x188] sm:$0xff] }
 0x369   : > { %971 = vst [vmem:[#allocation3 + $0x68] sm:$0xff] %v963_v1  ;;  %2138 = vmatpush.msra.mxu2 %v2006_v28  ;;  %2158 = vmatpush.msra.mxu3 %v2022_v0  ;;  %v2018_v1 = vld [vmem:[%s3897_s6 + $0x1b8] sm:$0xff]  ;;  %v1995_v28 = vld [vmem:[%s3897_s6 + $0x100] sm:$0xff] }
 0x36a   : > { %2096 = vmatpush.msra.mxu0 %v1976_v54  ;;  %2116 = vmatpush.msra.mxu1 %v1992_v38  ;;  %v1965_v54 = vld [vmem:[%s3897_s6 + $0x10] sm:$0xff]  ;;  %v2011_v0 = vld [vmem:[%s3897_s6 + $0x180] sm:$0xff] }
 0x36b   : > { %2139 = vmatpush.msra.mxu2 %v2005_v44  ;;  %2159 = vmatpush.msra.mxu3 %v2021_v6  ;;  %v1981_v38 = vld [vmem:[%s3897_s6 + $0x90] sm:$0xff]  ;;  %v2074_v44 = vld [vmem:[%s3897_s6 + $0x378] sm:$0xff] }
 0x36c   : > { %2097 = vmatpush.msra.mxu0 %v1975_v49  ;;  %2117 = vmatpush.msra.mxu1 %v1991_v50  ;;  %v1964_v49 = vld [vmem:[%s3897_s6 + $0x8] sm:$0xff]  ;;  %v2090_v6 = vld [vmem:[%s3897_s6 + $0x3f8] sm:$0xff] }
 0x36d   : > { %2140 = vmatpush.msra.mxu2 %v2004_v14  ;;  %2160 = vmatpush.msra.mxu3 %v2020_v16  ;;  %v1980_v50 = vld [vmem:[%s3897_s6 + $0x88] sm:$0xff] }
 0x36e   : > { %2098 = vmatpush.msra.mxu0 %v1974_v53  ;;  %2118 = vmatpush.msra.mxu1 %v1990_v55  ;;  %v1963_v53 = vld [vmem:[%s3897_s6] sm:$0xff]  ;;  %v2072_v14 = vld [vmem:[%s3897_s6 + $0x368] sm:$0xff] }
 0x36f   : > { %2141 = vmatpush.msra.mxu2 %v2003_v43  ;;  %2161 = vmatpush.msra.mxu3 %v2019_v13  ;;  %v1979_v55 = vld [vmem:[%s3897_s6 + $0x80] sm:$0xff]  ;;  %v2088_v16 = vld [vmem:[%s3897_s6 + $0x3e8] sm:$0xff] }
 0x370   : > { %2099 = vmatpush.msra.mxu0 %v1973_v2  ;;  %2119 = vmatpush.msra.mxu1 %v1989_v51  ;;  %v2042_v2 = vld [vmem:[%s3897_s6 + $0x278] sm:$0xff]  ;;  %v2087_v43 = vld [vmem:[%s3897_s6 + $0x3e0] sm:$0xff] }
 0x371   : > { %2142 = vmatpush.msra.mxu2 %v2002_v26  ;;  %2162 = vmatpush.msra.mxu3 %v2018_v1  ;;  %v2058_v51 = vld [vmem:[%s3897_s6 + $0x2f8] sm:$0xff] }
 0x372   : > { %2100 = vmatpush.msra.mxu0 %v1972_v19  ;;  %2120 = vmatpush.msra.mxu1 %v1988_v12  ;;  %v2040_v19 = vld [vmem:[%s3897_s6 + $0x268] sm:$0xff] }
 0x373   : > { %v2056_v12 = vld [vmem:[%s3897_s6 + $0x2e8] sm:$0xff] }
 0x374   : > { %v1687_v9 = vpop.f32.mrf.mxu1  ;;  %2101 = vmatpush.msra.mxu0 %v1971_v20  ;;  %2121 = vmatpush.msra.mxu1 %v1987_v22  ;;  %v2055_v20 = vld [vmem:[%s3897_s6 + $0x2e0] sm:$0xff] }
 0x375   : > { %v1688_v32 = vadd.f32 %v1687_v9, %v3402_v58  ;;  %v2001_v9 = vld [vmem:[%s3897_s6 + $0x130] sm:$0xff]  ;;  %v2071_v22 = vld [vmem:[%s3897_s6 + $0x360] sm:$0xff] }
 0x376   : > { %2102 = vmatpush.msra.mxu0 %v1970_v23  ;;  %2122 = vmatpush.msra.mxu1 %v1986_v25 }
 0x377   : > { %v1811_v15 = vmax.f32 %v1688_v32, 0.0  ;;  %v2017_v32 = vld [vmem:[%s3897_s6 + $0x1b0] sm:$0xff]  ;;  %2143 = vmatpush.msra.mxu2 %v2001_v9  ;;  %v2038_v9 = vld [vmem:[%s3897_s6 + $0x258] sm:$0xff] }
 0x378   : > { %2103 = vmatpush.msra.mxu0 %v1969_v63  ;;  %2123 = vmatpush.msra.mxu1 %v1985_v29 }
 0x379   : > { %1819 = vst [vmem:[#allocation4 + $0x8] sm:$0xff] %v1811_v15  ;;  %v1968_v15 = vld [vmem:[%s3897_s6 + $0x28] sm:$0xff]  ;;  %2163 = vmatpush.msra.mxu3 %v2017_v32  ;;  %v2054_v32 = vld [vmem:[%s3897_s6 + $0x2d8] sm:$0xff] }
 0x37a   : > { %2104 = vmatpush.msra.mxu0 %v1968_v15  ;;  %v2070_v15 = vld [vmem:[%s3897_s6 + $0x358] sm:$0xff] }
 0x380   : > { %v1842_v35 = vld [vmem:[#allocation4 + $0x8] ss:$0 sm:$0xff]  ;;  %v1844_v17 = vld [vmem:[#allocation4 + $0x9] ss:$0 sm:$0xff]  ;;  %v1846_v10 = vld [vmem:[#allocation4 + $0xa] ss:$0 sm:$0xff]  ;;  %v1707_v31 = vpop.f32.mrf.mxu2 }
 0x381   : > { %1843 = vst [vmem:[#allocation5 + $0x1] sm:$0x1] %v1842_v35  ;;  %v1848_v36 = vld [vmem:[#allocation4 + $0xb] ss:$0 sm:$0xff]  ;;  %v1708_v30 = vadd.f32 %v1707_v31, %v3402_v58  ;;  %v1850_v27 = vld [vmem:[#allocation4 + $0xc] ss:$0 sm:$0xff] }
 0x382   : > { %1845 = vst [vmem:[#allocation5 + $0x9] sm:$0x1] %v1844_v17  ;;  %v1852_v34 = vld [vmem:[#allocation4 + $0xd] ss:$0 sm:$0xff]  ;;  %v1854_v39 = vld [vmem:[#allocation4 + $0xe] ss:$0 sm:$0xff] }
 0x383   : > { %1847 = vst [vmem:[#allocation5 + $0x11] sm:$0x1] %v1846_v10  ;;  %v1856_v37 = vld [vmem:[#allocation4 + $0xf] ss:$0 sm:$0xff]  ;;  %v1812_v59 = vmax.f32 %v1708_v30, 0.0  ;;  %v1984_v35 = vld [vmem:[%s3897_s6 + $0xa8] sm:$0xff] }
 0x384   : > { %1849 = vst [vmem:[#allocation5 + $0x19] sm:$0x1] %v1848_v36  ;;  %v2000_v17 = vld [vmem:[%s3897_s6 + $0x128] sm:$0xff]  ;;  %v1967_v31 = vld [vmem:[%s3897_s6 + $0x20] sm:$0xff]  ;;  %2124 = vmatpush.msra.mxu1 %v1984_v35 }
 0x385   : > { %1851 = vst [vmem:[#allocation5 + $0x21] sm:$0x1] %v1850_v27  ;;  %v2016_v10 = vld [vmem:[%s3897_s6 + $0x1a8] sm:$0xff]  ;;  %v1983_v36 = vld [vmem:[%s3897_s6 + $0xa0] sm:$0xff]  ;;  %2144 = vmatpush.msra.mxu2 %v2000_v17  ;;  %2105 = vmatpush.msra.mxu0 %v1967_v31 }
 0x386   : > { %1853 = vst [vmem:[#allocation5 + $0x29] sm:$0x1] %v1852_v34  ;;  %v1999_v30 = vld [vmem:[%s3897_s6 + $0x120] sm:$0xff]  ;;  %2164 = vmatpush.msra.mxu3 %v2016_v10  ;;  %v1966_v34 = vld [vmem:[%s3897_s6 + $0x18] sm:$0xff]  ;;  %2125 = vmatpush.msra.mxu1 %v1983_v36 }
 0x387   : > { %1855 = vst [vmem:[#allocation5 + $0x31] sm:$0x1] %v1854_v39  ;;  %v2015_v27 = vld [vmem:[%s3897_s6 + $0x1a0] sm:$0xff]  ;;  %v1982_v39 = vld [vmem:[%s3897_s6 + $0x98] sm:$0xff]  ;;  %2145 = vmatpush.msra.mxu2 %v1999_v30  ;;  %2106 = vmatpush.msra.mxu0 %v1966_v34 }
 0x388   : > { %1857 = vst [vmem:[#allocation5 + $0x39] sm:$0x1] %v1856_v37  ;;  %v1998_v37 = vld [vmem:[%s3897_s6 + $0x118] sm:$0xff]  ;;  %2165 = vmatpush.msra.mxu3 %v2015_v27  ;;  %2126 = vmatpush.msra.mxu1 %v1982_v39 }
 0x389   : > { %1820 = vst [vmem:[#allocation4 + $0x10] sm:$0xff] %v1812_v59  ;;  %v2014_v59 = vld [vmem:[%s3897_s6 + $0x198] sm:$0xff]  ;;  %2146 = vmatpush.msra.mxu2 %v1998_v37  ;;  %2107 = vmatpush.msra.mxu0 %v1965_v54  ;;  %v2084_v54 = vld [vmem:[%s3897_s6 + $0x3c8] sm:$0xff] }
 0x38a   : > { %2166 = vmatpush.msra.mxu3 %v2014_v59  ;;  %2127 = vmatpush.msra.mxu1 %v1981_v38  ;;  %v2086_v59 = vld [vmem:[%s3897_s6 + $0x3d8] sm:$0xff] }
 0x38b   : > { %2147 = vmatpush.msra.mxu2 %v1997_v48  ;;  %2108 = vmatpush.msra.mxu0 %v1964_v49  ;;  %v2035_v48 = vld [vmem:[%s3897_s6 + $0x240] sm:$0xff] }
 0x38c   : > { %2167 = vmatpush.msra.mxu3 %v2013_v41  ;;  %2128 = vmatpush.msra.mxu1 %v1980_v50  ;;  %v2051_v41 = vld [vmem:[%s3897_s6 + $0x2c0] sm:$0xff] }
 0x38d   : > { %2148 = vmatpush.msra.mxu2 %v1996_v62  ;;  %2109 = vmatpush.msra.mxu0 %v1963_v53  ;;  %v2067_v49 = vld [vmem:[%s3897_s6 + $0x340] sm:$0xff] }
 0x38e   : > { %2168 = vmatpush.msra.mxu3 %v2012_v52  ;;  %2129 = vmatpush.msra.mxu1 %v1979_v55  ;;  %v2083_v62 = vld [vmem:[%s3897_s6 + $0x3c0] sm:$0xff]  ;;  %v2034_v52 = vld [vmem:[%s3897_s6 + $0x238] sm:$0xff] }
 0x38f   : > { %2149 = vmatpush.msra.mxu2 %v1995_v28  ;;  %2174 = vmatpush.msrb.mxu0 %v2042_v2  ;;  %v2050_v55 = vld [vmem:[%s3897_s6 + $0x2b8] sm:$0xff]  ;;  %v2033_v2 = vld [vmem:[%s3897_s6 + $0x230] sm:$0xff] }
 0x390   : > { %v1858_v7 = vld [vmem:[#allocation4 + $0x10] ss:$0 sm:$0xff]  ;;  %v1860_v8 = vld [vmem:[#allocation4 + $0x11] ss:$0 sm:$0xff]  ;;  %v1862_v57 = vld [vmem:[#allocation4 + $0x12] ss:$0 sm:$0xff]  ;;  %v1727_v61 = vpop.f32.mrf.mxu3  ;;  %2169 = vmatpush.msra.mxu3 %v2011_v0  ;;  %2194 = vmatpush.msrb.mxu1 %v2058_v51 }
 0x391   : > { %1859 = vst [vmem:[#allocation5 + $0x2] sm:$0x1] %v1858_v7  ;;  %v1864_v60 = vld [vmem:[#allocation4 + $0x13] ss:$0 sm:$0xff]  ;;  %v1866_v56 = vld [vmem:[#allocation4 + $0x14] ss:$0 sm:$0xff]  ;;  %v1728_v5 = vadd.f32 %v1727_v61, %v3402_v58  ;;  %2214 = vmatpush.msrb.mxu2 %v2074_v44 }
 0x392   : > { %1861 = vst [vmem:[#allocation5 + $0xa] sm:$0x1] %v1860_v8  ;;  %v1868_v4 = vld [vmem:[#allocation4 + $0x15] ss:$0 sm:$0xff]  ;;  %v1870_v3 = vld [vmem:[#allocation4 + $0x16] ss:$0 sm:$0xff]  ;;  %2234 = vmatpush.msrb.mxu3 %v2090_v6 }
 0x393   : > { %1863 = vst [vmem:[#allocation5 + $0x12] sm:$0x1] %v1862_v57  ;;  %v1872_v11 = vld [vmem:[#allocation4 + $0x17] ss:$0 sm:$0xff]  ;;  %v1813_v18 = vmax.f32 %v1728_v5, 0.0  ;;  %v2057_v5 = vld [vmem:[%s3897_s6 + $0x2f0] sm:$0xff] }
 0x394   : > { %1865 = vst [vmem:[#allocation5 + $0x1a] sm:$0x1] %v1864_v60  ;;  %2195 = vmatpush.msrb.mxu1 %v2057_v5  ;;  %v2066_v28 = vld [vmem:[%s3897_s6 + $0x338] sm:$0xff]  ;;  %v2049_v51 = vld [vmem:[%s3897_s6 + $0x2b0] sm:$0xff]  ;;  %v2063_v5 = vld [vmem:[%s3897_s6 + $0x320] sm:$0xff] }
 0x395   : > { %1867 = vst [vmem:[#allocation5 + $0x22] sm:$0x1] %v1866_v56  ;;  %v2041_v56 = vld [vmem:[%s3897_s6 + $0x270] sm:$0xff]  ;;  %v2082_v0 = vld [vmem:[%s3897_s6 + $0x3b8] sm:$0xff] }
 0x396   : > { %1869 = vst [vmem:[#allocation5 + $0x2a] sm:$0x1] %v1868_v4  ;;  %v2073_v4 = vld [vmem:[%s3897_s6 + $0x370] sm:$0xff]  ;;  %2175 = vmatpush.msrb.mxu0 %v2041_v56  ;;  %2196 = vmatpush.msrb.mxu1 %v2056_v12  ;;  %v2047_v56 = vld [vmem:[%s3897_s6 + $0x2a0] sm:$0xff]  ;;  %v2078_v12 = vld [vmem:[%s3897_s6 + $0x398] sm:$0xff] }
 0x397   : > { %1871 = vst [vmem:[#allocation5 + $0x32] sm:$0x1] %v1870_v3  ;;  %v2089_v3 = vld [vmem:[%s3897_s6 + $0x3f0] sm:$0xff]  ;;  %2215 = vmatpush.msrb.mxu2 %v2073_v4  ;;  %v2079_v4 = vld [vmem:[%s3897_s6 + $0x3a0] sm:$0xff] }
 0x398   : > { %1873 = vst [vmem:[#allocation5 + $0x3a] sm:$0x1] %v1872_v11  ;;  %2235 = vmatpush.msrb.mxu3 %v2089_v3  ;;  %2176 = vmatpush.msrb.mxu0 %v2040_v19  ;;  %v2065_v44 = vld [vmem:[%s3897_s6 + $0x330] sm:$0xff]  ;;  %v2030_v3 = vld [vmem:[%s3897_s6 + $0x218] sm:$0xff] }
 0x399   : > { %1821 = vst [vmem:[#allocation4 + $0x18] sm:$0xff] %v1813_v18  ;;  %2216 = vmatpush.msrb.mxu2 %v2072_v14  ;;  %v2039_v18 = vld [vmem:[%s3897_s6 + $0x260] sm:$0xff]  ;;  %2197 = vmatpush.msrb.mxu1 %v2055_v20  ;;  %v2081_v6 = vld [vmem:[%s3897_s6 + $0x3b0] sm:$0xff]  ;;  %v2062_v19 = vld [vmem:[%s3897_s6 + $0x318] sm:$0xff] }
 0x39a   : > { %2236 = vmatpush.msrb.mxu3 %v2088_v16  ;;  %2177 = vmatpush.msrb.mxu0 %v2039_v18  ;;  %v2029_v14 = vld [vmem:[%s3897_s6 + $0x210] sm:$0xff] }
 0x39b   : > { %2217 = vmatpush.msrb.mxu2 %v2071_v22  ;;  %2198 = vmatpush.msrb.mxu1 %v2054_v32  ;;  %v2045_v16 = vld [vmem:[%s3897_s6 + $0x290] sm:$0xff]  ;;  %v2027_v32 = vld [vmem:[%s3897_s6 + $0x200] sm:$0xff] }
 0x39c   : > { %2237 = vmatpush.msrb.mxu3 %v2087_v43  ;;  %2178 = vmatpush.msrb.mxu0 %v2038_v9  ;;  %v2061_v18 = vld [vmem:[%s3897_s6 + $0x310] sm:$0xff]  ;;  %v2076_v9 = vld [vmem:[%s3897_s6 + $0x388] sm:$0xff] }
 0x39d   : > { %2218 = vmatpush.msrb.mxu2 %v2070_v15 }
 0x39e   : > { %2238 = vmatpush.msrb.mxu3 %v2086_v59 }
 0x3a0   : > { %v1874_v40 = vld [vmem:[#allocation4 + $0x18] ss:$0 sm:$0xff]  ;;  %v1876_v42 = vld [vmem:[#allocation4 + $0x19] ss:$0 sm:$0xff]  ;;  %v1878_v46 = vld [vmem:[#allocation4 + $0x1a] ss:$0 sm:$0xff] }
 0x3a1   : > { %1875 = vst [vmem:[#allocation5 + $0x3] sm:$0x1] %v1874_v40  ;;  %v1880_v47 = vld [vmem:[#allocation4 + $0x1b] ss:$0 sm:$0xff]  ;;  %v1882_v45 = vld [vmem:[#allocation4 + $0x1c] ss:$0 sm:$0xff] }
 0x3a2   : > { %1877 = vst [vmem:[#allocation5 + $0xb] sm:$0x1] %v1876_v42  ;;  %v1884_v21 = vld [vmem:[#allocation4 + $0x1d] ss:$0 sm:$0xff]  ;;  %v1886_v33 = vld [vmem:[#allocation4 + $0x1e] ss:$0 sm:$0xff] }
 0x3a3   : > { %1879 = vst [vmem:[#allocation5 + $0x13] sm:$0x1] %v1878_v46  ;;  %v1888_v24 = vld [vmem:[#allocation4 + $0x1f] ss:$0 sm:$0xff]  ;;  %v2037_v40 = vld [vmem:[%s3897_s6 + $0x250] sm:$0xff] }
 0x3a4   : > { %1881 = vst [vmem:[#allocation5 + $0x1b] sm:$0x1] %v1880_v47  ;;  %v2053_v42 = vld [vmem:[%s3897_s6 + $0x2d0] sm:$0xff]  ;;  %2179 = vmatpush.msrb.mxu0 %v2037_v40 }
 0x3a5   : > { %1883 = vst [vmem:[#allocation5 + $0x23] sm:$0x1] %v1882_v45  ;;  %v2069_v45 = vld [vmem:[%s3897_s6 + $0x350] sm:$0xff]  ;;  %2199 = vmatpush.msrb.mxu1 %v2053_v42 }
 0x3a6   : > { %1885 = vst [vmem:[#allocation5 + $0x2b] sm:$0x1] %v1884_v21  ;;  %v2085_v21 = vld [vmem:[%s3897_s6 + $0x3d0] sm:$0xff]  ;;  %2219 = vmatpush.msrb.mxu2 %v2069_v45 }
 0x3a7   : > { %1887 = vst [vmem:[#allocation5 + $0x33] sm:$0x1] %v1886_v33  ;;  %v2036_v33 = vld [vmem:[%s3897_s6 + $0x248] sm:$0xff]  ;;  %2239 = vmatpush.msrb.mxu3 %v2085_v21 }
 0x3a8   : > { %1889 = vst [vmem:[#allocation5 + $0x3b] sm:$0x1] %v1888_v24  ;;  %v2068_v24 = vld [vmem:[%s3897_s6 + $0x348] sm:$0xff]  ;;  %2180 = vmatpush.msrb.mxu0 %v2036_v33 }
 0x3a9   : > { %2220 = vmatpush.msrb.mxu2 %v2068_v24  ;;  %2240 = vmatpush.msrb.mxu3 %v2084_v54  ;;  %v2259_v54 = vld [vmem:[%s3899_s8 + $0x18] sm:$0xff] }
 0x3aa   : > { %2181 = vmatpush.msrb.mxu0 %v2035_v48  ;;  %v2257_v48 = vld [vmem:[%s3899_s8 + $0x8] sm:$0xff] }
 0x3ab   : > { %2221 = vmatpush.msrb.mxu2 %v2067_v49  ;;  %2241 = vmatpush.msrb.mxu3 %v2083_v62  ;;  %v2450_v49 = vld [vmem:[%s3898_s7] ss:$0 sm:$0xff] }
 0x3ac   : > { %2182 = vmatpush.msrb.mxu0 %v2034_v52 }
 0x3ad   : > { %2222 = vmatpush.msrb.mxu2 %v2066_v28  ;;  %2242 = vmatpush.msrb.mxu3 %v2082_v0 }
 0x3ae   : > { %2183 = vmatpush.msrb.mxu0 %v2033_v2 }
 0x3af   : > { %2223 = vmatpush.msrb.mxu2 %v2065_v44  ;;  %2243 = vmatpush.msrb.mxu3 %v2081_v6 }
 0x3db   : > { %v1807_v7 = vpop.f32.mrf.mxu3 }
 0x3dc   : > { %v1808_v8 = vadd.f32 %v1807_v7, %v3402_v58  ;;  %v2032_v7 = vld [vmem:[%s3897_s6 + $0x228] sm:$0xff] }
 0x3dd   : > { %2184 = vmatpush.msrb.mxu0 %v2032_v7 }
 0x3de   : > { %v1817_v57 = vmax.f32 %v1808_v8, 0.0  ;;  %v2048_v8 = vld [vmem:[%s3897_s6 + $0x2a8] sm:$0xff] }
 0x3e0   : > { %1825 = vst [vmem:[#allocation4 + $0x38] sm:$0xff] %v1817_v57  ;;  %v1787_v61 = vpop.f32.mrf.mxu2  ;;  %v2064_v57 = vld [vmem:[%s3897_s6 + $0x328] sm:$0xff] }
 0x3e1   : > { %v1788_v60 = vadd.f32 %v1787_v61, %v3402_v58  ;;  %v2080_v61 = vld [vmem:[%s3897_s6 + $0x3a8] sm:$0xff]  ;;  %2224 = vmatpush.msrb.mxu2 %v2064_v57 }
 0x3e2   : > { %v1747_v17 = vpop.f32.mrf.mxu0  ;;  %v1767_v30 = vpop.f32.mrf.mxu1  ;;  %2244 = vmatpush.msrb.mxu3 %v2080_v61 }
 0x3e3   : > { %v1816_v11 = vmax.f32 %v1788_v60, 0.0  ;;  %v1748_v39 = vadd.f32 %v1747_v17, %v3402_v58  ;;  %v1768_v47 = vadd.f32 %v1767_v30, %v3402_v58  ;;  %v2052_v58 = vld [vmem:[%s3897_s6 + $0x2c8] sm:$0xff]  ;;  %v2031_v60 = vld [vmem:[%s3897_s6 + $0x220] sm:$0xff]  ;;  %2225 = vmatpush.msrb.mxu2 %v2063_v5 }
 0x3e4   : > { %2200 = vmatpush.msrb.mxu1 %v2052_v58  ;;  %2185 = vmatpush.msrb.mxu0 %v2031_v60  ;;  %v2059_v17 = vld [vmem:[%s3897_s6 + $0x300] sm:$0xff]  ;;  %v2451_v5 = vld [vmem:[#allocation6] ss:$0 sm:$0xff] }
 0x3e5   : > { %1824 = vst [vmem:[#allocation4 + $0x30] sm:$0xff] %v1816_v11  ;;  %v1814_v38 = vmax.f32 %v1748_v39, 0.0  ;;  %v1815_v53 = vmax.f32 %v1768_v47, 0.0  ;;  %v2046_v11 = vld [vmem:[%s3897_s6 + $0x298] sm:$0xff]  ;;  %2245 = vmatpush.msrb.mxu3 %v2079_v4  ;;  %2226 = vmatpush.msrb.mxu2 %v2062_v19 }
 0x3e6   : > { %2201 = vmatpush.msrb.mxu1 %v2051_v41  ;;  %2186 = vmatpush.msrb.mxu0 %v2030_v3  ;;  %v2256_v41 = vld [vmem:[%s3899_s8] sm:$0xff] }
 0x3e7   : > { %v1938_v13 = vld [vmem:[#allocation4 + $0x38] ss:$0 sm:$0xff]  ;;  %v1940_v23 = vld [vmem:[#allocation4 + $0x39] ss:$0 sm:$0xff]  ;;  %v1942_v25 = vld [vmem:[#allocation4 + $0x3a] ss:$0 sm:$0xff]  ;;  %2246 = vmatpush.msrb.mxu3 %v2078_v12  ;;  %2227 = vmatpush.msrb.mxu2 %v2061_v18 }
 0x3e8   : > { %1939 = vst [vmem:[#allocation5 + $0x7] sm:$0x1] %v1938_v13  ;;  %v1944_v26 = vld [vmem:[#allocation4 + $0x3b] ss:$0 sm:$0xff]  ;;  %v1946_v1 = vld [vmem:[#allocation4 + $0x3c] ss:$0 sm:$0xff]  ;;  %2202 = vmatpush.msrb.mxu1 %v2050_v55  ;;  %2187 = vmatpush.msrb.mxu0 %v2029_v14 }
 0x3e9   : > { %1941 = vst [vmem:[#allocation5 + $0xf] sm:$0x1] %v1940_v23  ;;  %v1948_v63 = vld [vmem:[#allocation4 + $0x3d] ss:$0 sm:$0xff]  ;;  %v1950_v29 = vld [vmem:[#allocation4 + $0x3e] ss:$0 sm:$0xff] }
 0x3ea   : > { %1943 = vst [vmem:[#allocation5 + $0x17] sm:$0x1] %v1942_v25  ;;  %v1952_v35 = vld [vmem:[#allocation4 + $0x3f] ss:$0 sm:$0xff]  ;;  %2203 = vmatpush.msrb.mxu1 %v2049_v51  ;;  %v2077_v23 = vld [vmem:[%s3897_s6 + $0x390] sm:$0xff]  ;;  %v2028_v25 = vld [vmem:[%s3897_s6 + $0x208] sm:$0xff] }
 0x3eb   : > { %1945 = vst [vmem:[#allocation5 + $0x1f] sm:$0x1] %v1944_v26  ;;  %2247 = vmatpush.msrb.mxu3 %v2077_v23  ;;  %2188 = vmatpush.msrb.mxu0 %v2028_v25 }
 0x3ec   : > { %1947 = vst [vmem:[#allocation5 + $0x27] sm:$0x1] %v1946_v1  ;;  %v1922_v10 = vld [vmem:[#allocation4 + $0x30] ss:$0 sm:$0xff]  ;;  %v1924_v31 = vld [vmem:[#allocation4 + $0x31] ss:$0 sm:$0xff]  ;;  %2204 = vmatpush.msrb.mxu1 %v2048_v8 }
 0x3ed   : > { %1949 = vst [vmem:[#allocation5 + $0x2f] sm:$0x1] %v1948_v63  ;;  %v1926_v36 = vld [vmem:[#allocation4 + $0x32] ss:$0 sm:$0xff]  ;;  %v1928_v27 = vld [vmem:[#allocation4 + $0x33] ss:$0 sm:$0xff]  ;;  %2248 = vmatpush.msrb.mxu3 %v2076_v9  ;;  %2189 = vmatpush.msrb.mxu0 %v2027_v32 }
 0x3ee   : > { %1951 = vst [vmem:[#allocation5 + $0x37] sm:$0x1] %v1950_v29  ;;  %v1930_v34 = vld [vmem:[#allocation4 + $0x34] ss:$0 sm:$0xff]  ;;  %v1932_v37 = vld [vmem:[#allocation4 + $0x35] ss:$0 sm:$0xff]  ;;  %2205 = vmatpush.msrb.mxu1 %v2047_v56 }
 0x3ef   : > { %1953 = vst [vmem:[#allocation5 + $0x3f] sm:$0x1] %v1952_v35  ;;  %v1934_v46 = vld [vmem:[#allocation4 + $0x36] ss:$0 sm:$0xff]  ;;  %v1936_v50 = vld [vmem:[#allocation4 + $0x37] ss:$0 sm:$0xff] }
 0x3f0   : > { %1923 = vst [vmem:[#allocation5 + $0x6] sm:$0x1] %v1922_v10  ;;  %2206 = vmatpush.msrb.mxu1 %v2046_v11  ;;  %v2044_v1 = vld [vmem:[%s3897_s6 + $0x288] sm:$0xff]  ;;  %v2043_v35 = vld [vmem:[%s3897_s6 + $0x280] sm:$0xff] }
 0x3f1   : > { %1925 = vst [vmem:[#allocation5 + $0xe] sm:$0x1] %v1924_v31  ;;  %v2060_v63 = vld [vmem:[%s3897_s6 + $0x308] sm:$0xff]  ;;  %v2075_v31 = vld [vmem:[%s3897_s6 + $0x380] sm:$0xff] }
 0x3f2   : > { %1927 = vst [vmem:[#allocation5 + $0x16] sm:$0x1] %v1926_v36  ;;  %2207 = vmatpush.msrb.mxu1 %v2045_v16  ;;  %2228 = vmatpush.msrb.mxu2 %v2060_v63 }
 0x3f3   : > { %1929 = vst [vmem:[#allocation5 + $0x1e] sm:$0x1] %v1928_v27  ;;  %2249 = vmatpush.msrb.mxu3 %v2075_v31 }
 0x3f4   : > { %1931 = vst [vmem:[#allocation5 + $0x26] sm:$0x1] %v1930_v34  ;;  %2208 = vmatpush.msrb.mxu1 %v2044_v1  ;;  %2229 = vmatpush.msrb.mxu2 %v2059_v17 }
 0x3f5   : > { %1933 = vst [vmem:[#allocation5 + $0x2e] sm:$0x1] %v1932_v37 }
 0x3f6   : > { %1935 = vst [vmem:[#allocation5 + $0x36] sm:$0x1] %v1934_v46  ;;  %2209 = vmatpush.msrb.mxu1 %v2043_v35 }
 0x3f7   : > { %1937 = vst [vmem:[#allocation5 + $0x3e] sm:$0x1] %v1936_v50 }
 0x3f8   : > { %1822 = vst [vmem:[#allocation4 + $0x20] sm:$0xff] %v1814_v38  ;;  %v2258_v38 = vld [vmem:[%s3899_s8 + $0x10] sm:$0xff] }
 0x3f9   : > { %1823 = vst [vmem:[#allocation4 + $0x28] sm:$0xff] %v1815_v53 }
 0x3ff   : > { %v1890_v20 = vld [vmem:[#allocation4 + $0x20] ss:$0 sm:$0xff]  ;;  %v1892_v22 = vld [vmem:[#allocation4 + $0x21] ss:$0 sm:$0xff]  ;;  %v1894_v43 = vld [vmem:[#allocation4 + $0x22] ss:$0 sm:$0xff] }
 0x400   : > { %1891 = vst [vmem:[#allocation5 + $0x4] sm:$0x1] %v1890_v20  ;;  %v1896_v13 = vld [vmem:[#allocation4 + $0x23] ss:$0 sm:$0xff]  ;;  %v1898_v26 = vld [vmem:[#allocation4 + $0x24] ss:$0 sm:$0xff] }
 0x401   : > { %1893 = vst [vmem:[#allocation5 + $0xc] sm:$0x1] %v1892_v22  ;;  %v1900_v29 = vld [vmem:[#allocation4 + $0x25] ss:$0 sm:$0xff]  ;;  %v1902_v15 = vld [vmem:[#allocation4 + $0x26] ss:$0 sm:$0xff] }
 0x402   : > { %1895 = vst [vmem:[#allocation5 + $0x14] sm:$0x1] %v1894_v43  ;;  %v1904_v10 = vld [vmem:[#allocation4 + $0x27] ss:$0 sm:$0xff]  ;;  %v1906_v36 = vld [vmem:[#allocation4 + $0x28] ss:$0 sm:$0xff] }
 0x403   : > { %1897 = vst [vmem:[#allocation5 + $0x1c] sm:$0x1] %v1896_v13  ;;  %v1908_v30 = vld [vmem:[#allocation4 + $0x29] ss:$0 sm:$0xff]  ;;  %v1910_v27 = vld [vmem:[#allocation4 + $0x2a] ss:$0 sm:$0xff] }
 0x404   : > { %1899 = vst [vmem:[#allocation5 + $0x24] sm:$0x1] %v1898_v26  ;;  %v1912_v34 = vld [vmem:[#allocation4 + $0x2b] ss:$0 sm:$0xff]  ;;  %v1914_v39 = vld [vmem:[#allocation4 + $0x2c] ss:$0 sm:$0xff] }
 0x405   : > { %1901 = vst [vmem:[#allocation5 + $0x2c] sm:$0x1] %v1900_v29  ;;  %v1916_v37 = vld [vmem:[#allocation4 + $0x2d] ss:$0 sm:$0xff]  ;;  %v1918_v59 = vld [vmem:[#allocation4 + $0x2e] ss:$0 sm:$0xff] }
 0x406   : > { %1903 = vst [vmem:[#allocation5 + $0x34] sm:$0x1] %v1902_v15  ;;  %v1920_v40 = vld [vmem:[#allocation4 + $0x2f] ss:$0 sm:$0xff] }
 0x407   : > { %1905 = vst [vmem:[#allocation5 + $0x3c] sm:$0x1] %v1904_v10 }
 0x408   : > { %1907 = vst [vmem:[#allocation5 + $0x5] sm:$0x1] %v1906_v36 }
 0x409   : > { %1909 = vst [vmem:[#allocation5 + $0xd] sm:$0x1] %v1908_v30 }
 0x40a   : > { %1911 = vst [vmem:[#allocation5 + $0x15] sm:$0x1] %v1910_v27 }
 0x40b   : > { %1913 = vst [vmem:[#allocation5 + $0x1d] sm:$0x1] %v1912_v34 }
 0x40c   : > { %1915 = vst [vmem:[#allocation5 + $0x25] sm:$0x1] %v1914_v39 }
 0x40d   : > { %1917 = vst [vmem:[#allocation5 + $0x2d] sm:$0x1] %v1916_v37 }
 0x40e   : > { %1919 = vst [vmem:[#allocation5 + $0x35] sm:$0x1] %v1918_v59 }
 0x40f   : > { %1921 = vst [vmem:[#allocation5 + $0x3d] sm:$0x1] %v1920_v40  ;;  %v1954_v42 = vld [vmem:[#allocation5] sm:$0xff] }
 0x410   : > { %2110 = vmatmul.f32.vlgmr.msra.gmra.mxu0 %v1954_v42  ;;  %v1955_v46 = vld [vmem:[#allocation5 + $0x8] sm:$0xff] }
 0x411   : > { %2130 = vmatmul.f32.vlgmr.msra.gmra.mxu1 %v1955_v46  ;;  %v1956_v47 = vld [vmem:[#allocation5 + $0x10] sm:$0xff]  ;;  %2279 = vmatpush.msra.mxu0 %v2259_v54 }
 0x412   : > { %2150 = vmatmul.f32.vlgmr.msra.gmra.mxu2 %v1956_v47  ;;  %v1957_v45 = vld [vmem:[#allocation5 + $0x18] sm:$0xff] }
 0x413   : > { %2170 = vmatmul.f32.vlgmr.msra.gmra.mxu3 %v1957_v45  ;;  %v1958_v21 = vld [vmem:[#allocation5 + $0x20] sm:$0xff]  ;;  %2280 = vmatpush.msra.mxu0 %v2258_v38 }
 0x414   : > { %v1959_v33 = vld [vmem:[#allocation5 + $0x28] sm:$0xff] }
 0x415   : > { %v1960_v58 = vld [vmem:[#allocation5 + $0x30] sm:$0xff]  ;;  %2281 = vmatpush.msra.mxu0 %v2257_v48 }
 0x416   : > { %v1961_v24 = vld [vmem:[#allocation5 + $0x38] sm:$0xff] }
 0x417   : > { %2282 = vmatpush.msra.mxu0 %v2256_v41 }
 0x418   : > { %2190 = vmatmul.f32.vlgmr.msrb.gmra.mxu0 %v1958_v21 }
 0x419   : > { %2210 = vmatmul.f32.vlgmr.msrb.gmra.mxu1 %v1959_v33 }
 0x41a   : > { %2230 = vmatmul.f32.vlgmr.msrb.gmra.mxu2 %v1960_v58 }
 0x41b   : > { %2250 = vmatmul.f32.vlgmr.msrb.gmra.mxu3 %v1961_v24 }
 0x48d   : > { %v2111_v50 = vpop.f32.mrf.mxu0 }
 0x48e   : > { %v2112_v62 = vadd.f32 %v2450_v49, %v2111_v50  ;;  %v2131_v52 = vpop.f32.mrf.mxu1 }
 0x490   : > { %v2132_v53 = vadd.f32 %v2131_v52, %v2112_v62 }
 0x495   : > { %v2151_v55 = vpop.f32.mrf.mxu2  ;;  %v2191_v51 = vpop.f32.mrf.mxu0 }
 0x496   : > { %v2152_v28 = vadd.f32 %v2151_v55, %v2132_v53  ;;  %v2171_v0 = vpop.f32.mrf.mxu3  ;;  %v2211_v6 = vpop.f32.mrf.mxu1 }
 0x498   : > { %v2172_v2 = vadd.f32 %v2171_v0, %v2152_v28 }
 0x49a   : > { %v2192_v44 = vadd.f32 %v2191_v51, %v2172_v2 }
 0x49c   : > { %v2212_v7 = vadd.f32 %v2211_v6, %v2192_v44 }
 0x49d   : > { %v2231_v8 = vpop.f32.mrf.mxu2 }
 0x49e   : > { %v2232_v57 = vadd.f32 %v2231_v8, %v2212_v7  ;;  %v2251_v61 = vpop.f32.mrf.mxu3 }
 0x4a0   : > { %v2252_v60 = vadd.f32 %v2251_v61, %v2232_v57 }
 0x4a2   : > { %v2254_v56 = vmax.f32 %v2252_v60, 0.0 }
 0x4a4   : > { %2419 = vmatmul.msk.f32.vlgmr.msra.gmra.mxu0 %vm2263_vm0, %v2254_v56 }
 0x521   : > { %v2284_v4 = vpop.f32.mrf.mxu0 }
 0x522   : > { %v2285_v3 = vadd.f32 %v2451_v5, %v2284_v4 }
 0x524   : > { %2300 = vrot.lane.b32.xlu2 %v2285_v3, %s2535_s12  ;;  %2295 = vrot.lane.b32.xlu1 %v2285_v3, %s2536_s14  ;;  %2288 = vst.msk [vmem:[%s3878_s11] sm:$0x1] %vm2287_vm12, %v2285_v3 }
 0x525   : > { %2290 = vrot.lane.b32.xlu0 %v2285_v3, %s2537_s17 }
 0x52c   : > { %2315 = vrot.lane.b32.xlu2 %v2285_v3, %s2538_s9  ;;  %2310 = vrot.lane.b32.xlu1 %v2285_v3, %s2539_s18 }
 0x52d   : > { %2305 = vrot.lane.b32.xlu0 %v2285_v3, %s2540_s19 }
 0x535   : > { %2320 = vrot.lane.b32.xlu0 %v2285_v3, %s2541_s16 }
 0x57e   : > { %v2301_v19 = vpop.permute.xlu2 %2300 }
 0x586   : > { %v2316_v18 = vpop.permute.xlu2 %2315 }
 0x596   : > { %v2296_v11 = vpop.permute.xlu1 %2295 }
 0x597   : > { %v2291_v12 = vpop.permute.xlu0 %2290 }
 0x598   : > { %2294 = vst.msk [vmem:[%s3878_s11 - $0x1] sm:$0x2] %vm2293_vm13, %v2291_v12 }
 0x599   : > { %2299 = vst.msk [vmem:[%s3878_s11 - $0x2] sm:$0x4] %vm2298_vm9, %v2296_v11 }
 0x59a   : > { %2304 = vst.msk [vmem:[%s3878_s11 - $0x3] sm:$0x8] %vm2303_vm4, %v2301_v19 }
 0x59e   : > { %v2311_v14 = vpop.permute.xlu1 %2310 }
 0x59f   : > { %v2306_v16 = vpop.permute.xlu0 %2305 }
 0x5a0   : > { %2309 = vst.msk [vmem:[%s3878_s11 - $0x4] sm:$0x10] %vm2308_vm14, %v2306_v16 }
 0x5a1   : > { %2314 = vst.msk [vmem:[%s3878_s11 - $0x5] sm:$0x20] %vm2313_vm6, %v2311_v14 }
 0x5a2   : > { %2319 = vst.msk [vmem:[%s3878_s11 - $0x6] sm:$0x40] %vm2318_vm2, %v2316_v18 }
 0x5a7   : > { %v2321_v20 = vpop.permute.xlu0 %2320 }
 0x5a8   : > { %2324 = vst.msk [vmem:[%s3878_s11 - $0x7] sm:$0x80] %vm2323_vm15, %v2321_v20 }
 0x5a9 PF: > { %s22_s15 = sadd.s32 1, %s2522_s15  }
 0x5aa   : > { %p19_p5 = scmp.ge.s32.totalorder %s22_s15, 4  }
 0x5ac   :  { %21 = sbr.rel (!%p19_p5) target bundleno = 3 (0x3), region = 106 }

</bundles_post_ra>
